<compile_context>
chip_gen: v5e
topology: v5e:2x2
jax: 0.10.0
libtpu: 0.0.40
codegen_flags: <defaults>
</compile_context>

<pallas_src>
import functools

import jax
import jax.numpy as jnp
from jax.experimental import pallas as pl
from jax.experimental.pallas import tpu as pltpu

EPS = 1e-5   # nn.BatchNorm2d default eps
LANE = 128   # TPU lane width


def _round_up(v, m):
    return (v + m - 1) // m * m


# ------------------------------ Pallas kernel ------------------------------

def _res2d_kernel(x_ref, wa_ref, sa_ref, ba_ref, w2_ref, s2_ref, b2_ref,
                  out_ref, hpad_ref, him_ref, *, bt, ho, wo, cp):
    """Fused Res_2d forward for a block of `bt` images.

    x_ref   : (bt, Ho*Wo, 9*Cin)   bf16  im2col of the stride-2 3x3 taps of x
    wa_ref  : (9*Cin, 2*CP)        bf16  fused [conv1 | conv3] im2col weights
    sa_ref  : (1, 2*CP)            f32   folded BN scale  [bn1 | bn3]
    ba_ref  : (1, 2*CP)            f32   folded BN bias   [bn1 | bn3]
    w2_ref  : (9*CP, CP)           bf16  conv2 im2col weights (kw-major, kh-minor)
    s2_ref  : (1, CP)              f32   folded bn2 scale
    b2_ref  : (1, CP)              f32   folded bn2 bias
    out_ref : (bt, Ho*Wo, CP)      bf16  lane-dense output
    hpad_ref: (bt, Ho+2, Wo+2, CP) bf16  scratch: zero-haloed stage-1 activation
    him_ref : (bt*Ho*Wo, 9*CP)     bf16  scratch: im2col of h for conv2
    """
    m = ho * wo
    rows = bt * m

    # ---- stage 1: conv1(x) and conv3(x) fused into ONE matmul
    # (K = 9*Cin, N = 2*CP); x stays bf16 end-to-end (no f32 up-cast).
    xt = x_ref[...].reshape(rows, x_ref.shape[-1])
    z = jnp.dot(xt, wa_ref[...], preferred_element_type=jnp.float32)
    z = z * sa_ref[...] + ba_ref[...]                        # folded BN affine (f32)
    h = jnp.maximum(z[:, :cp], 0.0).astype(jnp.bfloat16)     # relu(bn1(conv1(x)))
    sc = z[:, cp:]                                           # bn3(conv3(x)) shortcut

    # ---- stage 2: store h ONCE into the zero-haloed bf16 scratch; zero only
    # the 1-pixel border, every step (safe with the batch axis "parallel").
    hpad_ref[:, 1:1 + ho, 1:1 + wo, :] = h.reshape(bt, ho, wo, cp)
    zrow = jnp.zeros((bt, 1, wo + 2, cp), jnp.bfloat16)
    hpad_ref[:, 0:1, :, :] = zrow
    hpad_ref[:, ho + 1:ho + 2, :, :] = zrow
    zcol = jnp.zeros((bt, ho, 1, cp), jnp.bfloat16)
    hpad_ref[:, 1:1 + ho, 0:1, :] = zcol
    hpad_ref[:, 1:1 + ho, wo + 1:wo + 2, :] = zcol

    # Build the (rows, 9*CP) im2col of h: the W (sublane) shift is done only 3
    # times (kw hoisted out of the kh loop), H-axis slices are free, and the
    # scratch stores are lane-aligned (offsets are multiples of CP=128).
    for kw in range(3):
        wsl = hpad_ref[:, :, kw:kw + wo, :]                  # (bt, ho+2, wo, cp)
        for kh in range(3):
            t = kw * 3 + kh
            him_ref[:, t * cp:(t + 1) * cp] = wsl[:, kh:kh + ho].reshape(rows, cp)

    # conv2 as ONE matmul with K = 9*CP (accumulation on the MXU result path).
    acc2 = jnp.dot(him_ref[...], w2_ref[...], preferred_element_type=jnp.float32)

    # out = relu(bn2(conv2(h)) + shortcut) -- f32 epilogue, bf16 store.
    out = jnp.maximum(acc2 * s2_ref[...] + b2_ref[...] + sc, 0.0)
    out_ref[...] = out.reshape(bt, m, cp).astype(out_ref.dtype)


# ------------------------------ pallas_call wrapper ------------------------------

def _res2d_call(xim, wa, sa, ba, w2, s2, b2, *, bt, ho, wo, cp):
    n, m, kin = xim.shape

    kernel = functools.partial(_res2d_kernel, bt=bt, ho=ho, wo=wo, cp=cp)

    def const_spec(a):
        nd = a.ndim
        return pl.BlockSpec(a.shape, lambda i, _nd=nd: (0,) * _nd)

    flops = 2 * n * m * (kin * 2 * cp + 9 * cp * cp)
    bytes_accessed = ((xim.size + wa.size + w2.size + n * m * cp) * 2
                      + (sa.size + ba.size + s2.size + b2.size) * 4)

    return pl.pallas_call(
        kernel,
        grid=(n // bt,),
        in_specs=[
            pl.BlockSpec((bt, m, kin), lambda i: (i, 0, 0)),
            const_spec(wa), const_spec(sa), const_spec(ba),
            const_spec(w2), const_spec(s2), const_spec(b2),
        ],
        out_specs=pl.BlockSpec((bt, m, cp), lambda i: (i, 0, 0)),
        out_shape=jax.ShapeDtypeStruct((n, m, cp), jnp.bfloat16),
        scratch_shapes=[
            pltpu.VMEM((bt, ho + 2, wo + 2, cp), jnp.bfloat16),
            pltpu.VMEM((bt * m, 9 * cp), jnp.bfloat16),
        ],
        compiler_params=pltpu.CompilerParams(
            dimension_semantics=("parallel",),
            vmem_limit_bytes=32 * 1024 * 1024),
        cost_estimate=pl.CostEstimate(flops=flops, transcendentals=0,
                                      bytes_accessed=bytes_accessed),
    )(xim, wa, sa, ba, w2, s2, b2)


# ------------------------------ JAX glue ------------------------------

def fold_bn(conv_bias, gamma, beta, mean, var, eps=EPS):
    """Fold conv bias + inference-mode BatchNorm into per-channel (scale, bias)."""
    scale = gamma / jnp.sqrt(var + eps)
    bias = beta + scale * (conv_bias - mean)
    return scale, bias


def _pad_row(v, cp):
    return jnp.pad(v, (0, cp - v.shape[0])).reshape(1, cp).astype(jnp.float32)


def _w_im2col_stage1(w, cp):
    """(Cout,Cin,K,K) -> (K*K*Cin, CP): rows ordered (kh, kw, cin), cols zero-padded."""
    cout, cin, kh, kw = w.shape
    t = jnp.transpose(w, (2, 3, 1, 0)).reshape(kh * kw * cin, cout)
    return jnp.pad(t, ((0, 0), (0, cp - cout)))


def _w_im2col_stage2(w, cp):
    """(Cout,Cin,K,K) -> (K*K*CP, CP): rows ordered (kw, kh, cin_padded)."""
    cout, cin, kh, kw = w.shape
    t = jnp.transpose(w, (3, 2, 1, 0))                        # (kw, kh, cin, cout)
    t = jnp.pad(t, ((0, 0), (0, 0), (0, cp - cin), (0, cp - cout)))
    return t.reshape(kh * kw * cp, cp)


def _pick_block_batch(n, m, target_rows=256):
    """Largest divisor of n keeping the stacked MXU row count (bt*m) near target."""
    cap = max(1, target_rows // max(m, 1))
    bt = 1
    for d in range(1, min(n, cap) + 1):
        if n % d == 0:
            bt = d
    return bt


def res2d_forward(x_nchw, p, stride=2, k=3, block_batch=None):
    assert stride == 2 and k == 3, "implements the Res_2d default (3x3, stride 2)"
    n, cin, h, w = x_nchw.shape
    cout = p['w1'].shape[0]
    cp = _round_up(cout, LANE)
    pad = k // 2

    ho = (h + 2 * pad - k) // stride + 1
    wo = (w + 2 * pad - k) // stride + 1
    m = ho * wo
    kin = k * k * cin

    # NCHW -> NHWC, halo pad, then a tiny (N, Ho*Wo, 9*Cin) bf16 im2col so the
    # in-kernel stage-1 conv is ONE matmul (all taps folded into K).
    x = jnp.transpose(x_nchw, (0, 2, 3, 1)).astype(jnp.float32)
    xp = jnp.pad(x, ((0, 0), (pad, pad), (pad, pad), (0, 0)))
    patches = []
    for kh in range(k):
        for kw in range(k):
            patches.append(xp[:, kh:kh + stride * (ho - 1) + 1:stride,
                               kw:kw + stride * (wo - 1) + 1:stride, :])
    xim = jnp.stack(patches, axis=3).reshape(n, m, kin).astype(jnp.bfloat16)

    s1, b1 = fold_bn(p['b1'], p['g1'], p['be1'], p['m1'], p['v1'])
    s2, b2 = fold_bn(p['b2'], p['g2'], p['be2'], p['m2'], p['v2'])
    s3, b3 = fold_bn(p['b3'], p['g3'], p['be3'], p['m3'], p['v3'])

    # conv1 and conv3 share their LHS -> fuse along the output-channel axis.
    wa = jnp.concatenate([_w_im2col_stage1(p['w1'], cp),
                          _w_im2col_stage1(p['w3'], cp)],
                         axis=-1).astype(jnp.bfloat16)        # (9*Cin, 2*CP)
    w2 = _w_im2col_stage2(p['w2'], cp).astype(jnp.bfloat16)   # (9*CP, CP)
    sa = jnp.concatenate([_pad_row(s1, cp), _pad_row(s3, cp)], axis=-1)
    ba = jnp.concatenate([_pad_row(b1, cp), _pad_row(b3, cp)], axis=-1)

    bt = block_batch or _pick_block_batch(n, m)

    out = _res2d_call(xim, wa, sa, ba, w2, _pad_row(s2, cp), _pad_row(b2, cp),
                      bt=bt, ho=ho, wo=wo, cp=cp)             # (N, Ho*Wo, CP) bf16
    out = out.reshape(n, ho, wo, cp)[:, :, :, :cout].astype(jnp.float32)
    return jnp.transpose(out, (0, 3, 1, 2))                   # NHWC -> NCHW


# ------------------------------ params & reference ------------------------------

def init_params(key, cin, cout, k=3):
    keys = jax.random.split(key, 18)
    def conv_w(kk, shape, fan_in):
        return jax.random.normal(kk, shape, jnp.float32) / jnp.sqrt(fan_in)
    p = {}
    p['w1'] = conv_w(keys[0], (cout, cin, k, k), cin * k * k)
    p['b1'] = 0.1 * jax.random.normal(keys[1], (cout,), jnp.float32)
    p['w2'] = conv_w(keys[2], (cout, cout, k, k), cout * k * k)
    p['b2'] = 0.1 * jax.random.normal(keys[3], (cout,), jnp.float32)
    p['w3'] = conv_w(keys[4], (cout, cin, k, k), cin * k * k)
    p['b3'] = 0.1 * jax.random.normal(keys[5], (cout,), jnp.float32)
    for i, off in zip((1, 2, 3), (6, 10, 14)):
        p[f'g{i}'] = 1.0 + 0.1 * jax.random.normal(keys[off], (cout,), jnp.float32)
        p[f'be{i}'] = 0.1 * jax.random.normal(keys[off + 1], (cout,), jnp.float32)
        p[f'm{i}'] = 0.1 * jax.random.normal(keys[off + 2], (cout,), jnp.float32)
        p[f'v{i}'] = 0.5 + jax.random.uniform(keys[off + 3], (cout,), jnp.float32)
    return p


def reference_forward(x, p, stride=2):
    """Pure-JAX replica of Res_2d.forward (inference-mode BN) for validation."""
    def conv(inp, w, b, s):
        y = jax.lax.conv_general_dilated(
            inp, w, (s, s), [(1, 1), (1, 1)],
            dimension_numbers=('NCHW', 'OIHW', 'NCHW'))
        return y + b[None, :, None, None]

    def bn(z, g, be, m, v):
        return ((z - m[None, :, None, None])
                * (g / jnp.sqrt(v + EPS))[None, :, None, None]
                + be[None, :, None, None])

    h = jax.nn.relu(bn(conv(x, p['w1'], p['b1'], stride),
                       p['g1'], p['be1'], p['m1'], p['v1']))
    out = bn(conv(h, p['w2'], p['b2'], 1), p['g2'], p['be2'], p['m2'], p['v2'])
    shortcut = bn(conv(x, p['w3'], p['b3'], stride),
                  p['g3'], p['be3'], p['m3'], p['v3'])
    return jax.nn.relu(out + shortcut)


# ------------------------------ main ------------------------------

if __name__ == "__main__":
    cin, cout = 4, 8        # Res_2d(input_channels=4, output_channels=8, shape=3, stride=2)
    key = jax.random.PRNGKey(0)
    kx, kp = jax.random.split(key)
    x = jax.random.normal(kx, (2, cin, 16, 16), jnp.float32)   # NCHW, small shapes
    params = init_params(kp, cin, cout)

    fwd = jax.jit(functools.partial(res2d_forward, stride=2))
    out = jax.block_until_ready(fwd(x, params))

    ref = jax.block_until_ready(reference_forward(x, params, stride=2))
    assert out.shape == (2, cout, 8, 8), out.shape
    # Relative-error check scaled to bf16 precision (bf16 MXU inputs + bf16 store).
    scale = float(jnp.max(jnp.abs(ref)))
    rel = float(jnp.max(jnp.abs(out - ref))) / max(scale, 1e-6)
    assert rel < 3e-2, f"max relative error too large: {rel}"

    print("KERNEL_OK")
</pallas_src>

<mosaic_0001>
module attributes {stable_mosaic.version = 11 : i64} {
  func.func @_res2d_kernel(%arg0: i32, %arg1: memref<2x64x36xbf16, #tpu.memory_space<vmem>>, %arg2: memref<36x256xbf16, #tpu.memory_space<vmem>>, %arg3: memref<1x256xf32, #tpu.memory_space<vmem>>, %arg4: memref<1x256xf32, #tpu.memory_space<vmem>>, %arg5: memref<1152x128xbf16, #tpu.memory_space<vmem>>, %arg6: memref<1x128xf32, #tpu.memory_space<vmem>>, %arg7: memref<1x128xf32, #tpu.memory_space<vmem>>, %arg8: memref<2x64x128xbf16, #tpu.memory_space<vmem>>, %arg9: memref<2x10x10x128xbf16, #tpu.memory_space<vmem>>, %arg10: memref<128x1152xbf16, #tpu.memory_space<vmem>>) attributes {dimension_semantics = [#tpu.dimension_semantics<parallel>], iteration_bounds = array<i64: 1>, scalar_prefetch = 0 : i64, scratch_operands = 2 : i64, tpu.core_type = #tpu.core_type<tc>, window_params = [{transform_indices = @transform_0, window_bounds = array<i64: 2, 64, 36>}, {pipeline_mode = #tpu.pipeline_mode<synchronous>, transform_indices = @transform_1, window_bounds = array<i64: 36, 256>}, {pipeline_mode = #tpu.pipeline_mode<synchronous>, transform_indices = @transform_2, window_bounds = array<i64: 1, 256>}, {pipeline_mode = #tpu.pipeline_mode<synchronous>, transform_indices = @transform_3, window_bounds = array<i64: 1, 256>}, {pipeline_mode = #tpu.pipeline_mode<synchronous>, transform_indices = @transform_4, window_bounds = array<i64: 1152, 128>}, {pipeline_mode = #tpu.pipeline_mode<synchronous>, transform_indices = @transform_5, window_bounds = array<i64: 1, 128>}, {pipeline_mode = #tpu.pipeline_mode<synchronous>, transform_indices = @transform_6, window_bounds = array<i64: 1, 128>}, {transform_indices = @transform_7, window_bounds = array<i64: 2, 64, 128>}]} {
    %c0 = arith.constant 0 : index
    %c0_0 = arith.constant 0 : index
    %c0_1 = arith.constant 0 : index
    %0 = vector.load %arg1[%c0, %c0_0, %c0_1] : memref<2x64x36xbf16, #tpu.memory_space<vmem>>, vector<2x64x36xbf16>
    %1 = vector.shape_cast %0 : vector<2x64x36xbf16> to vector<128x36xbf16>
    %c0_2 = arith.constant 0 : index
    %c0_3 = arith.constant 0 : index
    %2 = vector.load %arg2[%c0_2, %c0_3] : memref<36x256xbf16, #tpu.memory_space<vmem>>, vector<36x256xbf16>
    %cst = arith.constant dense<0.000000e+00> : vector<128x256xf32>
    %3 = tpu.matmul %1, %2, %cst {dimension_numbers = #tpu.dot_dimension_numbers<[1], [0], [0], [1], [0, 0, 1, 1], [], []>} : vector<128x36xbf16>, vector<36x256xbf16>, vector<128x256xf32> -> vector<128x256xf32>
    %c0_4 = arith.constant 0 : index
    %c0_5 = arith.constant 0 : index
    %4 = vector.load %arg3[%c0_4, %c0_5] : memref<1x256xf32, #tpu.memory_space<vmem>>, vector<1x256xf32>
    %5 = vector.broadcast %4 : vector<1x256xf32> to vector<128x256xf32>
    %6 = arith.mulf %3, %5 : vector<128x256xf32>
    %c0_6 = arith.constant 0 : index
    %c0_7 = arith.constant 0 : index
    %7 = vector.load %arg4[%c0_6, %c0_7] : memref<1x256xf32, #tpu.memory_space<vmem>>, vector<1x256xf32>
    %8 = vector.broadcast %7 : vector<1x256xf32> to vector<128x256xf32>
    %9 = arith.addf %6, %8 : vector<128x256xf32>
    %10 = vector.extract_strided_slice %9 {offsets = [0, 0], sizes = [128, 128], strides = [1, 1]} : vector<128x256xf32> to vector<128x128xf32>
    %cst_8 = arith.constant 0.000000e+00 : f32
    %11 = vector.broadcast %cst_8 : f32 to vector<128x128xf32>
    %12 = arith.maximumf %10, %11 : vector<128x128xf32>
    %13 = arith.truncf %12 : vector<128x128xf32> to vector<128x128xbf16>
    %14 = vector.extract_strided_slice %9 {offsets = [0, 128], sizes = [128, 128], strides = [1, 1]} : vector<128x256xf32> to vector<128x128xf32>
    %15 = vector.shape_cast %13 : vector<128x128xbf16> to vector<2x8x8x128xbf16>
    %c0_9 = arith.constant 0 : index
    %c1 = arith.constant 1 : index
    %c1_10 = arith.constant 1 : index
    %c0_11 = arith.constant 0 : index
    %16 = vector.load %arg9[%c0_9, %c1, %c1_10, %c0_11] : memref<2x10x10x128xbf16, #tpu.memory_space<vmem>>, vector<2x8x8x128xbf16>
    tpu.vector_store %arg9[%c0_9, %c1, %c1_10, %c0_11], %15 {strides = array<i32>} : memref<2x10x10x128xbf16, #tpu.memory_space<vmem>>, vector<2x8x8x128xbf16>,
    %cst_12 = arith.constant 0.000000e+00 : bf16
    %17 = vector.broadcast %cst_12 : bf16 to vector<2x1x10x128xbf16>
    %c0_13 = arith.constant 0 : index
    %c0_14 = arith.constant 0 : index
    %c0_15 = arith.constant 0 : index
    %c0_16 = arith.constant 0 : index
    %18 = vector.load %arg9[%c0_13, %c0_14, %c0_15, %c0_16] : memref<2x10x10x128xbf16, #tpu.memory_space<vmem>>, vector<2x1x10x128xbf16>
    tpu.vector_store %arg9[%c0_13, %c0_14, %c0_15, %c0_16], %17 {strides = array<i32>} : memref<2x10x10x128xbf16, #tpu.memory_space<vmem>>, vector<2x1x10x128xbf16>,
    %c0_17 = arith.constant 0 : index
    %c9 = arith.constant 9 : index
    %c0_18 = arith.constant 0 : index
    %c0_19 = arith.constant 0 : index
    %19 = vector.load %arg9[%c0_17, %c9, %c0_18, %c0_19] : memref<2x10x10x128xbf16, #tpu.memory_space<vmem>>, vector<2x1x10x128xbf16>
    tpu.vector_store %arg9[%c0_17, %c9, %c0_18, %c0_19], %17 {strides = array<i32>} : memref<2x10x10x128xbf16, #tpu.memory_space<vmem>>, vector<2x1x10x128xbf16>,
    %cst_20 = arith.constant 0.000000e+00 : bf16
    %20 = vector.broadcast %cst_20 : bf16 to vector<2x8x1x128xbf16>
    %c0_21 = arith.constant 0 : index
    %c1_22 = arith.constant 1 : index
    %c0_23 = arith.constant 0 : index
    %c0_24 = arith.constant 0 : index
    %21 = vector.load %arg9[%c0_21, %c1_22, %c0_23, %c0_24] : memref<2x10x10x128xbf16, #tpu.memory_space<vmem>>, vector<2x8x1x128xbf16>
    tpu.vector_store %arg9[%c0_21, %c1_22, %c0_23, %c0_24], %20 {strides = array<i32>} : memref<2x10x10x128xbf16, #tpu.memory_space<vmem>>, vector<2x8x1x128xbf16>,
    %c0_25 = arith.constant 0 : index
    %c1_26 = arith.constant 1 : index
    %c9_27 = arith.constant 9 : index
    %c0_28 = arith.constant 0 : index
    %22 = vector.load %arg9[%c0_25, %c1_26, %c9_27, %c0_28] : memref<2x10x10x128xbf16, #tpu.memory_space<vmem>>, vector<2x8x1x128xbf16>
    tpu.vector_store %arg9[%c0_25, %c1_26, %c9_27, %c0_28], %20 {strides = array<i32>} : memref<2x10x10x128xbf16, #tpu.memory_space<vmem>>, vector<2x8x1x128xbf16>,
    %c0_29 = arith.constant 0 : index
    %c0_30 = arith.constant 0 : index
    %c0_31 = arith.constant 0 : index
    %c0_32 = arith.constant 0 : index
    %23 = vector.load %arg9[%c0_29, %c0_30, %c0_31, %c0_32] : memref<2x10x10x128xbf16, #tpu.memory_space<vmem>>, vector<2x10x8x128xbf16>
    %24 = vector.extract_strided_slice %23 {offsets = [0, 0, 0, 0], sizes = [2, 8, 8, 128], strides = [1, 1, 1, 1]} : vector<2x10x8x128xbf16> to vector<2x8x8x128xbf16>
    %25 = vector.shape_cast %24 : vector<2x8x8x128xbf16> to vector<128x128xbf16>
    %c0_33 = arith.constant 0 : index
    %c0_34 = arith.constant 0 : index
    %26 = vector.load %arg10[%c0_33, %c0_34] : memref<128x1152xbf16, #tpu.memory_space<vmem>>, vector<128x128xbf16>
    tpu.vector_store %arg10[%c0_33, %c0_34], %25 {strides = array<i32>} : memref<128x1152xbf16, #tpu.memory_space<vmem>>, vector<128x128xbf16>,
    %27 = vector.extract_strided_slice %23 {offsets = [0, 1, 0, 0], sizes = [2, 8, 8, 128], strides = [1, 1, 1, 1]} : vector<2x10x8x128xbf16> to vector<2x8x8x128xbf16>
    %28 = vector.shape_cast %27 : vector<2x8x8x128xbf16> to vector<128x128xbf16>
    %c0_35 = arith.constant 0 : index
    %c128 = arith.constant 128 : index
    %29 = vector.load %arg10[%c0_35, %c128] : memref<128x1152xbf16, #tpu.memory_space<vmem>>, vector<128x128xbf16>
    tpu.vector_store %arg10[%c0_35, %c128], %28 {strides = array<i32>} : memref<128x1152xbf16, #tpu.memory_space<vmem>>, vector<128x128xbf16>,
    %30 = vector.extract_strided_slice %23 {offsets = [0, 2, 0, 0], sizes = [2, 8, 8, 128], strides = [1, 1, 1, 1]} : vector<2x10x8x128xbf16> to vector<2x8x8x128xbf16>
    %31 = vector.shape_cast %30 : vector<2x8x8x128xbf16> to vector<128x128xbf16>
    %c0_36 = arith.constant 0 : index
    %c256 = arith.constant 256 : index
    %32 = vector.load %arg10[%c0_36, %c256] : memref<128x1152xbf16, #tpu.memory_space<vmem>>, vector<128x128xbf16>
    tpu.vector_store %arg10[%c0_36, %c256], %31 {strides = array<i32>} : memref<128x1152xbf16, #tpu.memory_space<vmem>>, vector<128x128xbf16>,
    %c0_37 = arith.constant 0 : index
    %c0_38 = arith.constant 0 : index
    %c1_39 = arith.constant 1 : index
    %c0_40 = arith.constant 0 : index
    %33 = vector.load %arg9[%c0_37, %c0_38, %c1_39, %c0_40] : memref<2x10x10x128xbf16, #tpu.memory_space<vmem>>, vector<2x10x8x128xbf16>
    %34 = vector.extract_strided_slice %33 {offsets = [0, 0, 0, 0], sizes = [2, 8, 8, 128], strides = [1, 1, 1, 1]} : vector<2x10x8x128xbf16> to vector<2x8x8x128xbf16>
    %35 = vector.shape_cast %34 : vector<2x8x8x128xbf16> to vector<128x128xbf16>
    %c0_41 = arith.constant 0 : index
    %c384 = arith.constant 384 : index
    %36 = vector.load %arg10[%c0_41, %c384] : memref<128x1152xbf16, #tpu.memory_space<vmem>>, vector<128x128xbf16>
    tpu.vector_store %arg10[%c0_41, %c384], %35 {strides = array<i32>} : memref<128x1152xbf16, #tpu.memory_space<vmem>>, vector<128x128xbf16>,
    %37 = vector.extract_strided_slice %33 {offsets = [0, 1, 0, 0], sizes = [2, 8, 8, 128], strides = [1, 1, 1, 1]} : vector<2x10x8x128xbf16> to vector<2x8x8x128xbf16>
    %38 = vector.shape_cast %37 : vector<2x8x8x128xbf16> to vector<128x128xbf16>
    %c0_42 = arith.constant 0 : index
    %c512 = arith.constant 512 : index
    %39 = vector.load %arg10[%c0_42, %c512] : memref<128x1152xbf16, #tpu.memory_space<vmem>>, vector<128x128xbf16>
    tpu.vector_store %arg10[%c0_42, %c512], %38 {strides = array<i32>} : memref<128x1152xbf16, #tpu.memory_space<vmem>>, vector<128x128xbf16>,
    %40 = vector.extract_strided_slice %33 {offsets = [0, 2, 0, 0], sizes = [2, 8, 8, 128], strides = [1, 1, 1, 1]} : vector<2x10x8x128xbf16> to vector<2x8x8x128xbf16>
    %41 = vector.shape_cast %40 : vector<2x8x8x128xbf16> to vector<128x128xbf16>
    %c0_43 = arith.constant 0 : index
    %c640 = arith.constant 640 : index
    %42 = vector.load %arg10[%c0_43, %c640] : memref<128x1152xbf16, #tpu.memory_space<vmem>>, vector<128x128xbf16>
    tpu.vector_store %arg10[%c0_43, %c640], %41 {strides = array<i32>} : memref<128x1152xbf16, #tpu.memory_space<vmem>>, vector<128x128xbf16>,
    %c0_44 = arith.constant 0 : index
    %c0_45 = arith.constant 0 : index
    %c2 = arith.constant 2 : index
    %c0_46 = arith.constant 0 : index
    %43 = vector.load %arg9[%c0_44, %c0_45, %c2, %c0_46] : memref<2x10x10x128xbf16, #tpu.memory_space<vmem>>, vector<2x10x8x128xbf16>
    %44 = vector.extract_strided_slice %43 {offsets = [0, 0, 0, 0], sizes = [2, 8, 8, 128], strides = [1, 1, 1, 1]} : vector<2x10x8x128xbf16> to vector<2x8x8x128xbf16>
    %45 = vector.shape_cast %44 : vector<2x8x8x128xbf16> to vector<128x128xbf16>
    %c0_47 = arith.constant 0 : index
    %c768 = arith.constant 768 : index
    %46 = vector.load %arg10[%c0_47, %c768] : memref<128x1152xbf16, #tpu.memory_space<vmem>>, vector<128x128xbf16>
    tpu.vector_store %arg10[%c0_47, %c768], %45 {strides = array<i32>} : memref<128x1152xbf16, #tpu.memory_space<vmem>>, vector<128x128xbf16>,
    %47 = vector.extract_strided_slice %43 {offsets = [0, 1, 0, 0], sizes = [2, 8, 8, 128], strides = [1, 1, 1, 1]} : vector<2x10x8x128xbf16> to vector<2x8x8x128xbf16>
    %48 = vector.shape_cast %47 : vector<2x8x8x128xbf16> to vector<128x128xbf16>
    %c0_48 = arith.constant 0 : index
    %c896 = arith.constant 896 : index
    %49 = vector.load %arg10[%c0_48, %c896] : memref<128x1152xbf16, #tpu.memory_space<vmem>>, vector<128x128xbf16>
    tpu.vector_store %arg10[%c0_48, %c896], %48 {strides = array<i32>} : memref<128x1152xbf16, #tpu.memory_space<vmem>>, vector<128x128xbf16>,
    %50 = vector.extract_strided_slice %43 {offsets = [0, 2, 0, 0], sizes = [2, 8, 8, 128], strides = [1, 1, 1, 1]} : vector<2x10x8x128xbf16> to vector<2x8x8x128xbf16>
    %51 = vector.shape_cast %50 : vector<2x8x8x128xbf16> to vector<128x128xbf16>
    %c0_49 = arith.constant 0 : index
    %c1024 = arith.constant 1024 : index
    %52 = vector.load %arg10[%c0_49, %c1024] : memref<128x1152xbf16, #tpu.memory_space<vmem>>, vector<128x128xbf16>
    tpu.vector_store %arg10[%c0_49, %c1024], %51 {strides = array<i32>} : memref<128x1152xbf16, #tpu.memory_space<vmem>>, vector<128x128xbf16>,
    %c0_50 = arith.constant 0 : index
    %c0_51 = arith.constant 0 : index
    %53 = vector.load %arg10[%c0_50, %c0_51] : memref<128x1152xbf16, #tpu.memory_space<vmem>>, vector<128x1152xbf16>
    %c0_52 = arith.constant 0 : index
    %c0_53 = arith.constant 0 : index
    %54 = vector.load %arg5[%c0_52, %c0_53] : memref<1152x128xbf16, #tpu.memory_space<vmem>>, vector<1152x128xbf16>
    %cst_54 = arith.constant dense<0.000000e+00> : vector<128x128xf32>
    %55 = tpu.matmul %53, %54, %cst_54 {dimension_numbers = #tpu.dot_dimension_numbers<[1], [0], [0], [1], [0, 0, 1, 1], [], []>} : vector<128x1152xbf16>, vector<1152x128xbf16>, vector<128x128xf32> -> vector<128x128xf32>
    %c0_55 = arith.constant 0 : index
    %c0_56 = arith.constant 0 : index
    %56 = vector.load %arg6[%c0_55, %c0_56] : memref<1x128xf32, #tpu.memory_space<vmem>>, vector<1x128xf32>
    %57 = vector.broadcast %56 : vector<1x128xf32> to vector<128x128xf32>
    %58 = arith.mulf %55, %57 : vector<128x128xf32>
    %c0_57 = arith.constant 0 : index
    %c0_58 = arith.constant 0 : index
    %59 = vector.load %arg7[%c0_57, %c0_58] : memref<1x128xf32, #tpu.memory_space<vmem>>, vector<1x128xf32>
    %60 = vector.broadcast %59 : vector<1x128xf32> to vector<128x128xf32>
    %61 = arith.addf %58, %60 : vector<128x128xf32>
    %62 = arith.addf %61, %14 : vector<128x128xf32>
    %cst_59 = arith.constant 0.000000e+00 : f32
    %63 = vector.broadcast %cst_59 : f32 to vector<128x128xf32>
    %64 = arith.maximumf %62, %63 : vector<128x128xf32>
    %65 = vector.shape_cast %64 : vector<128x128xf32> to vector<2x64x128xf32>
    %66 = arith.truncf %65 : vector<2x64x128xf32> to vector<2x64x128xbf16>
    %c0_60 = arith.constant 0 : index
    %c0_61 = arith.constant 0 : index
    %c0_62 = arith.constant 0 : index
    %67 = vector.load %arg8[%c0_60, %c0_61, %c0_62] : memref<2x64x128xbf16, #tpu.memory_space<vmem>>, vector<2x64x128xbf16>
    tpu.vector_store %arg8[%c0_60, %c0_61, %c0_62], %66 {strides = array<i32>} : memref<2x64x128xbf16, #tpu.memory_space<vmem>>, vector<2x64x128xbf16>,
    return
  }
  func.func @transform_0(%arg0: i32) -> (i32, i32, i32) {
    %c0_i32 = arith.constant 0 : i32
    %c0_i32_0 = arith.constant 0 : i32
    %c0_i32_1 = arith.constant 0 : i32
    return %arg0, %c0_i32, %c0_i32_0 : i32, i32, i32
  }
  func.func @transform_1(%arg0: i32) -> (i32, i32) {
    %c0_i32 = arith.constant 0 : i32
    %c0_i32_0 = arith.constant 0 : i32
    %c0_i32_1 = arith.constant 0 : i32
    return %c0_i32, %c0_i32_0 : i32, i32
  }
  func.func @transform_2(%arg0: i32) -> (i32, i32) {
    %c0_i32 = arith.constant 0 : i32
    %c0_i32_0 = arith.constant 0 : i32
    %c0_i32_1 = arith.constant 0 : i32
    return %c0_i32, %c0_i32_0 : i32, i32
  }
  func.func @transform_3(%arg0: i32) -> (i32, i32) {
    %c0_i32 = arith.constant 0 : i32
    %c0_i32_0 = arith.constant 0 : i32
    %c0_i32_1 = arith.constant 0 : i32
    return %c0_i32, %c0_i32_0 : i32, i32
  }
  func.func @transform_4(%arg0: i32) -> (i32, i32) {
    %c0_i32 = arith.constant 0 : i32
    %c0_i32_0 = arith.constant 0 : i32
    %c0_i32_1 = arith.constant 0 : i32
    return %c0_i32, %c0_i32_0 : i32, i32
  }
  func.func @transform_5(%arg0: i32) -> (i32, i32) {
    %c0_i32 = arith.constant 0 : i32
    %c0_i32_0 = arith.constant 0 : i32
    %c0_i32_1 = arith.constant 0 : i32
    return %c0_i32, %c0_i32_0 : i32, i32
  }
  func.func @transform_6(%arg0: i32) -> (i32, i32) {
    %c0_i32 = arith.constant 0 : i32
    %c0_i32_0 = arith.constant 0 : i32
    %c0_i32_1 = arith.constant 0 : i32
    return %c0_i32, %c0_i32_0 : i32, i32
  }
  func.func @transform_7(%arg0: i32) -> (i32, i32, i32) {
    %c0_i32 = arith.constant 0 : i32
    %c0_i32_0 = arith.constant 0 : i32
    %c0_i32_1 = arith.constant 0 : i32
    return %arg0, %c0_i32, %c0_i32_0 : i32, i32, i32
  }
}

</mosaic_0001>

<bundles_post_ra>
// kernel: res2d_forward.1
= control target key start
LH: loop header
LB: loop body
LE: loop exit
PB: predicated region body
PF: predicated region fallthrough
CT: control target
= control target key end

     0   :  { %vm138_vm0 = vcmask 1041408   ;;  %vm113_vm1 = vcmask 293888   ;;  %v3859_v35 = vmov 0   ;;  %vm512_vm2 = vcmask 1043456   ;;  %v515_v59 = vld [vmem:[#allocation2 + $0x8] sm:$0xf]  ;;  %s4890_s1 = inlined_call_operand.vmem [shape: bf16[36,256], index: 1, kind: input, shape index: {}]   ;;  %s4891_s0 = inlined_call_operand.vmem [shape: bf16[2,64,36], index: 0, kind: input, shape index: {}]   ;;  %s4892_s4 = inlined_call_operand.vmem [shape: bf16[1152,128], index: 4, kind: input, shape index: {}]   ;;  %s4893_s2 = inlined_call_operand.vmem [shape: f32[1,256], index: 2, kind: input, shape index: {}]   ;;  %s4894_s3 = inlined_call_operand.vmem [shape: f32[1,256], index: 3, kind: input, shape index: {}]   ;;  %s4895_s5 = inlined_call_operand.vmem [shape: f32[1,128], index: 5, kind: input, shape index: {}]   ;;  %s4896_s6 = inlined_call_operand.vmem [shape: f32[1,128], index: 6, kind: input, shape index: {}]   ;;  %s4897_s7 = inlined_call_operand.vmem [shape: bf16[2,64,128], index: 7, kind: output, shape index: {}]  }
   0x1   :  { %v47_v0 = vld [vmem:[%s4890_s1 + $0x20] sm:$0x33]  ;;  %v3025_v3 = vld [vmem:[%s4890_s1 + $0x10] sm:$0xf]  ;;  %v3654_v4 = vld [vmem:[%s4890_s1 + $0x14] sm:$0xf0] }
   0x2   :  { %v101_v1 = vunpack.c.l.b16 %v47_v0  ;;  %v3026_v6 = vor.u32 %v3654_v4, %v3025_v3  ;;  %v3017_v7 = vld [vmem:[%s4890_s1] sm:$0xf]  ;;  %v3652_v8 = vld [vmem:[%s4890_s1 + $0x4] sm:$0xf0]  ;;  %v102_v11 = vunpack.c.h.b16 %v47_v0  ;;  %v3653_v13 = vld [vmem:[%s4890_s1 + $0x14] sm:$0xf] }
   0x3   :  { %v3018_v9 = vor.u32 %v3652_v8, %v3017_v7  ;;  %v3643_v10 = vld [vmem:[%s4891_s0] sm:$0xff]  ;;  %v3027_v14 = vld [vmem:[%s4890_s1 + $0x18] sm:$0xf0]  ;;  %v3019_v18 = vld [vmem:[%s4890_s1 + $0x8] sm:$0xf0]  ;;  %vm518_vm4 = vcmask 1040384  }
   0x4   :  { %v107_v2 = vpack.c.b16 %v101_v1, %v101_v1  ;;  %v108_v12 = vpack.c.b16 %v102_v11, %v102_v11  ;;  %v3030_v16 = vor.u32 %v3653_v13, %v3027_v14  ;;  %v3651_v17 = vld [vmem:[%s4890_s1 + $0x4] sm:$0xf]  ;;  %v3644_v20 = vld [vmem:[%s4891_s0 + $0x8] sm:$0xff]  ;;  %v3645_v21 = vld [vmem:[%s4891_s0 + $0x10] sm:$0xff]  ;;  %614 = vst [vmem:[#allocation2] sm:$0xf] %v3859_v35 }
   0x5   :  { %v3022_v19 = vor.u32 %v3651_v17, %v3019_v18  ;;  %v3646_v22 = vld [vmem:[%s4891_s0 + $0x18] sm:$0xff]  ;;  %v3647_v23 = vld [vmem:[%s4891_s0 + $0x20] sm:$0xff]  ;;  %v3648_v24 = vld [vmem:[%s4891_s0 + $0x28] sm:$0xff]  ;;  %615 = vst [vmem:[#allocation2 + $0x4] sm:$0x1] %v3859_v35  ;;  %vm1251_vm12 = vcmask 1042432  }
   0x6   :  { %v140_v5 = vsel %vm138_vm0, %v107_v2, 0  ;;  %v143_v15 = vsel %vm138_vm0, %v108_v12, 0  ;;  %v3649_v25 = vld [vmem:[%s4891_s0 + $0x30] sm:$0xff]  ;;  %v3734_v26 = vld [vmem:[%s4892_s4 + $0x38] sm:$0xff]  ;;  %v3732_v29 = vld [vmem:[%s4892_s4 + $0x28] sm:$0xff]  ;;  %vm1252_vm13 = vcmask 1046532  }
   0x7   :  { %150 = vmatpush.bf16.msra.mxu0 %v140_v5  ;;  %199 = vmatpush.bf16.msra.mxu1 %v143_v15  ;;  %v3650_v27 = vld [vmem:[%s4891_s0 + $0x38] sm:$0xff]  ;;  %v3733_v28 = vld [vmem:[%s4892_s4 + $0x30] sm:$0xff]  ;;  %v3731_v31 = vld [vmem:[%s4892_s4 + $0x20] sm:$0xff]  ;;  %616 = vst [vmem:[#allocation2 + $0x50] sm:$0xf] %v3859_v35 }
   0x8   :  { %2434 = vmatpush.bf16.msra.mxu2 %v3734_v26  ;;  %3846 = vmatpush.bf16.msra.mxu3 %v3734_v26  ;;  %v3758_v30 = vld [vmem:[%s4892_s4 + $0xf8] sm:$0xff]  ;;  %v243_v32 = vld [vmem:[%s4893_s2] sm:$0x3]  ;;  %v3757_v33 = vld [vmem:[%s4892_s4 + $0xf0] sm:$0xff]  ;;  %617 = vst [vmem:[#allocation2 + $0x54] sm:$0x1] %v3859_v35 }
   0x9   :  { %v281_v34 = vld [vmem:[%s4894_s3] sm:$0x3]  ;;  %v3992_v36 = vperm.slane %v243_v32, 0  ;;  %v3730_v37 = vld [vmem:[%s4892_s4 + $0x18] sm:$0xff]  ;;  %v3756_v39 = vld [vmem:[%s4892_s4 + $0xe8] sm:$0xff] }
   0xa   :  { %v3750_v38 = vld [vmem:[%s4892_s4 + $0xb8] sm:$0xff]  ;;  %v4003_v40 = vperm.slane %v281_v34, 0  ;;  %619 = vst [vmem:[#allocation2 + $0x48] sm:$0xf] %v3859_v35  ;;  %v3729_v43 = vld [vmem:[%s4892_s4 + $0x10] sm:$0xff]  ;;  %v3755_v45 = vld [vmem:[%s4892_s4 + $0xe0] sm:$0xff] }
   0xb   :  { %151 = vmatpush.bf16.msra.mxu0 %v3026_v6  ;;  %200 = vmatpush.bf16.msra.mxu1 %v3030_v16  ;;  %v3749_v44 = vld [vmem:[%s4892_s4 + $0xb0] sm:$0xff]  ;;  %620 = vst [vmem:[#allocation2 + $0x4c] sm:$0x1] %v3859_v35  ;;  %v720_v47 = vld [vmem:[#allocation2] sm:$0xf]  ;;  %v3728_v49 = vld [vmem:[%s4892_s4 + $0x8] sm:$0xff] }
   0xc   :  { %2435 = vmatpush.bf16.msra.mxu2 %v3733_v28  ;;  %3847 = vmatpush.bf16.msra.mxu3 %v3733_v28  ;;  %621 = vst [vmem:[#allocation2 + $0x98] sm:$0xf] %v3859_v35  ;;  %v3748_v50 = vld [vmem:[%s4892_s4 + $0xa8] sm:$0xff]  ;;  %v3754_v51 = vld [vmem:[%s4892_s4 + $0xd8] sm:$0xff]  ;;  %v788_v52 = vld [vmem:[#allocation2] sm:$0xf] }
   0xd   :  { %740 = vst [vmem:[#allocation3] sm:$0xf] %v720_v47  ;;  %v832_v54 = vshrl.u32 %v788_v52, 16  ;;  %v835_v55 = vshll.u32 %v788_v52, 16  ;;  %vm513_vm3 = vsmask.f32 7938  ;;  %vm4414_vm14 = vmor %vm1251_vm12, %vm1252_vm13 }
   0xe   :  { %622 = vst [vmem:[#allocation2 + $0x9c] sm:$0x1] %v3859_v35  ;;  %vm519_vm5 = vsmask.f32 256  ;;  %v3727_v60 = vld [vmem:[%s4892_s4] sm:$0xff]  ;;  %v3753_v62 = vld [vmem:[%s4892_s4 + $0xd0] sm:$0xff]  ;;  %vm4038_vm6 = vmand %vm512_vm2, %vm513_vm3 }
   0xf   :  { %152 = vmatpush.bf16.msra.mxu0 %v3018_v9  ;;  %201 = vmatpush.bf16.msra.mxu1 %v3022_v19  ;;  %v3747_v61 = vld [vmem:[%s4892_s4 + $0xa0] sm:$0xff]  ;;  %v834_v63 = vrot.slane %v832_v54, 4  ;;  %v837_v0 = vrot.slane %v835_v55, 5  ;;  %v521_v4 = vld [vmem:[#allocation2 + $0xc] sm:$0x1]  ;;  %vm4045_vm7 = vmand %vm518_vm4, %vm519_vm5 }
  0x10   :  { %2436 = vmatpush.bf16.msra.mxu2 %v3732_v29  ;;  %3848 = vmatpush.bf16.msra.mxu3 %v3732_v29  ;;  %v789_v6 = vld [vmem:[#allocation2 + $0x4] sm:$0x1]  ;;  %vm828_vm8 = vsmask.f32 3328  ;;  %vm829_vm9 = vsmask.f32 7440  ;;  %vm4081_vm11 = vmand %vm518_vm4, %vm513_vm3 }
  0x11   :  { %v838_v8 = vor.u32 %v837_v0, %v834_v63  ;;  %v841_v9 = vshll.u32 %v789_v6, 16  ;;  %vm4049_vm10 = vmor %vm828_vm8, %vm829_vm9  ;;  %v3746_v19 = vld [vmem:[%s4892_s4 + $0x98] sm:$0xff]  ;;  %v3745_v29 = vld [vmem:[%s4892_s4 + $0x90] sm:$0xff] }
  0x12   :  { %3031 = vmatmul.msk.bf16.vlgmr.msra.gmra.mxu0 %vm113_vm1, %v3643_v10  ;;  %3039 = vmatmul.msk.bf16.vlgmr.msra.gmra.mxu1 %vm113_vm1, %v3643_v10  ;;  %v3751_v32 = vld [vmem:[%s4892_s4 + $0xc0] sm:$0xff]  ;;  %v527_v35 = vld [vmem:[#allocation2 + $0x14] sm:$0x1]  ;;  %v530_v54 = vld [vmem:[#allocation2 + $0x18] sm:$0xf] }
  0x13   :  { %2581 = vmatpush.bf16.msrb.mxu1 %v3758_v30  ;;  %2532 = vmatpush.bf16.msrb.mxu0 %v3750_v38  ;;  %v839_v14 = vrot.slane %v838_v8, 4  ;;  %v843_v15 = vrot.slane %v841_v9, 5  ;;  %v3765_v30 = vld [vmem:[%s4892_s4 + $0x130] sm:$0xff]  ;;  %v533_v55 = vld [vmem:[#allocation2 + $0x1c] sm:$0x1] }
  0x14   :  { %2437 = vmatpush.bf16.msra.mxu2 %v3731_v31  ;;  %3849 = vmatpush.bf16.msra.mxu3 %v3731_v31  ;;  %v524_v31 = vld [vmem:[#allocation2 + $0x10] sm:$0xf]  ;;  %v536_v8 = vld [vmem:[#allocation2 + $0x20] sm:$0xf] }
  0x17   :  { %2582 = vmatpush.bf16.msrb.mxu1 %v3757_v33  ;;  %2533 = vmatpush.bf16.msrb.mxu0 %v3749_v44 }
  0x18   :  { %2438 = vmatpush.bf16.msra.mxu2 %v3730_v37  ;;  %3850 = vmatpush.bf16.msra.mxu3 %v3730_v37 }
  0x1b   :  { %2583 = vmatpush.bf16.msrb.mxu1 %v3756_v39  ;;  %2534 = vmatpush.bf16.msrb.mxu0 %v3748_v50 }
  0x1c   :  { %2439 = vmatpush.bf16.msra.mxu2 %v3729_v43  ;;  %3851 = vmatpush.bf16.msra.mxu3 %v3729_v43  ;;  %v3744_v43 = vld [vmem:[%s4892_s4 + $0x88] sm:$0xff] }
  0x1f   :  { %2584 = vmatpush.bf16.msrb.mxu1 %v3755_v45  ;;  %2535 = vmatpush.bf16.msrb.mxu0 %v3747_v61 }
  0x20   :  { %2440 = vmatpush.bf16.msra.mxu2 %v3728_v49  ;;  %3852 = vmatpush.bf16.msra.mxu3 %v3728_v49 }
  0x22   :  { %3032 = vmatmul.msk.bf16.gmra.mxu0 %vm113_vm1, %v3644_v20  ;;  %3040 = vmatmul.msk.bf16.gmra.mxu1 %vm113_vm1, %v3644_v20  ;;  %v3766_v20 = vld [vmem:[%s4892_s4 + $0x138] sm:$0xff] }
  0x23   :  { %2585 = vmatpush.bf16.msrb.mxu1 %v3754_v51  ;;  %2536 = vmatpush.bf16.msrb.mxu0 %v3746_v19 }
  0x24   :  { %2441 = vmatpush.bf16.msra.mxu2 %v3727_v60  ;;  %3853 = vmatpush.bf16.msra.mxu3 %v3727_v60 }
  0x27   :  { %2586 = vmatpush.bf16.msrb.mxu1 %v3753_v62  ;;  %2537 = vmatpush.bf16.msrb.mxu0 %v3745_v29 }
  0x28   :  { %2630 = vmatpush.bf16.msrb.mxu2 %v3766_v20 }
  0x2b   :  { %2538 = vmatpush.bf16.msrb.mxu0 %v3744_v43  ;;  %v545_v43 = vld [vmem:[#allocation2 + $0x2c] sm:$0x1] }
  0x2c   :  { %2631 = vmatpush.bf16.msrb.mxu2 %v3765_v30 }
  0x32   :  { %3033 = vmatmul.msk.bf16.gmra.mxu0 %vm113_vm1, %v3645_v21  ;;  %3041 = vmatmul.msk.bf16.gmra.mxu1 %vm113_vm1, %v3645_v21 }
  0x42   :  { %3034 = vmatmul.msk.bf16.gmra.mxu0 %vm113_vm1, %v3646_v22  ;;  %3042 = vmatmul.msk.bf16.gmra.mxu1 %vm113_vm1, %v3646_v22  ;;  %v3752_v22 = vld [vmem:[%s4892_s4 + $0xc8] sm:$0xff] }
  0x43   :  { %2587 = vmatpush.bf16.msrb.mxu1 %v3752_v22 }
  0x47   :  { %2588 = vmatpush.bf16.msrb.mxu1 %v3751_v32  ;;  %v3069_v32 = vld [vmem:[#allocation3] sm:$0xf] }
  0x52   :  { %3035 = vmatmul.msk.bf16.gmra.mxu0 %vm113_vm1, %v3647_v23  ;;  %3043 = vmatmul.msk.bf16.gmra.mxu1 %vm113_vm1, %v3647_v23  ;;  %v844_v23 = vsel %vm4049_vm10, %v839_v14, %v843_v15 }
  0x53   :  { %1071 = vst [vmem:[#allocation3 + $0xc] sm:$0xf] %v844_v23 }
  0x62   :  { %3036 = vmatmul.msk.bf16.gmra.mxu0 %vm113_vm1, %v3648_v24  ;;  %3044 = vmatmul.msk.bf16.gmra.mxu1 %vm113_vm1, %v3648_v24 }
  0x72   :  { %3037 = vmatmul.msk.bf16.gmra.mxu0 %vm113_vm1, %v3649_v25  ;;  %3045 = vmatmul.msk.bf16.gmra.mxu1 %vm113_vm1, %v3649_v25 }
  0x82   :  { %3038 = vmatmul.msk.bf16.gmra.mxu0 %vm113_vm1, %v3650_v27  ;;  %3046 = vmatmul.msk.bf16.gmra.mxu1 %vm113_vm1, %v3650_v27 }
  0x8f   :  { %v154_v41 = vpop.f32.mrf.mxu0 }
  0x90   :  { %v249_v42 = vmul.f32 %v3992_v36, %v154_v41 }
  0x92   :  { %v287_v46 = vadd.f32 %v4003_v40, %v249_v42 }
  0x94   :  { %v319_v48 = vmax.f32 %v287_v46, 0.0 }
  0x96   :  { %v335_v53 = vpack.c.bf16 %v319_v48, %v319_v48 }
  0x97   :  { %v156_v56 = vpop.f32.mrf.mxu0 }
  0x98   :  { %v352_v57 = vshrl.u32 %v335_v53, 16  ;;  %v251_v58 = vmul.f32 %v3992_v36, %v156_v56  ;;  %v355_v2 = vshll.u32 %v335_v53, 16  ;;  %v3764_v56 = vld [vmem:[%s4892_s4 + $0x128] sm:$0xff] }
  0x99   :  { %2632 = vmatpush.bf16.msrb.mxu2 %v3764_v56 }
  0x9a   :  { %v354_v1 = vrot.slane %v352_v57, 7  ;;  %v289_v5 = vadd.f32 %v4003_v40, %v251_v58 }
  0x9c   :  { %v357_v10 = vor.u32 %v355_v2, %v354_v1  ;;  %v358_v11 = vrot.slane %v354_v1, 4  ;;  %v320_v12 = vmax.f32 %v289_v5, 0.0 }
  0x9e   :  { %v516_v16 = vsel %vm4038_vm6, %v357_v10, %v515_v59  ;;  %v522_v17 = vsel %vm4045_vm7, %v358_v11, %v521_v4  ;;  %v336_v18 = vpack.c.bf16 %v320_v12, %v320_v12 }
  0x9f   :  { %517 = vst [vmem:[#allocation2 + $0x8] sm:$0xf] %v516_v16  ;;  %v159_v21 = vpop.f32.mrf.mxu0  ;;  %v539_v16 = vld [vmem:[#allocation2 + $0x24] sm:$0x1] }
  0xa0   :  { %523 = vst [vmem:[#allocation2 + $0xc] sm:$0x1] %v522_v17  ;;  %v360_v24 = vshrl.u32 %v336_v18, 16  ;;  %v253_v25 = vmul.f32 %v3992_v36, %v159_v21  ;;  %v363_v27 = vshll.u32 %v336_v18, 16  ;;  %v3743_v21 = vld [vmem:[%s4892_s4 + $0x80] sm:$0xff] }
  0xa1   :  { %2539 = vmatpush.bf16.msrb.mxu0 %v3743_v21 }
  0xa2   :  { %v362_v26 = vrot.slane %v360_v24, 7  ;;  %v291_v28 = vadd.f32 %v4003_v40, %v253_v25  ;;  %v3763_v24 = vld [vmem:[%s4892_s4 + $0x120] sm:$0xff] }
  0xa3   :  { %2633 = vmatpush.bf16.msrb.mxu2 %v3763_v24 }
  0xa4   :  { %v365_v33 = vor.u32 %v363_v27, %v362_v26  ;;  %v366_v34 = vrot.slane %v362_v26, 4  ;;  %v321_v37 = vmax.f32 %v291_v28, 0.0 }
  0xa6   :  { %v623_v39 = vld [vmem:[#allocation2 + $0x8] sm:$0x1]  ;;  %v525_v41 = vsel %vm4038_vm6, %v365_v33, %v524_v31  ;;  %v337_v42 = vpack.c.bf16 %v321_v37, %v321_v37  ;;  %v528_v46 = vsel %vm4045_vm7, %v366_v34, %v527_v35  ;;  %v3762_v34 = vld [vmem:[%s4892_s4 + $0x118] sm:$0xff] }
  0xa7   :  { %v624_v44 = vsel %vm4045_vm7, 0, %v623_v39  ;;  %v672_v45 = vld [vmem:[#allocation2 + $0xc] sm:$0x1]  ;;  %526 = vst [vmem:[#allocation2 + $0x10] sm:$0xf] %v525_v41  ;;  %v161_v47 = vpop.f32.mrf.mxu0  ;;  %2634 = vmatpush.bf16.msrb.mxu2 %v3762_v34 }
  0xa8   :  { %625 = vst [vmem:[#allocation2 + $0x8] sm:$0x1] %v624_v44  ;;  %v673_v48 = vsel %vm4081_vm11, 0, %v672_v45  ;;  %v368_v49 = vshrl.u32 %v337_v42, 16  ;;  %v255_v50 = vmul.f32 %v3992_v36, %v161_v47  ;;  %v371_v52 = vshll.u32 %v337_v42, 16 }
  0xa9   :  { %674 = vst [vmem:[#allocation2 + $0xc] sm:$0x1] %v673_v48  ;;  %v542_v42 = vld [vmem:[#allocation2 + $0x28] sm:$0xf] }
  0xaa   :  { %529 = vst [vmem:[#allocation2 + $0x14] sm:$0x1] %v528_v46  ;;  %v370_v51 = vrot.slane %v368_v49, 7  ;;  %v293_v53 = vadd.f32 %v4003_v40, %v255_v50 }
  0xac   :  { %v373_v57 = vor.u32 %v371_v52, %v370_v51  ;;  %v374_v58 = vrot.slane %v370_v51, 4  ;;  %v322_v59 = vmax.f32 %v293_v53, 0.0  ;;  %v3761_v52 = vld [vmem:[%s4892_s4 + $0x110] sm:$0xff] }
  0xad   :  { %2635 = vmatpush.bf16.msrb.mxu2 %v3761_v52 }
  0xae   :  { %v626_v60 = vld [vmem:[#allocation2 + $0x10] sm:$0x1]  ;;  %v531_v61 = vsel %vm4038_vm6, %v373_v57, %v530_v54  ;;  %v534_v62 = vsel %vm4045_vm7, %v374_v58, %v533_v55  ;;  %v338_v63 = vpack.c.bf16 %v322_v59, %v322_v59 }
  0xaf   :  { %v790_v0 = vld [vmem:[#allocation2 + $0x8] sm:$0xf]  ;;  %v627_v1 = vsel %vm4045_vm7, 0, %v626_v60  ;;  %532 = vst [vmem:[#allocation2 + $0x18] sm:$0xf] %v531_v61  ;;  %v164_v2 = vpop.f32.mrf.mxu0 }
  0xb0   :  { %628 = vst [vmem:[#allocation2 + $0x10] sm:$0x1] %v627_v1  ;;  %v376_v4 = vshrl.u32 %v338_v63, 16  ;;  %v257_v5 = vmul.f32 %v3992_v36, %v164_v2  ;;  %v846_v9 = vshrl.u32 %v790_v0, 16  ;;  %v379_v12 = vshll.u32 %v338_v63, 16 }
  0xb1   :  { %v675_v6 = vld [vmem:[#allocation2 + $0x14] sm:$0x1]  ;;  %535 = vst [vmem:[#allocation2 + $0x1c] sm:$0x1] %v534_v62  ;;  %v721_v15 = vld [vmem:[#allocation2 + $0x8] sm:$0xf] }
  0xb2   :  { %v676_v10 = vsel %vm4081_vm11, 0, %v675_v6  ;;  %v378_v11 = vrot.slane %v376_v4, 7  ;;  %v295_v14 = vadd.f32 %v4003_v40, %v257_v5  ;;  %v791_v17 = vld [vmem:[#allocation2 + $0xc] sm:$0x1]  ;;  %741 = vst [vmem:[#allocation3 + $0x24] sm:$0xf] %v721_v15 }
  0xb3   :  { %677 = vst [vmem:[#allocation2 + $0x14] sm:$0x1] %v676_v10  ;;  %v848_v22 = vrot.slane %v846_v9, 4  ;;  %v849_v23 = vshll.u32 %v790_v0, 16  ;;  %v855_v29 = vshll.u32 %v791_v17, 16 }
  0xb4   :  { %v381_v18 = vor.u32 %v379_v12, %v378_v11  ;;  %v382_v19 = vrot.slane %v378_v11, 4  ;;  %v323_v20 = vmax.f32 %v295_v14, 0.0  ;;  %756 = vst [vmem:[#allocation3 + $0x4] sm:$0xf] %v721_v15  ;;  %v548_v6 = vld [vmem:[#allocation2 + $0x30] sm:$0xf] }
  0xb5   :  { %v851_v33 = vrot.slane %v849_v23, 5  ;;  %v857_v49 = vrot.slane %v855_v29, 5  ;;  %v3656_v14 = vld [vmem:[#allocation3 + $0xc] sm:$0xf] }
  0xb6   :  { %v629_v25 = vld [vmem:[#allocation2 + $0x18] sm:$0x1]  ;;  %v537_v26 = vsel %vm4038_vm6, %v381_v18, %v536_v8  ;;  %v540_v27 = vsel %vm4045_vm7, %v382_v19, %v539_v16  ;;  %v339_v28 = vpack.c.bf16 %v323_v20, %v323_v20  ;;  %v551_v8 = vld [vmem:[#allocation2 + $0x34] sm:$0x1] }
  0xb7   :  { %v630_v30 = vsel %vm4045_vm7, 0, %v629_v25  ;;  %538 = vst [vmem:[#allocation2 + $0x20] sm:$0xf] %v537_v26  ;;  %v166_v31 = vpop.f32.mrf.mxu0  ;;  %v852_v44 = vor.u32 %v851_v33, %v848_v22  ;;  %v722_v45 = vld [vmem:[#allocation2 + $0x10] sm:$0xf] }
  0xb8   :  { %631 = vst [vmem:[#allocation2 + $0x18] sm:$0x1] %v630_v30  ;;  %v678_v35 = vld [vmem:[#allocation2 + $0x1c] sm:$0x1]  ;;  %v384_v37 = vshrl.u32 %v339_v28, 16  ;;  %v259_v39 = vmul.f32 %v3992_v36, %v166_v31  ;;  %v387_v47 = vshll.u32 %v339_v28, 16 }
  0xb9   :  { %v679_v41 = vsel %vm4081_vm11, 0, %v678_v35  ;;  %541 = vst [vmem:[#allocation2 + $0x24] sm:$0x1] %v540_v27  ;;  %v3659_v50 = vld [vmem:[#allocation3 + $0x20] sm:$0xf0]  ;;  %v853_v51 = vrot.slane %v852_v44, 4 }
  0xba   :  { %680 = vst [vmem:[#allocation2 + $0x1c] sm:$0x1] %v679_v41  ;;  %v386_v46 = vrot.slane %v384_v37, 7  ;;  %v297_v48 = vadd.f32 %v4003_v40, %v259_v39  ;;  %v3070_v56 = vor.u32 %v3659_v50, %v3069_v32  ;;  %v792_v62 = vld [vmem:[#allocation2 + $0x10] sm:$0xf] }
  0xbb   :  { %742 = vst [vmem:[#allocation3 + $0x48] sm:$0xf] %v722_v45  ;;  %v858_v57 = vsel %vm4049_vm10, %v853_v51, %v857_v49  ;;  %v860_v9 = vshrl.u32 %v792_v62, 16  ;;  %v863_v16 = vshll.u32 %v792_v62, 16  ;;  %v793_v20 = vld [vmem:[#allocation2 + $0x14] sm:$0x1] }
  0xbc   :  { %v389_v53 = vor.u32 %v387_v47, %v386_v46  ;;  %v390_v54 = vrot.slane %v386_v46, 4  ;;  %v324_v55 = vmax.f32 %v297_v48, 0.0  ;;  %757 = vst [vmem:[#allocation3 + $0x28] sm:$0xf] %v722_v45  ;;  %2442 = vmatmul.bf16.vlgmr.msra.gmra.mxu2 %v3070_v56  ;;  %v869_v32 = vshll.u32 %v793_v20, 16 }
  0xbd   :  { %772 = vst [vmem:[#allocation3 + $0x8] sm:$0xf] %v722_v45  ;;  %v862_v22 = vrot.slane %v860_v9, 4  ;;  %v865_v31 = vrot.slane %v863_v16, 5  ;;  %v554_v39 = vld [vmem:[#allocation2 + $0x38] sm:$0xf] }
  0xbe   :  { %v632_v58 = vld [vmem:[#allocation2 + $0x20] sm:$0x1]  ;;  %v543_v59 = vsel %vm4038_vm6, %v389_v53, %v542_v42  ;;  %v546_v60 = vsel %vm4045_vm7, %v390_v54, %v545_v43  ;;  %v340_v61 = vpack.c.bf16 %v324_v55, %v324_v55  ;;  %1072 = vst [vmem:[#allocation3 + $0x30] sm:$0xf] %v858_v57  ;;  %v557_v41 = vld [vmem:[#allocation2 + $0x3c] sm:$0x1] }
  0xbf   :  { %v633_v63 = vsel %vm4045_vm7, 0, %v632_v58  ;;  %544 = vst [vmem:[#allocation2 + $0x28] sm:$0xf] %v543_v59  ;;  %v169_v0 = vpop.f32.mrf.mxu0  ;;  %v723_v15 = vld [vmem:[#allocation2 + $0x18] sm:$0xf]  ;;  %v866_v44 = vor.u32 %v865_v31, %v862_v22  ;;  %v871_v52 = vrot.slane %v869_v32, 5 }
  0xc0   :  { %634 = vst [vmem:[#allocation2 + $0x20] sm:$0x1] %v633_v63  ;;  %v681_v1 = vld [vmem:[#allocation2 + $0x24] sm:$0x1]  ;;  %v392_v2 = vshrl.u32 %v340_v61, 16  ;;  %v261_v4 = vmul.f32 %v3992_v36, %v169_v0  ;;  %v395_v11 = vshll.u32 %v340_v61, 16 }
  0xc1   :  { %v682_v5 = vsel %vm4081_vm11, 0, %v681_v1  ;;  %547 = vst [vmem:[#allocation2 + $0x2c] sm:$0x1] %v546_v60  ;;  %v794_v23 = vld [vmem:[#allocation2 + $0x18] sm:$0xf]  ;;  %v867_v51 = vrot.slane %v866_v44, 4 }
  0xc2   :  { %683 = vst [vmem:[#allocation2 + $0x24] sm:$0x1] %v682_v5  ;;  %v394_v10 = vrot.slane %v392_v2, 7  ;;  %v299_v12 = vadd.f32 %v4003_v40, %v261_v4  ;;  %v3105_v42 = vld [vmem:[#allocation3 + $0x48] sm:$0xf]  ;;  %v874_v45 = vshrl.u32 %v794_v23, 16 }
  0xc3   :  { %1117 = vst [vmem:[#allocation3 + $0x10] sm:$0xf] %v858_v57  ;;  %v795_v43 = vld [vmem:[#allocation2 + $0x1c] sm:$0x1]  ;;  %v877_v49 = vshll.u32 %v794_v23, 16  ;;  %v3760_v54 = vld [vmem:[%s4892_s4 + $0x108] sm:$0xff]  ;;  %v872_v16 = vsel %vm4049_vm10, %v867_v51, %v871_v52 }
  0xc4   :  { %v397_v17 = vor.u32 %v395_v11, %v394_v10  ;;  %v398_v18 = vrot.slane %v394_v10, 4  ;;  %v325_v19 = vmax.f32 %v299_v12, 0.0  ;;  %743 = vst [vmem:[#allocation3 + $0x6c] sm:$0xf] %v723_v15  ;;  %v876_v53 = vrot.slane %v874_v45, 4  ;;  %2636 = vmatpush.bf16.msrb.mxu2 %v3760_v54  ;;  %v3759_v10 = vld [vmem:[%s4892_s4 + $0x100] sm:$0xff] }
  0xc5   :  { %v3079_v21 = vld [vmem:[#allocation3 + $0x2c] sm:$0xf0]  ;;  %758 = vst [vmem:[#allocation3 + $0x4c] sm:$0xf] %v723_v15  ;;  %v3077_v59 = vld [vmem:[#allocation3 + $0x8] sm:$0xf] }
  0xc6   :  { %v635_v24 = vld [vmem:[#allocation2 + $0x28] sm:$0x1]  ;;  %v549_v25 = vsel %vm4038_vm6, %v397_v17, %v548_v6  ;;  %v552_v26 = vsel %vm4045_vm7, %v398_v18, %v551_v8  ;;  %v341_v27 = vpack.c.bf16 %v325_v19, %v325_v19  ;;  %v3082_v28 = vor.u32 %v3656_v14, %v3079_v21  ;;  %773 = vst [vmem:[#allocation3 + $0x2c] sm:$0xf] %v723_v15  ;;  %v569_v51 = vld [vmem:[#allocation2 + $0x5c] sm:$0x1] }
  0xc7   :  { %v636_v29 = vsel %vm4045_vm7, 0, %v635_v24  ;;  %550 = vst [vmem:[#allocation2 + $0x30] sm:$0xf] %v549_v25  ;;  %v171_v30 = vpop.f32.mrf.mxu0  ;;  %v4158_v60 = vld [vmem:[#allocation2 + $0x20] sm:$0xf]  ;;  %v879_v62 = vrot.slane %v877_v49, 5 }
  0xc8   :  { %637 = vst [vmem:[#allocation2 + $0x28] sm:$0x1] %v636_v29  ;;  %v684_v33 = vld [vmem:[#allocation2 + $0x2c] sm:$0x1]  ;;  %v400_v34 = vshrl.u32 %v341_v27, 16  ;;  %2589 = vmatmul.bf16.vlgmr.msrb.gmra.mxu1 %v3082_v28  ;;  %v263_v35 = vmul.f32 %v3992_v36, %v171_v30  ;;  %v403_v47 = vshll.u32 %v341_v27, 16  ;;  %2637 = vmatpush.bf16.msrb.mxu2 %v3759_v10 }
  0xc9   :  { %v685_v37 = vsel %vm4081_vm11, 0, %v684_v33  ;;  %553 = vst [vmem:[#allocation2 + $0x34] sm:$0x1] %v552_v26  ;;  %v883_v63 = vshll.u32 %v795_v43, 16  ;;  %v880_v9 = vor.u32 %v879_v62, %v876_v53  ;;  %v796_v11 = vld [vmem:[#allocation2 + $0x20] sm:$0xf] }
  0xca   :  { %686 = vst [vmem:[#allocation2 + $0x2c] sm:$0x1] %v685_v37  ;;  %v402_v46 = vrot.slane %v400_v34, 7  ;;  %v301_v48 = vadd.f32 %v4003_v40, %v263_v35  ;;  %v888_v23 = vshrl.u32 %v796_v11, 16  ;;  %v560_v24 = vld [vmem:[#allocation2 + $0x40] sm:$0xf] }
  0xcb   :  { %v3668_v50 = vld [vmem:[#allocation3 + $0x68] sm:$0xf0]  ;;  %744 = vst [vmem:[#allocation3 + $0x90] sm:$0xf] %v4158_v60  ;;  %v881_v18 = vrot.slane %v880_v9, 4  ;;  %v885_v19 = vrot.slane %v883_v63, 5 }
  0xcc   :  { %v405_v55 = vor.u32 %v403_v47, %v402_v46  ;;  %v406_v56 = vrot.slane %v402_v46, 4  ;;  %v326_v57 = vmax.f32 %v301_v48, 0.0  ;;  %v3106_v58 = vor.u32 %v3668_v50, %v3105_v42  ;;  %v563_v25 = vld [vmem:[#allocation2 + $0x44] sm:$0x1]  ;;  %1073 = vst [vmem:[#allocation3 + $0x54] sm:$0xf] %v872_v16 }
  0xcd   :  { %v3660_v61 = vld [vmem:[#allocation3 + $0x28] sm:$0xf0]  ;;  %v886_v26 = vsel %vm4049_vm10, %v881_v18, %v885_v19  ;;  %1163 = vst [vmem:[#allocation3 + $0x14] sm:$0xf] %v872_v16  ;;  %v891_v31 = vshll.u32 %v796_v11, 16  ;;  %v890_v37 = vrot.slane %v888_v23, 4 }
  0xce   :  { %v638_v0 = vld [vmem:[#allocation2 + $0x30] sm:$0x1]  ;;  %v555_v1 = vsel %vm4038_vm6, %v405_v55, %v554_v39  ;;  %v558_v2 = vsel %vm4045_vm7, %v406_v56, %v557_v41  ;;  %v342_v4 = vpack.c.bf16 %v326_v57, %v326_v57  ;;  %2447 = vmatmul.bf16.gmra.mxu2 %v3106_v58  ;;  %v3078_v5 = vor.u32 %v3660_v61, %v3077_v59  ;;  %v3742_v42 = vld [vmem:[%s4892_s4 + $0x78] sm:$0xff]  ;;  %v797_v48 = vld [vmem:[#allocation2 + $0x24] sm:$0x1] }
  0xcf   :  { %v639_v6 = vsel %vm4045_vm7, 0, %v638_v0  ;;  %556 = vst [vmem:[#allocation2 + $0x38] sm:$0xf] %v555_v1  ;;  %v174_v8 = vpop.f32.mrf.mxu0  ;;  %v798_v27 = vld [vmem:[#allocation2 + $0x28] sm:$0xf]  ;;  %2483 = vmatpush.bf16.msrb.mxu3 %v3742_v42  ;;  %v893_v53 = vrot.slane %v891_v31, 5 }
  0xd0   :  { %640 = vst [vmem:[#allocation2 + $0x30] sm:$0x1] %v639_v6  ;;  %v687_v12 = vld [vmem:[#allocation2 + $0x34] sm:$0x1]  ;;  %v408_v14 = vshrl.u32 %v342_v4, 16  ;;  %2540 = vmatmul.bf16.vlgmr.msrb.gmra.mxu0 %v3078_v5  ;;  %v265_v15 = vmul.f32 %v3992_v36, %v174_v8  ;;  %v411_v21 = vshll.u32 %v342_v4, 16 }
  0xd1   :  { %v688_v17 = vsel %vm4081_vm11, 0, %v687_v12  ;;  %559 = vst [vmem:[#allocation2 + $0x3c] sm:$0x1] %v558_v2  ;;  %v902_v43 = vshrl.u32 %v798_v27, 16  ;;  %v905_v44 = vshll.u32 %v798_v27, 16  ;;  %v894_v59 = vor.u32 %v893_v53, %v890_v37 }
  0xd2   :  { %689 = vst [vmem:[#allocation2 + $0x34] sm:$0x1] %v688_v17  ;;  %v410_v20 = vrot.slane %v408_v14, 7  ;;  %v303_v22 = vadd.f32 %v4003_v40, %v265_v15  ;;  %v566_v50 = vld [vmem:[#allocation2 + $0x58] sm:$0xf]  ;;  %v897_v4 = vshll.u32 %v797_v48, 16 }
  0xd3   :  { %1074 = vst [vmem:[#allocation3 + $0x78] sm:$0xf] %v886_v26  ;;  %v725_v52 = vld [vmem:[#allocation2 + $0x28] sm:$0xf]  ;;  %v3665_v56 = vld [vmem:[#allocation3 + $0x54] sm:$0xf] }
  0xd4   :  { %v413_v28 = vor.u32 %v411_v21, %v410_v20  ;;  %v414_v29 = vrot.slane %v410_v20, 4  ;;  %v327_v30 = vmax.f32 %v303_v22, 0.0  ;;  %1164 = vst [vmem:[#allocation3 + $0x38] sm:$0xf] %v886_v26  ;;  %v904_v61 = vrot.slane %v902_v43, 4 }
  0xd5   :  { %1118 = vst [vmem:[#allocation3 + $0x34] sm:$0xf] %v872_v16  ;;  %v907_v62 = vrot.slane %v905_v44, 5  ;;  %v799_v10 = vld [vmem:[#allocation2 + $0x2c] sm:$0x1]  ;;  %v895_v14 = vrot.slane %v894_v59, 4 }
  0xd6   :  { %v641_v32 = vld [vmem:[#allocation2 + $0x38] sm:$0x1]  ;;  %v561_v33 = vsel %vm4038_vm6, %v413_v28, %v560_v24  ;;  %v564_v34 = vsel %vm4045_vm7, %v414_v29, %v563_v25  ;;  %v343_v35 = vpack.c.bf16 %v327_v30, %v327_v30  ;;  %1119 = vst [vmem:[#allocation3 + $0x58] sm:$0xf] %v886_v26  ;;  %v3085_v18 = vld [vmem:[#allocation3 + $0x10] sm:$0xf] }
  0xd7   :  { %v642_v39 = vsel %vm4045_vm7, 0, %v641_v32  ;;  %562 = vst [vmem:[#allocation2 + $0x40] sm:$0xf] %v561_v33  ;;  %v176_v41 = vpop.f32.mrf.mxu0  ;;  %v908_v15 = vor.u32 %v907_v62, %v904_v61  ;;  %v572_v21 = vld [vmem:[#allocation2 + $0x60] sm:$0xf]  ;;  %v899_v23 = vrot.slane %v897_v4, 5 }
  0xd8   :  { %643 = vst [vmem:[#allocation2 + $0x38] sm:$0x1] %v642_v39  ;;  %v690_v45 = vld [vmem:[#allocation2 + $0x3c] sm:$0x1]  ;;  %v416_v46 = vshrl.u32 %v343_v35, 16  ;;  %v267_v47 = vmul.f32 %v3992_v36, %v176_v41  ;;  %v419_v55 = vshll.u32 %v343_v35, 16 }
  0xd9   :  { %v691_v49 = vsel %vm4081_vm11, 0, %v690_v45  ;;  %565 = vst [vmem:[#allocation2 + $0x44] sm:$0x1] %v564_v34  ;;  %v575_v22 = vld [vmem:[#allocation2 + $0x64] sm:$0x1]  ;;  %v911_v24 = vshll.u32 %v799_v10, 16  ;;  %v900_v32 = vsel %vm4049_vm10, %v895_v14, %v899_v23 }
  0xda   :  { %692 = vst [vmem:[#allocation2 + $0x3c] sm:$0x1] %v691_v49  ;;  %v418_v54 = vrot.slane %v416_v46, 7  ;;  %v305_v57 = vadd.f32 %v4003_v40, %v267_v47  ;;  %v3115_v58 = vld [vmem:[#allocation3 + $0x74] sm:$0xf0]  ;;  %v3741_v25 = vld [vmem:[%s4892_s4 + $0x70] sm:$0xff] }
  0xdb   :  { %v3118_v1 = vor.u32 %v3665_v56, %v3115_v58  ;;  %745 = vst [vmem:[#allocation3 + $0xb4] sm:$0xf] %v725_v52  ;;  %v3141_v30 = vld [vmem:[#allocation3 + $0x90] sm:$0xf]  ;;  %v909_v33 = vrot.slane %v908_v15, 4  ;;  %2484 = vmatpush.bf16.msrb.mxu3 %v3741_v25  ;;  %v913_v46 = vrot.slane %v911_v24, 5 }
  0xdc   :  { %v421_v63 = vor.u32 %v419_v55, %v418_v54  ;;  %v422_v0 = vrot.slane %v418_v54, 4  ;;  %v328_v2 = vmax.f32 %v305_v57, 0.0  ;;  %759 = vst [vmem:[#allocation3 + $0x70] sm:$0xf] %v4158_v60  ;;  %v3661_v28 = vld [vmem:[#allocation3 + $0x30] sm:$0xf0] }
  0xdd   :  { %2594 = vmatmul.bf16.gmra.mxu1 %v3118_v1  ;;  %760 = vst [vmem:[#allocation3 + $0x94] sm:$0xf] %v725_v52  ;;  %v3086_v31 = vor.u32 %v3661_v28, %v3085_v18  ;;  %v800_v48 = vld [vmem:[#allocation2 + $0x30] sm:$0xf]  ;;  %v578_v54 = vld [vmem:[#allocation2 + $0x68] sm:$0xf] }
  0xde   :  { %v644_v5 = vld [vmem:[#allocation2 + $0x40] sm:$0x1]  ;;  %v567_v6 = vsel %vm4038_vm6, %v421_v63, %v566_v50  ;;  %v570_v8 = vsel %vm4045_vm7, %v422_v0, %v569_v51  ;;  %v344_v9 = vpack.c.bf16 %v328_v2, %v328_v2  ;;  %774 = vst [vmem:[#allocation3 + $0x50] sm:$0xf] %v4158_v60  ;;  %v914_v51 = vsel %vm4049_vm10, %v909_v33, %v913_v46  ;;  %v581_v55 = vld [vmem:[#allocation2 + $0x6c] sm:$0x1]  ;;  %v4220_v0 = vpop.f32.mrf.mxu1 }
  0xdf   :  { %v645_v11 = vsel %vm4045_vm7, 0, %v644_v5  ;;  %568 = vst [vmem:[#allocation2 + $0x58] sm:$0xf] %v567_v6  ;;  %v179_v12 = vpop.f32.mrf.mxu0  ;;  %2638 = vmatmul.bf16.vlgmr.msrb.gmra.mxu2 %v3086_v31  ;;  %v802_v56 = vld [vmem:[#allocation2 + $0x38] sm:$0xf]  ;;  %v916_v61 = vshrl.u32 %v800_v48, 16 }
  0xe0   :  { %646 = vst [vmem:[#allocation2 + $0x40] sm:$0x1] %v645_v11  ;;  %v693_v16 = vld [vmem:[#allocation2 + $0x44] sm:$0x1]  ;;  %v424_v17 = vshrl.u32 %v344_v9, 16  ;;  %v269_v19 = vmul.f32 %v3992_v36, %v179_v12  ;;  %v427_v27 = vshll.u32 %v344_v9, 16 }
  0xe1   :  { %v694_v20 = vsel %vm4081_vm11, 0, %v693_v16  ;;  %571 = vst [vmem:[#allocation2 + $0x5c] sm:$0x1] %v570_v8  ;;  %v919_v63 = vshll.u32 %v800_v48, 16  ;;  %v918_v12 = vrot.slane %v916_v61, 4  ;;  %v930_v18 = vshrl.u32 %v802_v56, 16 }
  0xe2   :  { %695 = vst [vmem:[#allocation2 + $0x44] sm:$0x1] %v694_v20  ;;  %v426_v26 = vrot.slane %v424_v17, 7  ;;  %v307_v29 = vadd.f32 %v4003_v40, %v269_v19  ;;  %v3677_v37 = vld [vmem:[#allocation3 + $0xb0] sm:$0xf0]  ;;  %v933_v19 = vshll.u32 %v802_v56, 16 }
  0xe3   :  { %v3142_v41 = vor.u32 %v3677_v37, %v3141_v30  ;;  %775 = vst [vmem:[#allocation3 + $0x74] sm:$0xf] %v725_v52  ;;  %v4228_v15 = vld [vmem:[#allocation2 + $0x30] sm:$0xf]  ;;  %v921_v17 = vrot.slane %v919_v63, 5  ;;  %v3740_v30 = vld [vmem:[%s4892_s4 + $0x68] sm:$0xff] }
  0xe4   :  { %v429_v34 = vor.u32 %v427_v27, %v426_v26  ;;  %v430_v35 = vrot.slane %v426_v26, 4  ;;  %v329_v39 = vmax.f32 %v307_v29, 0.0  ;;  %1075 = vst [vmem:[#allocation3 + $0x9c] sm:$0xf] %v900_v32  ;;  %v801_v24 = vld [vmem:[#allocation2 + $0x34] sm:$0x1]  ;;  %2485 = vmatpush.bf16.msrb.mxu3 %v3740_v30 }
  0xe5   :  { %2452 = vmatmul.bf16.vlgmr.msra.gmra.mxu3 %v3142_v41  ;;  %v3113_v62 = vld [vmem:[#allocation3 + $0x50] sm:$0xf]  ;;  %1076 = vst [vmem:[#allocation3 + $0xc0] sm:$0xf] %v914_v51  ;;  %v587_v28 = vld [vmem:[#allocation2 + $0x74] sm:$0x1] }
  0xe6   :  { %v647_v42 = vld [vmem:[#allocation2 + $0x58] sm:$0x1]  ;;  %v573_v43 = vsel %vm4038_vm6, %v429_v34, %v572_v21  ;;  %v576_v44 = vsel %vm4045_vm7, %v430_v35, %v575_v22  ;;  %v345_v45 = vpack.c.bf16 %v329_v39, %v329_v39  ;;  %1120 = vst [vmem:[#allocation3 + $0x7c] sm:$0xf] %v900_v32  ;;  %v584_v27 = vld [vmem:[#allocation2 + $0x70] sm:$0xf]  ;;  %v922_v39 = vor.u32 %v921_v17, %v918_v12 }
  0xe7   :  { %v648_v47 = vsel %vm4045_vm7, 0, %v647_v42  ;;  %574 = vst [vmem:[#allocation2 + $0x60] sm:$0xf] %v573_v43  ;;  %v181_v60 = vpop.f32.mrf.mxu0  ;;  %v4230_v22 = vld [vmem:[#allocation2 + $0x38] sm:$0xf]  ;;  %v932_v41 = vrot.slane %v930_v18, 4 }
  0xe8   :  { %649 = vst [vmem:[#allocation2 + $0x58] sm:$0x1] %v648_v47  ;;  %v696_v49 = vld [vmem:[#allocation2 + $0x5c] sm:$0x1]  ;;  %v432_v50 = vshrl.u32 %v345_v45, 16  ;;  %v271_v52 = vmul.f32 %v3992_v36, %v181_v60  ;;  %v435_v58 = vshll.u32 %v345_v45, 16  ;;  %v4241_v60 = vpop.f32.mrf.mxu1 }
  0xe9   :  { %v697_v53 = vsel %vm4081_vm11, 0, %v696_v49  ;;  %577 = vst [vmem:[#allocation2 + $0x64] sm:$0x1] %v576_v44  ;;  %v3121_v29 = vld [vmem:[#allocation3 + $0x58] sm:$0xf]  ;;  %v935_v42 = vrot.slane %v933_v19, 5 }
  0xea   :  { %698 = vst [vmem:[#allocation2 + $0x5c] sm:$0x1] %v697_v53  ;;  %v434_v57 = vrot.slane %v432_v50, 7  ;;  %v309_v59 = vadd.f32 %v4003_v40, %v271_v52  ;;  %v3669_v1 = vld [vmem:[#allocation3 + $0x70] sm:$0xf0]  ;;  %v925_v47 = vshll.u32 %v801_v24, 16 }
  0xeb   :  { %v3114_v6 = vor.u32 %v3669_v1, %v3113_v62  ;;  %1121 = vst [vmem:[#allocation3 + $0xa0] sm:$0xf] %v914_v51  ;;  %v3674_v26 = vld [vmem:[#allocation3 + $0x9c] sm:$0xf]  ;;  %v590_v62 = vld [vmem:[#allocation2 + $0x78] sm:$0xf] }
  0xec   :  { %v437_v2 = vor.u32 %v435_v58, %v434_v57  ;;  %v438_v4 = vrot.slane %v434_v57, 4  ;;  %v330_v5 = vmax.f32 %v309_v59, 0.0  ;;  %1165 = vst [vmem:[#allocation3 + $0x5c] sm:$0xf] %v900_v32  ;;  %v3151_v31 = vld [vmem:[#allocation3 + $0xbc] sm:$0xf0] }
  0xed   :  { %2545 = vmatmul.bf16.gmra.mxu0 %v3114_v6  ;;  %v3154_v35 = vor.u32 %v3674_v26, %v3151_v31  ;;  %1166 = vst [vmem:[#allocation3 + $0x80] sm:$0xf] %v914_v51  ;;  %v3670_v37 = vld [vmem:[#allocation3 + $0x78] sm:$0xf0]  ;;  %v927_v1 = vrot.slane %v925_v47, 5 }
  0xee   :  { %v650_v8 = vld [vmem:[#allocation2 + $0x60] sm:$0x1]  ;;  %v579_v9 = vsel %vm4038_vm6, %v437_v2, %v578_v54  ;;  %v582_v10 = vsel %vm4045_vm7, %v438_v4, %v581_v55  ;;  %v346_v11 = vpack.c.bf16 %v330_v5, %v330_v5  ;;  %746 = vst [vmem:[#allocation3 + $0xd8] sm:$0xf] %v4228_v15  ;;  %v3122_v45 = vor.u32 %v3670_v37, %v3121_v29  ;;  %v803_v53 = vld [vmem:[#allocation2 + $0x3c] sm:$0x1] }
  0xef   :  { %v651_v14 = vsel %vm4045_vm7, 0, %v650_v8  ;;  %580 = vst [vmem:[#allocation2 + $0x68] sm:$0xf] %v579_v9  ;;  %v184_v16 = vpop.f32.mrf.mxu0  ;;  %2599 = vmatmul.bf16.gmra.mxu1 %v3154_v35  ;;  %v923_v54 = vrot.slane %v922_v39, 4  ;;  %v936_v55 = vor.u32 %v935_v42, %v932_v41  ;;  %v593_v63 = vld [vmem:[#allocation2 + $0x7c] sm:$0x1] }
  0xf0   :  { %652 = vst [vmem:[#allocation2 + $0x60] sm:$0x1] %v651_v14  ;;  %v699_v20 = vld [vmem:[#allocation2 + $0x64] sm:$0x1]  ;;  %v440_v21 = vshrl.u32 %v346_v11, 16  ;;  %v273_v23 = vmul.f32 %v3992_v36, %v184_v16  ;;  %v443_v33 = vshll.u32 %v346_v11, 16  ;;  %2643 = vmatmul.bf16.gmra.mxu2 %v3122_v45 }
  0xf1   :  { %v700_v25 = vsel %vm4081_vm11, 0, %v699_v20  ;;  %583 = vst [vmem:[#allocation2 + $0x6c] sm:$0x1] %v582_v10  ;;  %v939_v5 = vshll.u32 %v803_v53, 16  ;;  %v3739_v8 = vld [vmem:[%s4892_s4 + $0x60] sm:$0xff]  ;;  %v928_v10 = vsel %vm4049_vm10, %v923_v54, %v927_v1  ;;  %v937_v11 = vrot.slane %v936_v55, 4 }
  0xf2   :  { %701 = vst [vmem:[#allocation2 + $0x64] sm:$0x1] %v700_v25  ;;  %v442_v32 = vrot.slane %v440_v21, 7  ;;  %v311_v34 = vadd.f32 %v4003_v40, %v273_v23  ;;  %2486 = vmatpush.bf16.msrb.mxu3 %v3739_v8  ;;  %v808_v26 = vld [vmem:[#allocation2 + $0x50] sm:$0xf] }
  0xf3   :  { %747 = vst [vmem:[#allocation3 + $0xfc] sm:$0xf] %v4230_v22  ;;  %v941_v23 = vrot.slane %v939_v5, 5  ;;  %v810_v30 = vld [vmem:[#allocation2 + $0x58] sm:$0xf]  ;;  %v944_v37 = vshrl.u32 %v808_v26, 16 }
  0xf4   :  { %v445_v43 = vor.u32 %v443_v33, %v442_v32  ;;  %v446_v44 = vrot.slane %v442_v32, 4  ;;  %v331_v46 = vmax.f32 %v311_v34, 0.0  ;;  %761 = vst [vmem:[#allocation3 + $0xb8] sm:$0xf] %v4228_v15  ;;  %v596_v34 = vld [vmem:[#allocation2 + $0x80] sm:$0xf] }
  0xf5   :  { %v3177_v9 = vld [vmem:[#allocation3 + $0xd8] sm:$0xf]  ;;  %762 = vst [vmem:[#allocation3 + $0xdc] sm:$0xf] %v4230_v22  ;;  %v947_v42 = vshll.u32 %v808_v26, 16 }
  0xf6   :  { %v653_v48 = vld [vmem:[#allocation2 + $0x68] sm:$0x1]  ;;  %v585_v49 = vsel %vm4038_vm6, %v445_v43, %v584_v27  ;;  %v588_v50 = vsel %vm4045_vm7, %v446_v44, %v587_v28  ;;  %v347_v51 = vpack.c.bf16 %v331_v46, %v331_v46  ;;  %776 = vst [vmem:[#allocation3 + $0x98] sm:$0xf] %v4228_v15  ;;  %v4268_v27 = vpop.f32.mrf.mxu1  ;;  %v942_v28 = vsel %vm4049_vm10, %v937_v11, %v941_v23  ;;  %v730_v55 = vld [vmem:[#allocation2 + $0x50] sm:$0xf] }
  0xf7   :  { %v654_v52 = vsel %vm4045_vm7, 0, %v653_v48  ;;  %586 = vst [vmem:[#allocation2 + $0x70] sm:$0xf] %v585_v49  ;;  %v186_v56 = vpop.f32.mrf.mxu0  ;;  %v599_v48 = vld [vmem:[#allocation2 + $0x84] sm:$0x1]  ;;  %v958_v49 = vshrl.u32 %v810_v30, 16 }
  0xf8   :  { %655 = vst [vmem:[#allocation2 + $0x68] sm:$0x1] %v654_v52  ;;  %v702_v57 = vld [vmem:[#allocation2 + $0x6c] sm:$0x1]  ;;  %v448_v58 = vshrl.u32 %v347_v51, 16  ;;  %v275_v59 = vmul.f32 %v3992_v36, %v186_v56  ;;  %v451_v4 = vshll.u32 %v347_v51, 16 }
  0xf9   :  { %v703_v61 = vsel %vm4081_vm11, 0, %v702_v57  ;;  %589 = vst [vmem:[#allocation2 + $0x74] sm:$0x1] %v588_v50  ;;  %v809_v52 = vld [vmem:[#allocation2 + $0x54] sm:$0x1]  ;;  %v946_v56 = vrot.slane %v944_v37, 4 }
  0xfa   :  { %704 = vst [vmem:[#allocation2 + $0x6c] sm:$0x1] %v703_v61  ;;  %v450_v2 = vrot.slane %v448_v58, 7  ;;  %v313_v6 = vadd.f32 %v4003_v40, %v275_v59  ;;  %v3686_v12 = vld [vmem:[#allocation3 + $0xf8] sm:$0xf0]  ;;  %v949_v57 = vrot.slane %v947_v42, 5 }
  0xfb   :  { %v3178_v18 = vor.u32 %v3686_v12, %v3177_v9  ;;  %777 = vst [vmem:[#allocation3 + $0xbc] sm:$0xf] %v4230_v22  ;;  %v3738_v59 = vld [vmem:[%s4892_s4 + $0x58] sm:$0xff]  ;;  %v3157_v8 = vld [vmem:[#allocation3 + $0xa0] sm:$0xf]  ;;  %v960_v9 = vrot.slane %v958_v49, 4 }
  0xfc   :  { %v453_v14 = vor.u32 %v451_v4, %v450_v2  ;;  %v454_v16 = vrot.slane %v450_v2, 4  ;;  %v332_v17 = vmax.f32 %v313_v6, 0.0  ;;  %1077 = vst [vmem:[#allocation3 + $0xe4] sm:$0xf] %v928_v10  ;;  %v731_v1 = vld [vmem:[#allocation2 + $0x58] sm:$0xf]  ;;  %2487 = vmatpush.bf16.msrb.mxu3 %v3738_v59 }
  0xfd   :  { %2457 = vmatmul.bf16.gmra.mxu3 %v3178_v18  ;;  %v3149_v39 = vld [vmem:[#allocation3 + $0x98] sm:$0xf]  ;;  %1078 = vst [vmem:[#allocation3 + $0x108] sm:$0xf] %v942_v28  ;;  %v811_v4 = vld [vmem:[#allocation2 + $0x5c] sm:$0x1] }
  0xfe   :  { %v656_v19 = vld [vmem:[#allocation2 + $0x70] sm:$0x1]  ;;  %v591_v20 = vsel %vm4038_vm6, %v453_v14, %v590_v62  ;;  %v594_v21 = vsel %vm4045_vm7, %v454_v16, %v593_v63  ;;  %v348_v24 = vpack.c.bf16 %v332_v17, %v332_v17  ;;  %1122 = vst [vmem:[#allocation3 + $0xc4] sm:$0xf] %v928_v10  ;;  %v4288_v11 = vpop.f32.mrf.mxu1  ;;  %v728_v23 = vld [vmem:[#allocation2 + $0x40] sm:$0xf] }
  0xff   :  { %v657_v15 = vsel %vm4045_vm7, 0, %v656_v19  ;;  %592 = vst [vmem:[#allocation2 + $0x78] sm:$0xf] %v591_v20  ;;  %v189_v25 = vpop.f32.mrf.mxu0  ;;  %v953_v20 = vshll.u32 %v809_v52, 16  ;;  %v602_v26 = vld [vmem:[#allocation2 + $0x88] sm:$0xf] }
 0x100   :  { %658 = vst [vmem:[#allocation2 + $0x70] sm:$0x1] %v657_v15  ;;  %v705_v22 = vld [vmem:[#allocation2 + $0x74] sm:$0x1]  ;;  %v277_v29 = vmul.f32 %v3992_v36, %v189_v25  ;;  %v456_v32 = vshrl.u32 %v348_v24, 16  ;;  %v459_v33 = vshll.u32 %v348_v24, 16 }
 0x101   :  { %v706_v31 = vsel %vm4081_vm11, 0, %v705_v22  ;;  %595 = vst [vmem:[#allocation2 + $0x7c] sm:$0x1] %v594_v21  ;;  %v729_v24 = vld [vmem:[#allocation2 + $0x48] sm:$0xf] }
 0x102   :  { %707 = vst [vmem:[#allocation2 + $0x74] sm:$0x1] %v706_v31  ;;  %v315_v35 = vadd.f32 %v4003_v40, %v277_v29  ;;  %v458_v41 = vrot.slane %v456_v32, 7  ;;  %v3678_v43 = vld [vmem:[#allocation3 + $0xb8] sm:$0xf0] }
 0x103   :  { %v3150_v45 = vor.u32 %v3678_v43, %v3149_v39  ;;  %1123 = vst [vmem:[#allocation3 + $0xe8] sm:$0xf] %v942_v28  ;;  %v3683_v62 = vld [vmem:[#allocation3 + $0xe4] sm:$0xf]  ;;  %v4291_v31 = vld [vmem:[#allocation2 + $0x60] sm:$0xf] }
 0x104   :  { %v333_v44 = vmax.f32 %v315_v35, 0.0  ;;  %v461_v46 = vor.u32 %v459_v33, %v458_v41  ;;  %v462_v47 = vrot.slane %v458_v41, 4  ;;  %1167 = vst [vmem:[#allocation3 + $0xa4] sm:$0xf] %v928_v10  ;;  %v961_v10 = vshll.u32 %v810_v30, 16 }
 0x105   :  { %2550 = vmatmul.bf16.gmra.mxu0 %v3150_v45  ;;  %1168 = vst [vmem:[#allocation3 + $0xc8] sm:$0xf] %v942_v28  ;;  %v3187_v12 = vld [vmem:[#allocation3 + $0x104] sm:$0xf0]  ;;  %v3679_v19 = vld [vmem:[#allocation3 + $0xc0] sm:$0xf0] }
 0x106   :  { %v659_v50 = vld [vmem:[#allocation2 + $0x78] sm:$0x1]  ;;  %v349_v51 = vpack.c.bf16 %v333_v44, %v333_v44  ;;  %v597_v54 = vsel %vm4038_vm6, %v461_v46, %v596_v34  ;;  %v600_v63 = vsel %vm4045_vm7, %v462_v47, %v599_v48  ;;  %v3190_v18 = vor.u32 %v3683_v62, %v3187_v12  ;;  %748 = vst [vmem:[#allocation3 + $0x120] sm:$0xf] %v730_v55  ;;  %v605_v30 = vld [vmem:[#allocation2 + $0x8c] sm:$0x1] }
 0x107   :  { %v660_v53 = vsel %vm4045_vm7, 0, %v659_v50  ;;  %v191_v58 = vpop.f32.mrf.mxu0  ;;  %598 = vst [vmem:[#allocation2 + $0x80] sm:$0xf] %v597_v54  ;;  %v963_v21 = vrot.slane %v961_v10, 5  ;;  %v3158_v15 = vor.u32 %v3679_v19, %v3157_v8  ;;  %v967_v28 = vshll.u32 %v811_v4, 16 }
 0x108   :  { %661 = vst [vmem:[#allocation2 + $0x78] sm:$0x1] %v660_v53  ;;  %v708_v61 = vld [vmem:[#allocation2 + $0x7c] sm:$0x1]  ;;  %v464_v2 = vshrl.u32 %v349_v51, 16  ;;  %v279_v5 = vmul.f32 %v3992_v36, %v191_v58  ;;  %v467_v16 = vshll.u32 %v349_v51, 16  ;;  %v950_v36 = vor.u32 %v949_v57, %v946_v56  ;;  %2604 = vmatmul.bf16.gmra.mxu1 %v3190_v18  ;;  %v4306_v56 = vpop.f32.mrf.mxu1 }
 0x109   :  { %v709_v6 = vsel %vm4081_vm11, 0, %v708_v61  ;;  %601 = vst [vmem:[#allocation2 + $0x84] sm:$0x1] %v600_v63  ;;  %v964_v22 = vor.u32 %v963_v21, %v960_v9  ;;  %2648 = vmatmul.bf16.gmra.mxu2 %v3158_v15  ;;  %v4293_v32 = vld [vmem:[#allocation2 + $0x68] sm:$0xf]  ;;  %v955_v34 = vrot.slane %v953_v20, 5 }
 0x10a   :  { %710 = vst [vmem:[#allocation2 + $0x7c] sm:$0x1] %v709_v6  ;;  %v466_v14 = vrot.slane %v464_v2, 7  ;;  %v317_v17 = vadd.f32 %v4003_v40, %v279_v5  ;;  %v951_v33 = vrot.slane %v950_v36, 4  ;;  %v969_v43 = vrot.slane %v967_v28, 5 }
 0x10b   :  { %749 = vst [vmem:[#allocation3 + $0x144] sm:$0xf] %v731_v1  ;;  %v965_v41 = vrot.slane %v964_v22, 4  ;;  %v608_v48 = vld [vmem:[#allocation2 + $0x90] sm:$0xf]  ;;  %v986_v55 = vshrl.u32 %v4293_v32, 16 }
 0x10c   :  { %v469_v25 = vor.u32 %v467_v16, %v466_v14  ;;  %v334_v29 = vmax.f32 %v317_v17, 0.0  ;;  %764 = vst [vmem:[#allocation3 + $0x124] sm:$0xf] %v731_v1  ;;  %v470_v40 = vrot.slane %v466_v14, 4  ;;  %v611_v49 = vld [vmem:[#allocation2 + $0x94] sm:$0x1]  ;;  %v956_v53 = vsel %vm4049_vm10, %v951_v33, %v955_v34 }
 0x10d   :  { %778 = vst [vmem:[#allocation3 + $0xe0] sm:$0xf] %v728_v23  ;;  %v804_v50 = vld [vmem:[#allocation2 + $0x40] sm:$0xf]  ;;  %v970_v58 = vsel %vm4049_vm10, %v965_v41, %v969_v43  ;;  %v972_v59 = vshrl.u32 %v4291_v31, 16  ;;  %v989_v4 = vshll.u32 %v4293_v32, 16 }
 0x10e   :  { %v350_v35 = vpack.c.bf16 %v334_v29, %v334_v29  ;;  %v662_v37 = vld [vmem:[#allocation2 + $0x80] sm:$0x1]  ;;  %779 = vst [vmem:[#allocation3 + $0x104] sm:$0xf] %v729_v24  ;;  %v603_v39 = vsel %vm4038_vm6, %v469_v25, %v602_v26  ;;  %v606_v47 = vsel %vm4045_vm7, %v470_v40, %v605_v30  ;;  %v805_v1 = vld [vmem:[#allocation2 + $0x44] sm:$0x1] }
 0x10f   :  { %v663_v42 = vsel %vm4045_vm7, 0, %v662_v37  ;;  %763 = vst [vmem:[#allocation3 + $0x100] sm:$0xf] %v728_v23  ;;  %v3213_v52 = vld [vmem:[#allocation3 + $0x120] sm:$0xf]  ;;  %v1088_v2 = vshrl.u32 %v804_v50, 16 }
 0x110   :  { %v472_v44 = vshrl.u32 %v350_v35, 16  ;;  %v475_v45 = vshll.u32 %v350_v35, 16  ;;  %664 = vst [vmem:[#allocation2 + $0x80] sm:$0x1] %v663_v42  ;;  %v711_v46 = vld [vmem:[#allocation2 + $0x84] sm:$0x1]  ;;  %v4324_v37 = vpop.f32.mrf.mxu1 }
 0x111   :  { %v712_v51 = vsel %vm4081_vm11, 0, %v711_v46  ;;  %604 = vst [vmem:[#allocation2 + $0x88] sm:$0xf] %v603_v39  ;;  %v732_v6 = vld [vmem:[#allocation2 + $0x60] sm:$0xf]  ;;  %v1091_v8 = vshll.u32 %v804_v50, 16 }
 0x112   :  { %v474_v54 = vrot.slane %v472_v44, 7  ;;  %713 = vst [vmem:[#allocation2 + $0x84] sm:$0x1] %v712_v51  ;;  %v3695_v57 = vld [vmem:[#allocation3 + $0x140] sm:$0xf0]  ;;  %v1090_v14 = vrot.slane %v1088_v2, 4 }
 0x113   :  { %v3214_v61 = vor.u32 %v3695_v57, %v3213_v52  ;;  %607 = vst [vmem:[#allocation2 + $0x8c] sm:$0x1] %v606_v47  ;;  %v975_v16 = vshll.u32 %v4291_v31, 16  ;;  %v1093_v18 = vrot.slane %v1091_v8, 5  ;;  %v813_v19 = vld [vmem:[#allocation2 + $0x64] sm:$0x1] }
 0x114   :  { %v477_v62 = vor.u32 %v475_v45, %v474_v54  ;;  %v478_v63 = vrot.slane %v474_v54, 4  ;;  %v3185_v5 = vld [vmem:[#allocation3 + $0xe0] sm:$0xf]  ;;  %1079 = vst [vmem:[#allocation3 + $0x12c] sm:$0xf] %v956_v53  ;;  %v974_v36 = vrot.slane %v972_v59, 4 }
 0x115   :  { %2462 = vmatmul.bf16.gmra.mxu3 %v3214_v61  ;;  %v3687_v9 = vld [vmem:[#allocation3 + $0x100] sm:$0xf0]  ;;  %1080 = vst [vmem:[#allocation3 + $0x150] sm:$0xf] %v970_v58  ;;  %v4317_v20 = vld [vmem:[#allocation2 + $0x78] sm:$0xf]  ;;  %v1094_v3 = vor.u32 %v1093_v18, %v1090_v14 }
 0x116   :  { %v609_v10 = vsel %vm4038_vm6, %v477_v62, %v608_v48  ;;  %v612_v12 = vsel %vm4045_vm7, %v478_v63, %v611_v49  ;;  %v3186_v17 = vor.u32 %v3687_v9, %v3185_v5  ;;  %1125 = vst [vmem:[#allocation3 + $0x130] sm:$0xf] %v970_v58  ;;  %v733_v21 = vld [vmem:[#allocation2 + $0x68] sm:$0xf]  ;;  %v1097_v24 = vshll.u32 %v805_v1, 16  ;;  %v3737_v42 = vld [vmem:[%s4892_s4 + $0x50] sm:$0xff] }
 0x117   :  { %610 = vst [vmem:[#allocation2 + $0x90] sm:$0xf] %v609_v10  ;;  %v977_v15 = vrot.slane %v975_v16, 5  ;;  %v981_v26 = vshll.u32 %v813_v19, 16  ;;  %v988_v22 = vrot.slane %v986_v55, 4  ;;  %v991_v28 = vrot.slane %v989_v4, 5  ;;  %2488 = vmatpush.bf16.msrb.mxu3 %v3737_v42 }
 0x118   :  { %2555 = vmatmul.bf16.gmra.mxu0 %v3186_v17  ;;  %v665_v23 = vld [vmem:[#allocation2 + $0x88] sm:$0x1]  ;;  %613 = vst [vmem:[#allocation2 + $0x94] sm:$0x1] %v612_v12  ;;  %v815_v40 = vld [vmem:[#allocation2 + $0x6c] sm:$0x1]  ;;  %v4348_v12 = vpop.f32.mrf.mxu1 }
 0x119   :  { %v666_v25 = vsel %vm4045_vm7, 0, %v665_v23  ;;  %750 = vst [vmem:[#allocation3 + $0x168] sm:$0xf] %v732_v6  ;;  %v978_v30 = vor.u32 %v977_v15, %v974_v36  ;;  %v816_v31 = vld [vmem:[#allocation2 + $0x70] sm:$0xf]  ;;  %v1014_v32 = vshrl.u32 %v4317_v20, 16  ;;  %v992_v35 = vor.u32 %v991_v28, %v988_v22 }
 0x11a   :  { %667 = vst [vmem:[#allocation2 + $0x88] sm:$0x1] %v666_v25  ;;  %v714_v29 = vld [vmem:[#allocation2 + $0x8c] sm:$0x1]  ;;  %v1095_v41 = vrot.slane %v1094_v3, 4  ;;  %v1099_v44 = vrot.slane %v1097_v24, 5 }
 0x11b   :  { %v715_v33 = vsel %vm4081_vm11, 0, %v714_v29  ;;  %v3692_v34 = vld [vmem:[#allocation3 + $0x12c] sm:$0xf]  ;;  %751 = vst [vmem:[#allocation3 + $0x18c] sm:$0xf] %v733_v21  ;;  %v983_v45 = vrot.slane %v981_v26, 5 }
 0x11c   :  { %716 = vst [vmem:[#allocation2 + $0x8c] sm:$0x1] %v715_v33  ;;  %v3223_v39 = vld [vmem:[#allocation3 + $0x14c] sm:$0xf0]  ;;  %v995_v46 = vshll.u32 %v815_v40, 16  ;;  %v979_v48 = vrot.slane %v978_v30, 4  ;;  %v1100_v54 = vsel %vm4049_vm10, %v1095_v41, %v1099_v44 }
 0x11d   :  { %v3226_v43 = vor.u32 %v3692_v34, %v3223_v39  ;;  %765 = vst [vmem:[#allocation3 + $0x148] sm:$0xf] %v732_v6  ;;  %v3736_v49 = vld [vmem:[%s4892_s4 + $0x48] sm:$0xff]  ;;  %v993_v52 = vrot.slane %v992_v35, 4  ;;  %v1000_v55 = vshrl.u32 %v816_v31, 16  ;;  %v1003_v57 = vshll.u32 %v816_v31, 16 }
 0x11e   :  { %v668_v47 = vld [vmem:[#allocation2 + $0x90] sm:$0x1]  ;;  %766 = vst [vmem:[#allocation3 + $0x16c] sm:$0xf] %v733_v21  ;;  %v1017_v58 = vshll.u32 %v4317_v20, 16  ;;  %v997_v59 = vrot.slane %v995_v46, 5  ;;  %v984_v7 = vsel %vm4049_vm10, %v979_v48, %v983_v45  ;;  %2489 = vmatpush.bf16.msrb.mxu3 %v3736_v49 }
 0x11f   :  { %2609 = vmatmul.bf16.gmra.mxu1 %v3226_v43  ;;  %v669_v50 = vsel %vm4045_vm7, 0, %v668_v47  ;;  %v717_v51 = vld [vmem:[#allocation2 + $0x94] sm:$0x1]  ;;  %780 = vst [vmem:[#allocation3 + $0x128] sm:$0xf] %v732_v6  ;;  %v1002_v4 = vrot.slane %v1000_v55, 4 }
 0x120   :  { %670 = vst [vmem:[#allocation2 + $0x90] sm:$0x1] %v669_v50  ;;  %v718_v53 = vsel %vm4081_vm11, 0, %v717_v51  ;;  %v3249_v61 = vld [vmem:[#allocation3 + $0x168] sm:$0xf]  ;;  %v998_v1 = vsel %vm4049_vm10, %v993_v52, %v997_v59  ;;  %v1005_v5 = vrot.slane %v1003_v57, 5  ;;  %v4374_v49 = vpop.f32.mrf.mxu1 }
 0x121   :  { %719 = vst [vmem:[#allocation2 + $0x94] sm:$0x1] %v718_v53  ;;  %v4341_v63 = vld [vmem:[#allocation2 + $0x88] sm:$0xf]  ;;  %v817_v2 = vld [vmem:[#allocation2 + $0x74] sm:$0x1] }
 0x122   :  { %v3704_v62 = vld [vmem:[#allocation3 + $0x188] sm:$0xf0]  ;;  %781 = vst [vmem:[#allocation3 + $0x14c] sm:$0xf] %v733_v21  ;;  %v1016_v6 = vrot.slane %v1014_v32, 4  ;;  %v1019_v9 = vrot.slane %v1017_v58, 5  ;;  %v1006_v16 = vor.u32 %v1005_v5, %v1002_v4 }
 0x123   :  { %v3250_v38 = vor.u32 %v3704_v62, %v3249_v61  ;;  %1124 = vst [vmem:[#allocation3 + $0x10c] sm:$0xf] %v1100_v54  ;;  %v819_v8 = vld [vmem:[#allocation2 + $0x7c] sm:$0x1]  ;;  %v820_v14 = vld [vmem:[#allocation2 + $0x80] sm:$0xf] }
 0x124   :  { %1169 = vst [vmem:[#allocation3 + $0xec] sm:$0xf] %v1100_v54  ;;  %v3790_v10 = vld [vmem:[%s4892_s4 + $0x1f8] sm:$0xff]  ;;  %v734_v17 = vld [vmem:[#allocation2 + $0x70] sm:$0xf]  ;;  %v1009_v18 = vshll.u32 %v817_v2, 16  ;;  %v1020_v19 = vor.u32 %v1019_v9, %v1016_v6 }
 0x125   :  { %2467 = vmatmul.bf16.gmra.mxu3 %v3250_v38  ;;  %1081 = vst [vmem:[#allocation3 + $0x174] sm:$0xf] %v984_v7  ;;  %2777 = vmatpush.bf16.msra.mxu1 %v3790_v10  ;;  %v3789_v36 = vld [vmem:[%s4892_s4 + $0x1f0] sm:$0xff]  ;;  %v1042_v20 = vshrl.u32 %v4341_v63, 16  ;;  %v3193_v21 = vld [vmem:[#allocation3 + $0xe8] sm:$0xf] }
 0x126   :  { %4906 = vst [vmem:[#allocation4_spill] sm:$0xff] %v4348_v12  ;;  %v735_v23 = vld [vmem:[#allocation2 + $0x78] sm:$0xf]  ;;  %v1023_v3 = vshll.u32 %v819_v8, 16  ;;  %v3221_v24 = vld [vmem:[#allocation3 + $0x128] sm:$0xf] }
 0x127   :  { %1082 = vst [vmem:[#allocation3 + $0x198] sm:$0xf] %v998_v1  ;;  %v1045_v25 = vshll.u32 %v4341_v63, 16  ;;  %v1007_v28 = vrot.slane %v1006_v16, 4  ;;  %v1011_v40 = vrot.slane %v1009_v18, 5  ;;  %v1021_v30 = vrot.slane %v1020_v19, 4 }
 0x128   :  { %1126 = vst [vmem:[#allocation3 + $0x154] sm:$0xf] %v984_v7  ;;  %v1028_v31 = vshrl.u32 %v820_v14, 16  ;;  %v1025_v33 = vrot.slane %v1023_v3, 5  ;;  %v1031_v34 = vshll.u32 %v820_v14, 16  ;;  %v3782_v39 = vld [vmem:[%s4892_s4 + $0x1b8] sm:$0xff] }
 0x129   :  { %1127 = vst [vmem:[#allocation3 + $0x178] sm:$0xf] %v998_v1  ;;  %v3696_v15 = vld [vmem:[#allocation3 + $0x148] sm:$0xf0]  ;;  %2778 = vmatpush.bf16.msra.mxu1 %v3789_v36  ;;  %v1012_v43 = vsel %vm4049_vm10, %v1007_v28, %v1011_v40  ;;  %v3735_v44 = vld [vmem:[%s4892_s4 + $0x40] sm:$0xff]  ;;  %2728 = vmatpush.bf16.msra.mxu0 %v3782_v39  ;;  %v3781_v46 = vld [vmem:[%s4892_s4 + $0x1b0] sm:$0xff]  ;;  %v4388_v36 = vpop.f32.mrf.mxu1 }
 0x12a   :  { %1171 = vst [vmem:[#allocation3 + $0x134] sm:$0xf] %v984_v7  ;;  %v3222_v26 = vor.u32 %v3696_v15, %v3221_v24  ;;  %v3688_v22 = vld [vmem:[#allocation3 + $0x108] sm:$0xf0]  ;;  %v1026_v45 = vsel %vm4049_vm10, %v1021_v30, %v1025_v33  ;;  %v3787_v47 = vld [vmem:[%s4892_s4 + $0x1e0] sm:$0xff]  ;;  %v1030_v48 = vrot.slane %v1028_v31, 4  ;;  %2490 = vmatpush.bf16.msrb.mxu3 %v3735_v44 }
 0x12b   :  { %1172 = vst [vmem:[#allocation3 + $0x158] sm:$0xf] %v998_v1  ;;  %v3194_v29 = vor.u32 %v3688_v22, %v3193_v21  ;;  %v3788_v41 = vld [vmem:[%s4892_s4 + $0x1e8] sm:$0xff]  ;;  %v1033_v50 = vrot.slane %v1031_v34, 5  ;;  %v821_v51 = vld [vmem:[#allocation2 + $0x84] sm:$0x1] }
 0x12c   :  { %752 = vst [vmem:[#allocation3 + $0x1b0] sm:$0xf] %v734_v17  ;;  %2560 = vmatmul.bf16.gmra.mxu0 %v3222_v26  ;;  %v3701_v32 = vld [vmem:[#allocation3 + $0x174] sm:$0xf]  ;;  %v1044_v52 = vrot.slane %v1042_v20, 4  ;;  %v1047_v53 = vrot.slane %v1045_v25, 5 }
 0x12d   :  { %753 = vst [vmem:[#allocation3 + $0x1d4] sm:$0xf] %v735_v23  ;;  %2653 = vmatmul.bf16.gmra.mxu2 %v3194_v29  ;;  %2779 = vmatpush.bf16.msra.mxu1 %v3788_v41  ;;  %v823_v55 = vld [vmem:[#allocation2 + $0x8c] sm:$0x1]  ;;  %v1034_v57 = vor.u32 %v1033_v50, %v1030_v48  ;;  %v3786_v62 = vld [vmem:[%s4892_s4 + $0x1d8] sm:$0xff]  ;;  %v1037_v38 = vshll.u32 %v821_v51, 16 }
 0x12e   :  { %v3259_v35 = vld [vmem:[#allocation3 + $0x194] sm:$0xf0]  ;;  %767 = vst [vmem:[#allocation3 + $0x190] sm:$0xf] %v734_v17  ;;  %2729 = vmatpush.bf16.msra.mxu0 %v3781_v46  ;;  %v1048_v59 = vor.u32 %v1047_v53, %v1044_v52  ;;  %v3780_v61 = vld [vmem:[%s4892_s4 + $0x1a8] sm:$0xff]  ;;  %v1051_v2 = vshll.u32 %v823_v55, 16 }
 0x12f   :  { %v3262_v42 = vor.u32 %v3701_v32, %v3259_v35  ;;  %768 = vst [vmem:[#allocation3 + $0x1b4] sm:$0xf] %v735_v23  ;;  %v736_v63 = vld [vmem:[#allocation2 + $0x80] sm:$0xf]  ;;  %v737_v1 = vld [vmem:[#allocation2 + $0x88] sm:$0xf] }
 0x130   :  { %782 = vst [vmem:[#allocation3 + $0x170] sm:$0xf] %v734_v17  ;;  %v1035_v4 = vrot.slane %v1034_v57, 4  ;;  %v1049_v5 = vrot.slane %v1048_v59, 4  ;;  %v3779_v6 = vld [vmem:[%s4892_s4 + $0x1a0] sm:$0xff]  ;;  %v3785_v8 = vld [vmem:[%s4892_s4 + $0x1d0] sm:$0xff] }
 0x131   :  { %4907 = vst [vmem:[#allocation5_spill] sm:$0xff] %v4374_v49  ;;  %2614 = vmatmul.bf16.gmra.mxu1 %v3262_v42  ;;  %v3697_v16 = vld [vmem:[#allocation3 + $0x150] sm:$0xf0]  ;;  %v1039_v17 = vrot.slane %v1037_v38, 5  ;;  %v1053_v19 = vrot.slane %v1051_v2, 5  ;;  %v3774_v29 = vld [vmem:[%s4892_s4 + $0x178] sm:$0xff] }
 0x132   :  { %783 = vst [vmem:[#allocation3 + $0x194] sm:$0xf] %v735_v23  ;;  %2780 = vmatpush.bf16.msra.mxu1 %v3787_v47  ;;  %2730 = vmatpush.bf16.msra.mxu0 %v3780_v61  ;;  %v3229_v20 = vld [vmem:[#allocation3 + $0x130] sm:$0xf]  ;;  %v1182_v23 = vld [vmem:[#allocation2 + $0xc] sm:$0x1]  ;;  %v4426_v61 = vpop.f32.mrf.mxu1 }
 0x133   :  { %1083 = vst [vmem:[#allocation3 + $0x1bc] sm:$0xf] %v1012_v43  ;;  %v3285_v54 = vld [vmem:[#allocation3 + $0x1b0] sm:$0xf]  ;;  %v1040_v21 = vsel %vm4049_vm10, %v1035_v4, %v1039_v17  ;;  %v3230_v3 = vor.u32 %v3697_v16, %v3229_v20  ;;  %v1054_v15 = vsel %vm4049_vm10, %v1049_v5, %v1053_v19  ;;  %v1181_v25 = vld [vmem:[#allocation2 + $0x8] sm:$0xe]  ;;  %2679 = vmatpush.bf16.msra.mxu3 %v3774_v29 }
 0x134   :  { %1084 = vst [vmem:[#allocation3 + $0x1e0] sm:$0xf] %v1026_v45  ;;  %v3713_v58 = vld [vmem:[#allocation3 + $0x1d0] sm:$0xf0]  ;;  %v1183_v28 = vld [vmem:[#allocation2 + $0x10] sm:$0xe] }
 0x135   :  { %1128 = vst [vmem:[#allocation3 + $0x19c] sm:$0xf] %v1012_v43  ;;  %v3286_v7 = vor.u32 %v3713_v58, %v3285_v54  ;;  %v1184_v26 = vld [vmem:[#allocation2 + $0x14] sm:$0x1]  ;;  %v3778_v40 = vld [vmem:[%s4892_s4 + $0x198] sm:$0xff]  ;;  %v3784_v32 = vld [vmem:[%s4892_s4 + $0x1c8] sm:$0xff] }
 0x136   :  { %1129 = vst [vmem:[#allocation3 + $0x1c0] sm:$0xf] %v1026_v45  ;;  %2781 = vmatpush.bf16.msra.mxu1 %v3786_v62  ;;  %2731 = vmatpush.bf16.msra.mxu0 %v3779_v6  ;;  %v3798_v30 = vld [vmem:[%s4892_s4 + $0x238] sm:$0xff]  ;;  %v738_v31 = vld [vmem:[#allocation2 + $0x90] sm:$0xf]  ;;  %v1260_v34 = vrot.slane %v1182_v23, 5 }
 0x137   :  { %1173 = vst [vmem:[#allocation3 + $0x17c] sm:$0xf] %v1012_v43  ;;  %2472 = vmatmul.bf16.gmra.mxu3 %v3286_v7  ;;  %v3257_v9 = vld [vmem:[#allocation3 + $0x170] sm:$0xf]  ;;  %v1179_v33 = vld [vmem:[#allocation2] sm:$0xe]  ;;  %2826 = vmatpush.bf16.msra.mxu2 %v3798_v30 }
 0x138   :  { %1174 = vst [vmem:[#allocation3 + $0x1a0] sm:$0xf] %v1026_v45  ;;  %v739_v39 = vld [vmem:[#allocation2 + $0x98] sm:$0xf]  ;;  %v3777_v41 = vld [vmem:[%s4892_s4 + $0x190] sm:$0xff]  ;;  %v1264_v44 = vrot.slane %v1184_v26, 5 }
 0x139   :  { %v3705_v10 = vld [vmem:[#allocation3 + $0x190] sm:$0xf0]  ;;  %754 = vst [vmem:[#allocation3 + $0x1f8] sm:$0xf] %v736_v63  ;;  %v1180_v42 = vld [vmem:[#allocation2 + $0x4] sm:$0x1] }
 0x13a   :  { %v3258_v14 = vor.u32 %v3705_v10, %v3257_v9  ;;  %755 = vst [vmem:[#allocation3 + $0x21c] sm:$0xf] %v737_v1  ;;  %v3710_v24 = vld [vmem:[#allocation3 + $0x1bc] sm:$0xf]  ;;  %2782 = vmatpush.bf16.msra.mxu1 %v3785_v8  ;;  %2732 = vmatpush.bf16.msra.mxu0 %v3778_v40  ;;  %v1185_v43 = vld [vmem:[#allocation2 + $0x18] sm:$0xe] }
 0x13b   :  { %v3295_v18 = vld [vmem:[#allocation3 + $0x1dc] sm:$0xf0]  ;;  %769 = vst [vmem:[#allocation3 + $0x1d8] sm:$0xf] %v736_v63  ;;  %v3797_v45 = vld [vmem:[%s4892_s4 + $0x230] sm:$0xff]  ;;  %v3048_v48 = vrot.slane %v1181_v25, 9 }
 0x13c   :  { %4908 = vst [vmem:[#allocation6_spill] sm:$0xff] %v4388_v36  ;;  %2565 = vmatmul.bf16.gmra.mxu0 %v3258_v14  ;;  %v3298_v22 = vor.u32 %v3710_v24, %v3295_v18  ;;  %v1186_v47 = vld [vmem:[#allocation2 + $0x1c] sm:$0x1]  ;;  %v3783_v51 = vld [vmem:[%s4892_s4 + $0x1c0] sm:$0xff]  ;;  %v3049_v52 = vrot.slane %v1183_v28, 9  ;;  %v3776_v54 = vld [vmem:[%s4892_s4 + $0x188] sm:$0xff]  ;;  %2827 = vmatpush.bf16.msra.mxu2 %v3797_v45 }
 0x13d   :  { %770 = vst [vmem:[#allocation3 + $0x1fc] sm:$0xf] %v737_v1  ;;  %2658 = vmatmul.bf16.gmra.mxu2 %v3230_v3  ;;  %v1261_v55 = vsel %vm4414_vm14, %v3048_v48, %v1260_v34  ;;  %v3047_v57 = vrot.slane %v1179_v33, 9  ;;  %v1187_v58 = vld [vmem:[#allocation2 + $0x20] sm:$0xe]  ;;  %v3796_v7 = vld [vmem:[%s4892_s4 + $0x228] sm:$0xff] }
 0x13e   :  { %784 = vst [vmem:[#allocation3 + $0x1b8] sm:$0xf] %v736_v63  ;;  %2783 = vmatpush.bf16.msra.mxu1 %v3784_v32  ;;  %2733 = vmatpush.bf16.msra.mxu0 %v3777_v41  ;;  %v1188_v59 = vld [vmem:[#allocation2 + $0x24] sm:$0x1]  ;;  %v1265_v62 = vsel %vm4414_vm14, %v3049_v52, %v1264_v44  ;;  %v1256_v63 = vrot.slane %v1180_v42, 5  ;;  %v3050_v38 = vrot.slane %v1185_v43, 9 }
 0x13f   :  { %785 = vst [vmem:[#allocation3 + $0x1dc] sm:$0xf] %v737_v1  ;;  %v1268_v1 = vrot.slane %v1186_v47, 5  ;;  %v3706_v5 = vld [vmem:[#allocation3 + $0x198] sm:$0xf0]  ;;  %v3775_v6 = vld [vmem:[%s4892_s4 + $0x180] sm:$0xff] }
 0x140   :  { %1085 = vst [vmem:[#allocation3 + $0x204] sm:$0xf] %v1040_v21  ;;  %v3321_v50 = vld [vmem:[#allocation3 + $0x1f8] sm:$0xf]  ;;  %v824_v8 = vld [vmem:[#allocation2 + $0x90] sm:$0xf]  ;;  %2828 = vmatpush.bf16.msra.mxu2 %v3796_v7  ;;  %v1257_v20 = vsel %vm4414_vm14, %v3047_v57, %v1256_v63 }
 0x141   :  { %1086 = vst [vmem:[#allocation3 + $0x228] sm:$0xf] %v1054_v15  ;;  %v3722_v35 = vld [vmem:[#allocation3 + $0x218] sm:$0xf0]  ;;  %2619 = vmatmul.bf16.gmra.mxu1 %v3298_v22  ;;  %v1272_v9 = vrot.slane %v1188_v59, 5  ;;  %v1102_v14 = vshrl.u32 %v824_v8, 16 }
 0x142   :  { %1130 = vst [vmem:[#allocation3 + $0x1e4] sm:$0xf] %v1040_v21  ;;  %v3322_v53 = vor.u32 %v3722_v35, %v3321_v50  ;;  %2784 = vmatpush.bf16.msra.mxu1 %v3783_v51  ;;  %2734 = vmatpush.bf16.msra.mxu0 %v3776_v54  ;;  %v825_v10 = vld [vmem:[#allocation2 + $0x94] sm:$0x1]  ;;  %v1105_v16 = vshll.u32 %v824_v8, 16  ;;  %v3795_v19 = vld [vmem:[%s4892_s4 + $0x220] sm:$0xff] }
 0x143   :  { %1131 = vst [vmem:[#allocation3 + $0x208] sm:$0xf] %v1054_v15  ;;  %v1104_v23 = vrot.slane %v1102_v14, 4  ;;  %v1111_v24 = vshll.u32 %v825_v10, 16  ;;  %v3265_v25 = vld [vmem:[#allocation3 + $0x178] sm:$0xf] }
 0x144   :  { %1175 = vst [vmem:[#allocation3 + $0x1c4] sm:$0xf] %v1040_v21  ;;  %v3051_v21 = vrot.slane %v1187_v58, 9  ;;  %v1107_v3 = vrot.slane %v1105_v16, 5  ;;  %v3266_v26 = vor.u32 %v3706_v5, %v3265_v25  ;;  %v1190_v40 = vld [vmem:[#allocation2 + $0x2c] sm:$0x1]  ;;  %2829 = vmatpush.bf16.msra.mxu2 %v3795_v19 }
 0x145   :  { %1176 = vst [vmem:[#allocation3 + $0x1e8] sm:$0xf] %v1054_v15  ;;  %v3293_v2 = vld [vmem:[#allocation3 + $0x1b8] sm:$0xf]  ;;  %v1269_v15 = vsel %vm4414_vm14, %v3050_v38, %v1268_v1  ;;  %v1113_v32 = vrot.slane %v1111_v24, 5  ;;  %v3773_v33 = vld [vmem:[%s4892_s4 + $0x170] sm:$0xff] }
 0x146   :  { %786 = vst [vmem:[#allocation3 + $0x200] sm:$0xf] %v738_v31  ;;  %v3714_v4 = vld [vmem:[#allocation3 + $0x1d8] sm:$0xf0]  ;;  %2735 = vmatpush.bf16.msra.mxu0 %v3775_v6  ;;  %v1108_v28 = vor.u32 %v1107_v3, %v1104_v23  ;;  %v1273_v29 = vsel %vm4414_vm14, %v3051_v21, %v1272_v9  ;;  %v1189_v35 = vld [vmem:[#allocation2 + $0x28] sm:$0xe]  ;;  %2680 = vmatpush.bf16.msra.mxu3 %v3773_v33 }
 0x147   :  { %4911 = vst [vmem:[#allocation7_spill] sm:$0xff] %v4426_v61  ;;  %2477 = vmatmul.bf16.gmra.mxu3 %v3322_v53  ;;  %v3294_v17 = vor.u32 %v3714_v4, %v3293_v2  ;;  %v3719_v22 = vld [vmem:[#allocation3 + $0x204] sm:$0xf]  ;;  %v3794_v34 = vld [vmem:[%s4892_s4 + $0x218] sm:$0xff]  ;;  %v1276_v41 = vrot.slane %v1190_v40, 5  ;;  %v3793_v43 = vld [vmem:[%s4892_s4 + $0x210] sm:$0xff] }
 0x148   :  { %787 = vst [vmem:[#allocation3 + $0x224] sm:$0xf] %v739_v39  ;;  %v3331_v18 = vld [vmem:[#allocation3 + $0x224] sm:$0xf0]  ;;  %v4451_v39 = vpop.f32.mrf.mxu1  ;;  %2830 = vmatpush.bf16.msra.mxu2 %v3794_v34  ;;  %v1191_v44 = vld [vmem:[#allocation2 + $0x30] sm:$0xe] }
 0x149   :  { %771 = vst [vmem:[#allocation3 + $0x220] sm:$0xf] %v738_v31  ;;  %v3334_v30 = vor.u32 %v3719_v22, %v3331_v18  ;;  %v1109_v31 = vrot.slane %v1108_v28, 4  ;;  %v3052_v45 = vrot.slane %v1189_v35, 9  ;;  %v3071_v47 = vld [vmem:[#allocation3 + $0x24] sm:$0xf0] }
 0x14a   :  { %1364 = vst [vmem:[#allocation3 + $0x1c] sm:$0xf] %v1261_v55  ;;  %v1192_v48 = vld [vmem:[#allocation2 + $0x34] sm:$0x1]  ;;  %v3655_v51 = vld [vmem:[#allocation3 + $0x4] sm:$0xf] }
 0x14b   :  { %1365 = vst [vmem:[#allocation3 + $0x40] sm:$0xf] %v1265_v62  ;;  %v1114_v42 = vsel %vm4049_vm10, %v1109_v31, %v1113_v32  ;;  %v1277_v50 = vsel %vm4414_vm14, %v3052_v45, %v1276_v41  ;;  %v3053_v52 = vrot.slane %v1191_v44, 9  ;;  %v1280_v53 = vrot.slane %v1192_v48, 5  ;;  %v1193_v58 = vld [vmem:[#allocation2 + $0x38] sm:$0xe] }
 0x14c   :  { %1335 = vst [vmem:[#allocation3 + $0x3c] sm:$0xf] %v1261_v55  ;;  %2570 = vmatmul.bf16.gmra.mxu0 %v3294_v17  ;;  %v3074_v54 = vor.u32 %v3655_v51, %v3071_v47  ;;  %2831 = vmatpush.bf16.msra.mxu2 %v3793_v43  ;;  %v3792_v55 = vld [vmem:[%s4892_s4 + $0x208] sm:$0xff]  ;;  %v1194_v38 = vld [vmem:[#allocation2 + $0x3c] sm:$0x1]  ;;  %v3791_v2 = vld [vmem:[%s4892_s4 + $0x200] sm:$0xff] }
 0x14d   :  { %1336 = vst [vmem:[#allocation3 + $0x60] sm:$0xf] %v1265_v62  ;;  %2663 = vmatmul.bf16.gmra.mxu2 %v3266_v26  ;;  %v1281_v57 = vsel %vm4414_vm14, %v3053_v52, %v1280_v53  ;;  %v3329_v59 = vld [vmem:[#allocation3 + $0x200] sm:$0xf]  ;;  %v3772_v7 = vld [vmem:[%s4892_s4 + $0x168] sm:$0xff]  ;;  %v3054_v4 = vrot.slane %v1193_v58, 9 }
 0x14e   :  { %1394 = vst [vmem:[#allocation3 + $0x20] sm:$0xf] %v1265_v62  ;;  %v3715_v62 = vld [vmem:[#allocation3 + $0x1e0] sm:$0xf0]  ;;  %2681 = vmatpush.bf16.msra.mxu3 %v3772_v7  ;;  %v1284_v5 = vrot.slane %v1194_v38, 5 }
 0x14f   :  { %1334 = vst [vmem:[#allocation3 + $0x18] sm:$0xf] %v1257_v20  ;;  %v3723_v63 = vld [vmem:[#allocation3 + $0x220] sm:$0xf0]  ;;  %v3301_v8 = vld [vmem:[#allocation3 + $0x1c0] sm:$0xf] }
 0x150   :  { %1366 = vst [vmem:[#allocation3 + $0x64] sm:$0xf] %v1269_v15  ;;  %v4468_v1 = vpop.f32.mrf.mxu1  ;;  %2832 = vmatpush.bf16.msra.mxu2 %v3792_v55  ;;  %v3330_v6 = vor.u32 %v3723_v63, %v3329_v59  ;;  %v1285_v9 = vsel %vm4414_vm14, %v3054_v4, %v1284_v5  ;;  %v3302_v10 = vor.u32 %v3715_v62, %v3301_v8  ;;  %v1195_v17 = vld [vmem:[#allocation2 + $0x40] sm:$0xe]  ;;  %v1196_v19 = vld [vmem:[#allocation2 + $0x44] sm:$0x1] }
 0x151   :  { %4912 = vst [vmem:[#allocation8_spill] sm:$0xff] %v4451_v39  ;;  %2624 = vmatmul.bf16.gmra.mxu1 %v3334_v30  ;;  %v3658_v16 = vld [vmem:[#allocation3 + $0x1c] sm:$0xf]  ;;  %v3063_v20 = vrot.slane %v1195_v17, 9  ;;  %v1356_v21 = vrot.slane %v1196_v19, 5  ;;  %v3771_v43 = vld [vmem:[%s4892_s4 + $0x160] sm:$0xff] }
 0x152   :  { %1367 = vst [vmem:[#allocation3 + $0x88] sm:$0xf] %v1273_v29  ;;  %v3095_v14 = vld [vmem:[#allocation3 + $0x3c] sm:$0xf0]  ;;  %v1197_v23 = vld [vmem:[#allocation2 + $0x48] sm:$0xe]  ;;  %2682 = vmatpush.bf16.msra.mxu3 %v3771_v43 }
 0x153   :  { %1337 = vst [vmem:[#allocation3 + $0x84] sm:$0xf] %v1269_v15  ;;  %v3098_v18 = vor.u32 %v3658_v16, %v3095_v14  ;;  %v3107_v3 = vld [vmem:[#allocation3 + $0x6c] sm:$0xf0]  ;;  %v1198_v24 = vld [vmem:[#allocation2 + $0x4c] sm:$0x1]  ;;  %v1357_v26 = vsel %vm4414_vm14, %v3063_v20, %v1356_v21 }
 0x154   :  { %1132 = vst [vmem:[#allocation3 + $0x22c] sm:$0xf] %v1114_v42  ;;  %2833 = vmatpush.bf16.msra.mxu2 %v3791_v2  ;;  %v1386_v22 = vrot.slane %v1198_v24, 5  ;;  %v3664_v28 = vld [vmem:[#allocation3 + $0x4c] sm:$0xf] }
 0x155   :  { %1177 = vst [vmem:[#allocation3 + $0x20c] sm:$0xf] %v1114_v42  ;;  %v1201_v40 = vld [vmem:[#allocation2 + $0x58] sm:$0xe]  ;;  %v806_v31 = vld [vmem:[#allocation2 + $0x48] sm:$0xf] }
 0x156   :  { %1338 = vst [vmem:[#allocation3 + $0xa8] sm:$0xf] %v1273_v29  ;;  %v3662_v32 = vld [vmem:[#allocation3 + $0x38] sm:$0xf0]  ;;  %v807_v33 = vld [vmem:[#allocation2 + $0x4c] sm:$0x1] }
 0x157   :  { %1395 = vst [vmem:[#allocation3 + $0x44] sm:$0xf] %v1269_v15  ;;  %2491 = vmatmul.bf16.vlgmr.msrb.gmra.mxu3 %v3074_v54  ;;  %v3065_v15 = vrot.slane %v1197_v23, 9  ;;  %v1134_v34 = vshrl.u32 %v806_v31, 16  ;;  %v1137_v35 = vshll.u32 %v806_v31, 16  ;;  %v1143_v48 = vshll.u32 %v807_v33, 16 }
 0x158   :  { %1396 = vst [vmem:[#allocation3 + $0x68] sm:$0xf] %v1273_v29  ;;  %v4475_v25 = vpop.f32.mrf.mxu1  ;;  %v3110_v29 = vor.u32 %v3664_v28, %v3107_v3  ;;  %v3093_v42 = vld [vmem:[#allocation3 + $0x18] sm:$0xf]  ;;  %v1202_v44 = vld [vmem:[#allocation2 + $0x5c] sm:$0x1] }
 0x159   :  { %1368 = vst [vmem:[#allocation3 + $0xac] sm:$0xf] %v1277_v50  ;;  %v1387_v30 = vsel %vm4414_vm14, %v3065_v15, %v1386_v22  ;;  %v1199_v45 = vld [vmem:[#allocation2 + $0x50] sm:$0xe]  ;;  %v1136_v47 = vrot.slane %v1134_v34, 4  ;;  %v1292_v51 = vrot.slane %v1202_v44, 5  ;;  %v3094_v58 = vor.u32 %v3662_v32, %v3093_v42 }
 0x15a   :  { %1369 = vst [vmem:[#allocation3 + $0xd0] sm:$0xf] %v1281_v57  ;;  %v1200_v52 = vld [vmem:[#allocation2 + $0x54] sm:$0x1]  ;;  %v3055_v53 = vrot.slane %v1199_v45, 9  ;;  %v1139_v55 = vrot.slane %v1137_v35, 5 }
 0x15b   :  { %1339 = vst [vmem:[#allocation3 + $0xcc] sm:$0xf] %v1277_v50  ;;  %v3724_v41 = vld [vmem:[#allocation3 + $0x228] sm:$0xf0]  ;;  %v1288_v54 = vrot.slane %v1200_v52, 5  ;;  %v1145_v2 = vrot.slane %v1143_v48, 5 }
 0x15c   :  { %4913 = vst [vmem:[#allocation9_spill] sm:$0xff] %v4468_v1  ;;  %2575 = vmatmul.bf16.gmra.mxu0 %v3330_v6  ;;  %v3131_v7 = vld [vmem:[#allocation3 + $0x84] sm:$0xf0]  ;;  %v1140_v38 = vor.u32 %v1139_v55, %v1136_v47  ;;  %v3667_v5 = vld [vmem:[#allocation3 + $0x64] sm:$0xf]  ;;  %v3770_v15 = vld [vmem:[%s4892_s4 + $0x158] sm:$0xff] }
 0x15d   :  { %1340 = vst [vmem:[#allocation3 + $0xf0] sm:$0xf] %v1281_v57  ;;  %2668 = vmatmul.bf16.gmra.mxu2 %v3302_v10  ;;  %v1289_v63 = vsel %vm4414_vm14, %v3055_v53, %v1288_v54  ;;  %v1203_v6 = vld [vmem:[#allocation2 + $0x60] sm:$0xe]  ;;  %v1204_v10 = vld [vmem:[#allocation2 + $0x64] sm:$0x1]  ;;  %2683 = vmatpush.bf16.msra.mxu3 %v3770_v15 }
 0x15e   :  { %1397 = vst [vmem:[#allocation3 + $0x8c] sm:$0xf] %v1277_v50  ;;  %v3056_v50 = vrot.slane %v1201_v40, 9  ;;  %v1141_v8 = vrot.slane %v1140_v38, 4  ;;  %v3057_v17 = vrot.slane %v1203_v6, 9  ;;  %v3769_v6 = vld [vmem:[%s4892_s4 + $0x150] sm:$0xff] }
 0x15f   :  { %1398 = vst [vmem:[#allocation3 + $0xb0] sm:$0xf] %v1281_v57  ;;  %v3337_v57 = vld [vmem:[#allocation3 + $0x208] sm:$0xf]  ;;  %v3143_v19 = vld [vmem:[#allocation3 + $0xb4] sm:$0xf0] }
 0x160   :  { %1370 = vst [vmem:[#allocation3 + $0xf4] sm:$0xf] %v1285_v9  ;;  %v1293_v59 = vsel %vm4414_vm14, %v3056_v50, %v1292_v51  ;;  %v3338_v62 = vor.u32 %v3724_v41, %v3337_v57  ;;  %v4488_v4 = vpop.f32.mrf.mxu1  ;;  %v1146_v14 = vsel %vm4049_vm10, %v1141_v8, %v1145_v2  ;;  %v3673_v21 = vld [vmem:[#allocation3 + $0x94] sm:$0xf]  ;;  %v1205_v3 = vld [vmem:[#allocation2 + $0x68] sm:$0xe] }
 0x161   :  { %1341 = vst [vmem:[#allocation3 + $0x114] sm:$0xf] %v1285_v9  ;;  %2785 = vmatmul.bf16.vlgmr.msra.gmra.mxu1 %v3098_v18  ;;  %v1296_v18 = vrot.slane %v1204_v10, 5  ;;  %v3146_v23 = vor.u32 %v3673_v21, %v3143_v19  ;;  %v1206_v22 = vld [vmem:[#allocation2 + $0x6c] sm:$0x1]  ;;  %2684 = vmatpush.bf16.msra.mxu3 %v3769_v6 }
 0x162   :  { %1399 = vst [vmem:[#allocation3 + $0xd4] sm:$0xf] %v1285_v9  ;;  %v3134_v9 = vor.u32 %v3667_v5, %v3131_v7  ;;  %v3663_v28 = vld [vmem:[#allocation3 + $0x40] sm:$0xf0]  ;;  %v1300_v40 = vrot.slane %v1206_v22, 5 }
 0x163   :  { %4914 = vst [vmem:[#allocation10_spill] sm:$0xff] %v4475_v25  ;;  %v1297_v20 = vsel %vm4414_vm14, %v3057_v17, %v1296_v18  ;;  %v3129_v31 = vld [vmem:[#allocation3 + $0x60] sm:$0xf]  ;;  %v3167_v42 = vld [vmem:[#allocation3 + $0xcc] sm:$0xf0] }
 0x164   :  { %1371 = vst [vmem:[#allocation3 + $0x118] sm:$0xf] %v1357_v26  ;;  %v3101_v33 = vld [vmem:[#allocation3 + $0x20] sm:$0xf]  ;;  %v3676_v43 = vld [vmem:[#allocation3 + $0xac] sm:$0xf] }
 0x165   :  { %1400 = vst [vmem:[#allocation3 + $0xf8] sm:$0xf] %v1357_v26  ;;  %v3671_v26 = vld [vmem:[#allocation3 + $0x80] sm:$0xf0]  ;;  %v3102_v41 = vor.u32 %v3663_v28, %v3101_v33  ;;  %v1207_v44 = vld [vmem:[#allocation2 + $0x70] sm:$0xe]  ;;  %v3170_v45 = vor.u32 %v3676_v43, %v3167_v42 }
 0x166   :  { %1401 = vst [vmem:[#allocation3 + $0x11c] sm:$0xf] %v1387_v30  ;;  %v4501_v30 = vpop.f32.mrf.mxu2  ;;  %v3130_v32 = vor.u32 %v3671_v26, %v3129_v31  ;;  %v1208_v47 = vld [vmem:[#allocation2 + $0x74] sm:$0x1]  ;;  %v3059_v50 = vrot.slane %v1207_v44, 9 }
 0x167   :  { %2496 = vmatmul.bf16.gmra.mxu3 %v3110_v29  ;;  %1372 = vst [vmem:[#allocation3 + $0x13c] sm:$0xf] %v1293_v59  ;;  %v3058_v29 = vrot.slane %v1205_v3, 9  ;;  %v1304_v51 = vrot.slane %v1208_v47, 5  ;;  %v3179_v52 = vld [vmem:[#allocation3 + $0xfc] sm:$0xf0] }
 0x168   :  { %4915 = vst [vmem:[#allocation11_spill] sm:$0xff] %v4488_v4  ;;  %v4492_v16 = vpop.f32.mrf.mxu3  ;;  %v4496_v24 = vpop.f32.mrf.mxu1  ;;  %v3682_v55 = vld [vmem:[#allocation3 + $0xdc] sm:$0xf]  ;;  %v3165_v5 = vld [vmem:[#allocation3 + $0xa8] sm:$0xf] }
 0x169   :  { %1343 = vst [vmem:[#allocation3 + $0x15c] sm:$0xf] %v1293_v59  ;;  %v1301_v35 = vsel %vm4414_vm14, %v3058_v29, %v1300_v40  ;;  %v1305_v53 = vsel %vm4414_vm14, %v3059_v50, %v1304_v51  ;;  %v3182_v57 = vor.u32 %v3682_v55, %v3179_v52  ;;  %v1209_v59 = vld [vmem:[#allocation2 + $0x78] sm:$0xe]  ;;  %v1210_v7 = vld [vmem:[#allocation2 + $0x7c] sm:$0x1] }
 0x16a   :  { %1342 = vst [vmem:[#allocation3 + $0x138] sm:$0xf] %v1289_v63  ;;  %v3672_v63 = vld [vmem:[#allocation3 + $0x88] sm:$0xf0]  ;;  %v3060_v38 = vrot.slane %v1209_v59, 9  ;;  %v1308_v2 = vrot.slane %v1210_v7, 5 }
 0x16b   :  { %1170 = vst [vmem:[#allocation3 + $0x110] sm:$0xf] %v1146_v14  ;;  %v3137_v10 = vld [vmem:[#allocation3 + $0x68] sm:$0xf]  ;;  %v3203_v18 = vld [vmem:[#allocation3 + $0x114] sm:$0xf0] }
 0x16c   :  { %2736 = vmatmul.bf16.vlgmr.msra.gmra.mxu0 %v3094_v58  ;;  %1373 = vst [vmem:[#allocation3 + $0x160] sm:$0xf] %v1297_v20  ;;  %v1309_v14 = vsel %vm4414_vm14, %v3060_v38, %v1308_v2  ;;  %v3138_v17 = vor.u32 %v3672_v63, %v3137_v10  ;;  %v1211_v21 = vld [vmem:[#allocation2 + $0x80] sm:$0xe]  ;;  %v1212_v15 = vld [vmem:[#allocation2 + $0x84] sm:$0x1] }
 0x16d   :  { %2673 = vmatmul.bf16.gmra.mxu2 %v3338_v62  ;;  %1344 = vst [vmem:[#allocation3 + $0x180] sm:$0xf] %v1297_v20  ;;  %v3680_v62 = vld [vmem:[#allocation3 + $0xc8] sm:$0xf0]  ;;  %v3061_v26 = vrot.slane %v1211_v21, 9  ;;  %v1312_v22 = vrot.slane %v1212_v15, 5 }
 0x16e   :  { %1402 = vst [vmem:[#allocation3 + $0x140] sm:$0xf] %v1297_v20  ;;  %v4511_v54 = vpop.f32.mrf.mxu2  ;;  %v3685_v20 = vld [vmem:[#allocation3 + $0xf4] sm:$0xf]  ;;  %v3215_v28 = vld [vmem:[#allocation3 + $0x144] sm:$0xf0] }
 0x16f   :  { %4916 = vst [vmem:[#allocation12_spill] sm:$0xff] %v4496_v24  ;;  %v1313_v29 = vsel %vm4414_vm14, %v3061_v26, %v1312_v22  ;;  %v3691_v40 = vld [vmem:[#allocation3 + $0x124] sm:$0xf]  ;;  %v1213_v33 = vld [vmem:[#allocation2 + $0x88] sm:$0xe] }
 0x170   :  { %v4503_v34 = vpop.f32.mrf.mxu3  ;;  %1374 = vst [vmem:[#allocation3 + $0x184] sm:$0xf] %v1301_v35  ;;  %v4507_v48 = vpop.f32.mrf.mxu1  ;;  %v3689_v42 = vld [vmem:[#allocation3 + $0x110] sm:$0xf0]  ;;  %v1214_v43 = vld [vmem:[#allocation2 + $0x8c] sm:$0x1] }
 0x171   :  { %2790 = vmatmul.bf16.gmra.mxu1 %v3134_v9  ;;  %1345 = vst [vmem:[#allocation3 + $0x1a4] sm:$0xf] %v1301_v35  ;;  %v3166_v9 = vor.u32 %v3680_v62, %v3165_v5  ;;  %v3681_v44 = vld [vmem:[#allocation3 + $0xd0] sm:$0xf0]  ;;  %v3062_v47 = vrot.slane %v1213_v33, 9  ;;  %v1316_v50 = vrot.slane %v1214_v43, 5 }
 0x172   :  { %1403 = vst [vmem:[#allocation3 + $0x164] sm:$0xf] %v1301_v35  ;;  %v4530_v35 = vpop.f32.mrf.mxu0  ;;  %v3201_v51 = vld [vmem:[#allocation3 + $0xf0] sm:$0xf]  ;;  %v3768_v52 = vld [vmem:[%s4892_s4 + $0x148] sm:$0xff] }
 0x173   :  { %4917 = vst [vmem:[#allocation13_spill] sm:$0xff] %v4507_v48  ;;  %v3173_v55 = vld [vmem:[#allocation3 + $0xb0] sm:$0xf]  ;;  %v3239_v62 = vld [vmem:[#allocation3 + $0x15c] sm:$0xf0]  ;;  %2685 = vmatpush.bf16.msra.mxu3 %v3768_v52 }
 0x174   :  { %1375 = vst [vmem:[#allocation3 + $0x1a8] sm:$0xf] %v1305_v53  ;;  %v3174_v59 = vor.u32 %v3681_v44, %v3173_v55  ;;  %v3694_v7 = vld [vmem:[#allocation3 + $0x13c] sm:$0xf]  ;;  %v1215_v63 = vld [vmem:[#allocation2 + $0x90] sm:$0xe] }
 0x175   :  { %1346 = vst [vmem:[#allocation3 + $0x1c8] sm:$0xf] %v1305_v53  ;;  %v3242_v2 = vor.u32 %v3694_v7, %v3239_v62  ;;  %v1216_v5 = vld [vmem:[#allocation2 + $0x94] sm:$0x1]  ;;  %v1217_v6 = vld [vmem:[#allocation2 + $0x98] sm:$0xe] }
 0x176   :  { %1404 = vst [vmem:[#allocation3 + $0x188] sm:$0xf] %v1305_v53  ;;  %v4522_v19 = vpop.f32.mrf.mxu2  ;;  %v3202_v53 = vor.u32 %v3689_v42, %v3201_v51  ;;  %v826_v26 = vld [vmem:[#allocation2 + $0x98] sm:$0xf]  ;;  %v827_v33 = vld [vmem:[#allocation2 + $0x9c] sm:$0x1] }
 0x177   :  { %2501 = vmatmul.bf16.gmra.mxu3 %v3146_v23  ;;  %1376 = vst [vmem:[#allocation3 + $0x1cc] sm:$0xf] %v1309_v14  ;;  %v3206_v23 = vor.u32 %v3685_v20, %v3203_v18  ;;  %v1218_v18 = vld [vmem:[#allocation2 + $0x9c] sm:$0x1]  ;;  %v3066_v20 = vrot.slane %v1217_v6, 9  ;;  %v3767_v7 = vld [vmem:[%s4892_s4 + $0x140] sm:$0xff] }
 0x178   :  { %v4518_v8 = vpop.f32.mrf.mxu1  ;;  %1347 = vst [vmem:[#allocation3 + $0x1ec] sm:$0xf] %v1309_v14  ;;  %v1390_v15 = vrot.slane %v1218_v18, 5  ;;  %v3237_v51 = vld [vmem:[#allocation3 + $0x138] sm:$0xf]  ;;  %2686 = vmatpush.bf16.msra.mxu3 %v3767_v7 }
 0x179   :  { %1405 = vst [vmem:[#allocation3 + $0x1ac] sm:$0xf] %v1309_v14  ;;  %v3064_v14 = vrot.slane %v1215_v63, 9  ;;  %v3698_v52 = vld [vmem:[#allocation3 + $0x158] sm:$0xf0] }
 0x17a   :  { %1377 = vst [vmem:[#allocation3 + $0x1f0] sm:$0xf] %v1313_v29  ;;  %v3703_v18 = vld [vmem:[#allocation3 + $0x184] sm:$0xf]  ;;  %v3323_v7 = vld [vmem:[#allocation3 + $0x21c] sm:$0xf0] }
 0x17b   :  { %1348 = vst [vmem:[#allocation3 + $0x210] sm:$0xf] %v1313_v29  ;;  %v3123_v4 = vld [vmem:[#allocation3 + $0x7c] sm:$0xf0]  ;;  %v3675_v1 = vld [vmem:[#allocation3 + $0xa4] sm:$0xf] }
 0x17c   :  { %2741 = vmatmul.bf16.gmra.mxu0 %v3130_v32  ;;  %v3218_v32 = vor.u32 %v3691_v40, %v3215_v28  ;;  %1406 = vst [vmem:[#allocation3 + $0x1d0] sm:$0xf] %v1313_v29  ;;  %v1148_v28 = vshrl.u32 %v826_v26, 16  ;;  %v1151_v29 = vshll.u32 %v826_v26, 16  ;;  %v3700_v40 = vld [vmem:[#allocation3 + $0x16c] sm:$0xf] }
 0x17d   :  { %2834 = vmatmul.bf16.vlgmr.msra.gmra.mxu2 %v3102_v41  ;;  %v3684_v39 = vld [vmem:[#allocation3 + $0xec] sm:$0xf]  ;;  %v3702_v49 = vld [vmem:[#allocation3 + $0x17c] sm:$0xf] }
 0x17e   :  { %v4532_v41 = vpop.f32.mrf.mxu2  ;;  %v1150_v43 = vrot.slane %v1148_v28, 4  ;;  %v1153_v44 = vrot.slane %v1151_v29, 5 }
 0x180   :  { %v4513_v58 = vpop.f32.mrf.mxu3  ;;  %v4528_v31 = vpop.f32.mrf.mxu1 }
 0x181   :  { %2795 = vmatmul.bf16.gmra.mxu1 %v3170_v45 }
 0x186   :  { %v4547_v21 = vpop.f32.mrf.mxu2 }
 0x187   :  { %2506 = vmatmul.bf16.gmra.mxu3 %v3182_v57  ;;  %v1317_v57 = vsel %vm4414_vm14, %v3062_v47, %v1316_v50  ;;  %v1157_v47 = vshll.u32 %v827_v33, 16  ;;  %v1154_v50 = vor.u32 %v1153_v44, %v1150_v43  ;;  %v3273_v33 = vld [vmem:[#allocation3 + $0x180] sm:$0xf] }
 0x188   :  { %v4524_v3 = vpop.f32.mrf.mxu3  ;;  %1378 = vst [vmem:[#allocation3 + $0x214] sm:$0xf] %v1317_v57  ;;  %v4541_v38 = vpop.f32.mrf.mxu1  ;;  %v3245_v44 = vld [vmem:[#allocation3 + $0x140] sm:$0xf] }
 0x189   :  { %1349 = vst [vmem:[#allocation3 + $0x234] sm:$0xf] %v1317_v57  ;;  %v1155_v46 = vrot.slane %v1154_v50, 4  ;;  %v3311_v50 = vld [vmem:[#allocation3 + $0x1ec] sm:$0xf0] }
 0x18a   :  { %1407 = vst [vmem:[#allocation3 + $0x1f4] sm:$0xf] %v1317_v57  ;;  %v3209_v57 = vld [vmem:[#allocation3 + $0xf8] sm:$0xf] }
 0x18c   :  { %2746 = vmatmul.bf16.gmra.mxu0 %v3166_v9  ;;  %v4543_v9 = vpop.f32.mrf.mxu0 }
 0x18d   :  { %2839 = vmatmul.bf16.gmra.mxu2 %v3138_v17  ;;  %v1360_v17 = vrot.slane %v1216_v5, 5 }
 0x18e   :  { %v4564_v6 = vpop.f32.mrf.mxu2 }
 0x18f   :  { %v1361_v22 = vsel %vm4414_vm14, %v3064_v14, %v1360_v17  ;;  %v3275_v17 = vld [vmem:[#allocation3 + $0x1a4] sm:$0xf0] }
 0x190   :  { %1379 = vst [vmem:[#allocation3 + $0x238] sm:$0xf] %v1361_v22  ;;  %v4553_v55 = vpop.f32.mrf.mxu1 }
 0x191   :  { %2800 = vmatmul.bf16.gmra.mxu1 %v3206_v23  ;;  %v3251_v23 = vld [vmem:[#allocation3 + $0x18c] sm:$0xf0]  ;;  %1408 = vst [vmem:[#allocation3 + $0x218] sm:$0xf] %v1361_v22  ;;  %v3709_v22 = vld [vmem:[#allocation3 + $0x1b4] sm:$0xf] }
 0x192   :  { %v3254_v42 = vor.u32 %v3700_v40, %v3251_v23  ;;  %v3707_v40 = vld [vmem:[#allocation3 + $0x1a0] sm:$0xf0] }
 0x193   :  { %v3274_v43 = vor.u32 %v3707_v40, %v3273_v33 }
 0x194   :  { %v4560_v63 = vpop.f32.mrf.mxu0 }
 0x196   :  { %v4572_v29 = vpop.f32.mrf.mxu2 }
 0x197   :  { %2511 = vmatmul.bf16.gmra.mxu3 %v3218_v32  ;;  %v1391_v32 = vsel %vm4414_vm14, %v3066_v20, %v1390_v15  ;;  %v3278_v20 = vor.u32 %v3703_v18, %v3275_v17  ;;  %v3287_v15 = vld [vmem:[#allocation3 + $0x1d4] sm:$0xf0]  ;;  %v3716_v17 = vld [vmem:[#allocation3 + $0x1e8] sm:$0xf0] }
 0x198   :  { %v4534_v45 = vpop.f32.mrf.mxu3  ;;  %1409 = vst [vmem:[#allocation3 + $0x23c] sm:$0xf] %v1391_v32  ;;  %v4568_v26 = vpop.f32.mrf.mxu1  ;;  %v3290_v13 = vor.u32 %v3709_v22, %v3287_v15  ;;  %v3699_v32 = vld [vmem:[#allocation3 + $0x160] sm:$0xf0]  ;;  %v3309_v22 = vld [vmem:[#allocation3 + $0x1c8] sm:$0xf] }
 0x199   :  { %v3310_v40 = vor.u32 %v3716_v17, %v3309_v22  ;;  %v3725_v17 = vld [vmem:[#allocation3 + $0x230] sm:$0xf0]  ;;  %v3345_v22 = vld [vmem:[#allocation3 + $0x210] sm:$0xf] }
 0x19c   :  { %2751 = vmatmul.bf16.gmra.mxu0 %v3202_v53  ;;  %v1159_v53 = vrot.slane %v1157_v47, 5  ;;  %v4570_v28 = vpop.f32.mrf.mxu0  ;;  %v3246_v47 = vor.u32 %v3699_v32, %v3245_v44  ;;  %v3281_v32 = vld [vmem:[#allocation3 + $0x188] sm:$0xf]  ;;  %v3721_v44 = vld [vmem:[#allocation3 + $0x214] sm:$0xf] }
 0x19d   :  { %2844 = vmatmul.bf16.gmra.mxu2 %v3174_v59  ;;  %v3690_v59 = vld [vmem:[#allocation3 + $0x118] sm:$0xf0] }
 0x19e   :  { %v1160_v5 = vsel %vm4049_vm10, %v1155_v46, %v1159_v53  ;;  %v3210_v14 = vor.u32 %v3690_v59, %v3209_v57  ;;  %v4580_v59 = vpop.f32.mrf.mxu2 }
 0x19f   :  { %1178 = vst [vmem:[#allocation3 + $0x230] sm:$0xf] %v1160_v5  ;;  %v3726_v25 = vld [vmem:[#allocation3 + $0x238] sm:$0xf0] }
 0x1a0   :  { %v4545_v10 = vpop.f32.mrf.mxu3 }
 0x1a1   :  { %2805 = vmatmul.bf16.gmra.mxu1 %v3242_v2  ;;  %4918 = vst [vmem:[#allocation14_spill] sm:$0xff] %v4545_v10  ;;  %v3238_v2 = vor.u32 %v3698_v52, %v3237_v51  ;;  %v4576_v51 = vpop.f32.mrf.mxu1  ;;  %v3712_v52 = vld [vmem:[#allocation3 + $0x1cc] sm:$0xf] }
 0x1a2   :  { %v3314_v57 = vor.u32 %v3712_v52, %v3311_v50 }
 0x1a4   :  { %v4578_v53 = vpop.f32.mrf.mxu0 }
 0x1a6   :  { %v4588_v15 = vpop.f32.mrf.mxu2 }
 0x1a7   :  { %2516 = vmatmul.bf16.gmra.mxu3 %v3254_v42 }
 0x1a8   :  { %v4555_v62 = vpop.f32.mrf.mxu3 }
 0x1a9   :  { %4919 = vst [vmem:[#allocation15_spill] sm:$0xff] %v4555_v62  ;;  %v3693_v62 = vld [vmem:[#allocation3 + $0x134] sm:$0xf] }
 0x1ac   :  { %2756 = vmatmul.bf16.gmra.mxu0 %v3238_v2  ;;  %v3718_v2 = vld [vmem:[#allocation3 + $0x1fc] sm:$0xf]  ;;  %v4586_v18 = vpop.f32.mrf.mxu0 }
 0x1ad   :  { %2849 = vmatmul.bf16.gmra.mxu2 %v3210_v14  ;;  %v3326_v5 = vor.u32 %v3718_v2, %v3323_v7  ;;  %v4584_v14 = vpop.f32.mrf.mxu1 }
 0x1ae   :  { %v4598_v2 = vpop.f32.mrf.mxu2 }
 0x1b0   :  { %v4566_v23 = vpop.f32.mrf.mxu3 }
 0x1b1   :  { %2810 = vmatmul.bf16.gmra.mxu1 %v3278_v20  ;;  %4920 = vst [vmem:[#allocation16_spill] sm:$0xff] %v4566_v23  ;;  %v3708_v20 = vld [vmem:[#allocation3 + $0x1a8] sm:$0xf0] }
 0x1b2   :  { %v3282_v33 = vor.u32 %v3708_v20, %v3281_v32  ;;  %v3717_v20 = vld [vmem:[#allocation3 + $0x1f0] sm:$0xf0]  ;;  %v3346_v32 = vor.u32 %v3725_v17, %v3345_v22 }
 0x1b4   :  { %v4596_v7 = vpop.f32.mrf.mxu0 }
 0x1b5   :  { %v4592_v50 = vpop.f32.mrf.mxu1 }
 0x1b6   :  { %4924 = vst [vmem:[#allocation20_spill] sm:$0xff] %v4592_v50 }
 0x1b7   :  { %2521 = vmatmul.bf16.gmra.mxu3 %v3290_v13 }
 0x1ba   :  { %v4574_v42 = vpop.f32.mrf.mxu3 }
 0x1bb   :  { %4921 = vst [vmem:[#allocation17_spill] sm:$0xff] %v4574_v42  ;;  %v3195_v42 = vld [vmem:[#allocation3 + $0x10c] sm:$0xf0] }
 0x1bc   :  { %2761 = vmatmul.bf16.gmra.mxu0 %v3274_v43  ;;  %v3347_v43 = vld [vmem:[#allocation3 + $0x234] sm:$0xf0]  ;;  %v3198_v23 = vor.u32 %v3684_v39, %v3195_v42 }
 0x1bd   :  { %2854 = vmatmul.bf16.gmra.mxu2 %v3246_v47  ;;  %v3350_v47 = vor.u32 %v3721_v44, %v3347_v43  ;;  %v4602_v44 = vpop.f32.mrf.mxu0  ;;  %v4614_v22 = vpop.f32.mrf.mxu1 }
 0x1be   :  { %4928 = vst [vmem:[#allocation24_spill] sm:$0xff] %v4614_v22  ;;  %v3711_v22 = vld [vmem:[#allocation3 + $0x1c4] sm:$0xf] }
 0x1c1   :  { %2815 = vmatmul.bf16.gmra.mxu1 %v3314_v57  ;;  %v3087_v57 = vld [vmem:[#allocation3 + $0x34] sm:$0xf0] }
 0x1c2   :  { %v4582_v46 = vpop.f32.mrf.mxu3 }
 0x1c3   :  { %4922 = vst [vmem:[#allocation18_spill] sm:$0xff] %v4582_v46 }
 0x1c7   :  { %2526 = vmatmul.bf16.gmra.mxu3 %v3326_v5  ;;  %v3657_v5 = vld [vmem:[#allocation3 + $0x14] sm:$0xf] }
 0x1c8   :  { %v3090_v48 = vor.u32 %v3657_v5, %v3087_v57  ;;  %v3353_v5 = vld [vmem:[#allocation3 + $0x218] sm:$0xf] }
 0x1c9   :  { %v3354_v17 = vor.u32 %v3726_v25, %v3353_v5 }
 0x1ca   :  { %v4590_v13 = vpop.f32.mrf.mxu3 }
 0x1cb   :  { %4923 = vst [vmem:[#allocation19_spill] sm:$0xff] %v4590_v13 }
 0x1cc   :  { %2766 = vmatmul.bf16.gmra.mxu0 %v3310_v40 }
 0x1cd   :  { %2859 = vmatmul.bf16.gmra.mxu2 %v3282_v33  ;;  %v3317_v33 = vld [vmem:[#allocation3 + $0x1d0] sm:$0xf] }
 0x1ce   :  { %v3318_v43 = vor.u32 %v3717_v20, %v3317_v33  ;;  %v4612_v20 = vpop.f32.mrf.mxu0 }
 0x1cf   :  { %4927 = vst [vmem:[#allocation23_spill] sm:$0xff] %v4612_v20 }
 0x1d1   :  { %2820 = vmatmul.bf16.gmra.mxu1 %v3350_v47  ;;  %v4604_v47 = vpop.f32.mrf.mxu2 }
 0x1d2   :  { %v4594_v52 = vpop.f32.mrf.mxu3 }
 0x1d3   :  { %4925 = vst [vmem:[#allocation21_spill] sm:$0xff] %v4594_v52  ;;  %v3666_v52 = vld [vmem:[#allocation3 + $0x5c] sm:$0xf] }
 0x1d4   :  { %v3126_v57 = vor.u32 %v3666_v52, %v3123_v4 }
 0x1d6   :  { %v4620_v52 = vpop.f32.mrf.mxu0 }
 0x1d7   :  { %2687 = vmatmul.bf16.vlgmr.msra.gmra.mxu3 %v3090_v48  ;;  %4930 = vst [vmem:[#allocation26_spill] sm:$0xff] %v4620_v52 }
 0x1d9   :  { %v4608_v48 = vpop.f32.mrf.mxu2 }
 0x1da   :  { %v4600_v40 = vpop.f32.mrf.mxu3  ;;  %4926 = vst [vmem:[#allocation22_spill] sm:$0xff] %v4608_v48 }
 0x1dc   :  { %2771 = vmatmul.bf16.gmra.mxu0 %v3346_v32 }
 0x1dd   :  { %2864 = vmatmul.bf16.gmra.mxu2 %v3318_v43  ;;  %v3159_v43 = vld [vmem:[#allocation3 + $0xc4] sm:$0xf0] }
 0x1de   :  { %v3162_v4 = vor.u32 %v3675_v1, %v3159_v43  ;;  %v4628_v5 = vpop.f32.mrf.mxu0 }
 0x1df   :  { %4933 = vst [vmem:[#allocation29_spill] sm:$0xff] %v4628_v5  ;;  %v3231_v5 = vld [vmem:[#allocation3 + $0x154] sm:$0xf0] }
 0x1e1   :  { %v4616_v32 = vpop.f32.mrf.mxu2 }
 0x1e2   :  { %v4606_v24 = vpop.f32.mrf.mxu3  ;;  %4929 = vst [vmem:[#allocation25_spill] sm:$0xff] %v4616_v32  ;;  %v3234_v32 = vor.u32 %v3693_v62, %v3231_v5 }
 0x1e6   :  { %v4638_v43 = vpop.f32.mrf.mxu0 }
 0x1e7   :  { %2692 = vmatmul.bf16.gmra.mxu3 %v3126_v57  ;;  %v4622_v57 = vpop.f32.mrf.mxu1  ;;  %4936 = vst [vmem:[#allocation32_spill] sm:$0xff] %v4638_v43 }
 0x1e8   :  { %4931 = vst [vmem:[#allocation27_spill] sm:$0xff] %v4622_v57 }
 0x1e9   :  { %v4626_v25 = vpop.f32.mrf.mxu2 }
 0x1ea   :  { %v4610_v13 = vpop.f32.mrf.mxu3  ;;  %4932 = vst [vmem:[#allocation28_spill] sm:$0xff] %v4626_v25 }
 0x1ed   :  { %2869 = vmatmul.bf16.gmra.mxu2 %v3354_v17 }
 0x1ee   :  { %v4646_v52 = vpop.f32.mrf.mxu0 }
 0x1ef   :  { %v4632_v61 = vpop.f32.mrf.mxu1  ;;  %4939 = vst [vmem:[#allocation35_spill] sm:$0xff] %v4646_v52 }
 0x1f0   :  { %4934 = vst [vmem:[#allocation30_spill] sm:$0xff] %v4632_v61 }
 0x1f1   :  { %v4634_v36 = vpop.f32.mrf.mxu2 }
 0x1f2   :  { %v4618_v33 = vpop.f32.mrf.mxu3  ;;  %4935 = vst [vmem:[#allocation31_spill] sm:$0xff] %v4634_v36 }
 0x1f6   :  { %v4654_v36 = vpop.f32.mrf.mxu0 }
 0x1f7   :  { %2697 = vmatmul.bf16.gmra.mxu3 %v3162_v4  ;;  %v4640_v4 = vpop.f32.mrf.mxu1  ;;  %4942 = vst [vmem:[#allocation38_spill] sm:$0xff] %v4654_v36  ;;  %v3303_v36 = vld [vmem:[#allocation3 + $0x1e4] sm:$0xf0] }
 0x1f8   :  { %4937 = vst [vmem:[#allocation33_spill] sm:$0xff] %v4640_v4 }
 0x1f9   :  { %v4642_v57 = vpop.f32.mrf.mxu2 }
 0x1fa   :  { %v4624_v46 = vpop.f32.mrf.mxu3  ;;  %4938 = vst [vmem:[#allocation34_spill] sm:$0xff] %v4642_v57  ;;  %v3267_v57 = vld [vmem:[#allocation3 + $0x19c] sm:$0xf0] }
 0x1fb   :  { %v3270_v62 = vor.u32 %v3702_v49, %v3267_v57 }
 0x1fe   :  { %v4662_v5 = vpop.f32.mrf.mxu0 }
 0x1ff   :  { %v4648_v39 = vpop.f32.mrf.mxu1  ;;  %4946 = vst [vmem:[#allocation42_spill] sm:$0xff] %v4662_v5 }
 0x200   :  { %4940 = vst [vmem:[#allocation36_spill] sm:$0xff] %v4648_v39 }
 0x201   :  { %v4650_v42 = vpop.f32.mrf.mxu2 }
 0x202   :  { %v4630_v17 = vpop.f32.mrf.mxu3  ;;  %4941 = vst [vmem:[#allocation37_spill] sm:$0xff] %v4650_v42 }
 0x207   :  { %2702 = vmatmul.bf16.gmra.mxu3 %v3198_v23  ;;  %v4656_v43 = vpop.f32.mrf.mxu1 }
 0x208   :  { %4943 = vst [vmem:[#allocation39_spill] sm:$0xff] %v4656_v43  ;;  %v4672_v43 = vpop.f32.mrf.mxu0 }
 0x209   :  { %v4660_v61 = vpop.f32.mrf.mxu2  ;;  %4951 = vst [vmem:[#allocation47_spill] sm:$0xff] %v4672_v43 }
 0x20a   :  { %v4636_v1 = vpop.f32.mrf.mxu3  ;;  %4945 = vst [vmem:[#allocation41_spill] sm:$0xff] %v4660_v61 }
 0x20f   :  { %v4666_v39 = vpop.f32.mrf.mxu1 }
 0x210   :  { %4948 = vst [vmem:[#allocation44_spill] sm:$0xff] %v4666_v39 }
 0x211   :  { %v4668_v42 = vpop.f32.mrf.mxu2 }
 0x212   :  { %v4644_v25 = vpop.f32.mrf.mxu3  ;;  %4949 = vst [vmem:[#allocation45_spill] sm:$0xff] %v4668_v42  ;;  %v3720_v42 = vld [vmem:[#allocation3 + $0x20c] sm:$0xf] }
 0x217   :  { %2707 = vmatmul.bf16.gmra.mxu3 %v3234_v32  ;;  %v4674_v10 = vpop.f32.mrf.mxu1 }
 0x218   :  { %4952 = vst [vmem:[#allocation48_spill] sm:$0xff] %v4674_v10 }
 0x219   :  { %v4676_v49 = vpop.f32.mrf.mxu2 }
 0x21a   :  { %v4652_v23 = vpop.f32.mrf.mxu3  ;;  %4953 = vst [vmem:[#allocation49_spill] sm:$0xff] %v4676_v49 }
 0x21f   :  { %v2786_v61 = vpop.f32.mrf.mxu1 }
 0x221   :  { %v2835_v5 = vpop.f32.mrf.mxu2 }
 0x222   :  { %v4658_v4 = vpop.f32.mrf.mxu3 }
 0x223   :  { %4944 = vst [vmem:[#allocation40_spill] sm:$0xff] %v4658_v4  ;;  %v3306_v4 = vor.u32 %v3711_v22, %v3303_v36  ;;  %v2493_v22 = vadd.f32 %v4600_v40, %v4501_v30  ;;  %v3857_v30 = vld [vmem:[%s4893_s2] sm:$0x3] }
 0x227   :  { %2712 = vmatmul.bf16.gmra.mxu3 %v3270_v62  ;;  %v2737_v62 = vpop.f32.mrf.mxu0  ;;  %v2788_v43 = vpop.f32.mrf.mxu1 }
 0x229   :  { %v2837_v36 = vpop.f32.mrf.mxu2 }
 0x22a   :  { %v4664_v32 = vpop.f32.mrf.mxu3 }
 0x22b   :  { %4947 = vst [vmem:[#allocation43_spill] sm:$0xff] %v4664_v32  ;;  %v3339_v32 = vld [vmem:[#allocation3 + $0x22c] sm:$0xf0] }
 0x22f   :  { %v2739_v48 = vpop.f32.mrf.mxu0 }
 0x232   :  { %v4670_v52 = vpop.f32.mrf.mxu3 }
 0x233   :  { %4950 = vst [vmem:[#allocation46_spill] sm:$0xff] %v4670_v52  ;;  %v3342_v52 = vor.u32 %v3720_v42, %v3339_v32 }
 0x237   :  { %2717 = vmatmul.bf16.gmra.mxu3 %v3306_v4  ;;  %v2542_v4 = vadd.f32 %v4530_v35, %v2493_v22  ;;  %v2742_v49 = vpop.f32.mrf.mxu0  ;;  %v4697_v35 = vperm.slane %v3857_v30, 1  ;;  %v2498_v22 = vadd.f32 %v4610_v13, %v4522_v19 }
 0x239   :  { %v2591_v42 = vadd.f32 %v4518_v8, %v2542_v4  ;;  %v2547_v13 = vadd.f32 %v4560_v63, %v2498_v22 }
 0x23a   :  { %v4678_v57 = vpop.f32.mrf.mxu3 }
 0x23b   :  { %4954 = vst [vmem:[#allocation50_spill] sm:$0xff] %v4678_v57  ;;  %v2791_v57 = vpop.f32.mrf.mxu1 }
 0x23f   :  { %v2744_v40 = vpop.f32.mrf.mxu0 }
 0x242   :  { %v4680_v39 = vpop.f32.mrf.mxu3 }
 0x243   :  { %4955 = vst [vmem:[#allocation51_spill] sm:$0xff] %v4680_v39  ;;  %v2495_v39 = vadd.f32 %v4606_v24, %v4511_v54  ;;  %v2793_v8 = vpop.f32.mrf.mxu1 }
 0x245   :  { %v2544_v32 = vadd.f32 %v4543_v9, %v2495_v39  ;;  %v4705_v9 = vld [vmem:[%s4895_s5] ss:$0 sm:$0xff] }
 0x247   :  { %2722 = vmatmul.bf16.gmra.mxu3 %v3342_v52  ;;  %v2840_v52 = vpop.f32.mrf.mxu2  ;;  %v2593_v54 = vadd.f32 %v4528_v31, %v2544_v32  ;;  %v2500_v32 = vadd.f32 %v4618_v33, %v4532_v41  ;;  %v2747_v22 = vpop.f32.mrf.mxu0 }
 0x24a   :  { %v4682_v20 = vpop.f32.mrf.mxu3 }
 0x24b   :  { %4956 = vst [vmem:[#allocation52_spill] sm:$0xff] %v4682_v20  ;;  %v2640_v20 = vadd.f32 %v4547_v21, %v2591_v42  ;;  %v3858_v21 = vld [vmem:[%s4894_s3] sm:$0x3] }
 0x24f   :  { %v2842_v19 = vpop.f32.mrf.mxu2 }
 0x252   :  { %v4687_v10 = vpop.f32.mrf.mxu3 }
 0x25a   :  { %v2688_v12 = vpop.f32.mrf.mxu3 }
 0x25b   :  { %v2689_v50 = vadd.f32 %v2688_v12, %v2640_v20  ;;  %v250_v12 = vmul.f32 %v4697_v35, %v4220_v0  ;;  %v4712_v20 = vperm.slane %v3858_v21, 1  ;;  %v2796_v21 = vpop.f32.mrf.mxu1 }
 0x25d   :  { %v2738_v24 = vadd.f32 %v2737_v62, %v2689_v50  ;;  %v2642_v50 = vadd.f32 %v4564_v6, %v2593_v54  ;;  %v288_v42 = vadd.f32 %v4712_v20, %v250_v12  ;;  %v252_v6 = vmul.f32 %v4697_v35, %v4241_v60 }
 0x25e   :  { %v2549_v54 = vadd.f32 %v4570_v28, %v2500_v32 }
 0x25f   :  { %v2787_v4 = vadd.f32 %v2786_v61, %v2738_v24  ;;  %v4718_v61 = vld [vmem:[%s4896_s6] ss:$0 sm:$0xff] }
 0x260   :  { %v2598_v60 = vadd.f32 %v4553_v55, %v2549_v54  ;;  %v256_v54 = vmul.f32 %v4697_v35, %v4288_v11 }
 0x261   :  { %v2836_v31 = vadd.f32 %v2835_v5, %v2787_v4  ;;  %v2596_v5 = vadd.f32 %v4541_v38, %v2547_v13  ;;  %v2503_v38 = vadd.f32 %v4624_v46, %v4492_v16 }
 0x262   :  { %v2690_v39 = vpop.f32.mrf.mxu3  ;;  %v2647_v16 = vadd.f32 %v4580_v59, %v2598_v60 }
 0x263   :  { %v2879_v0 = vmul.f32 %v4705_v9, %v2836_v31  ;;  %v2691_v62 = vadd.f32 %v2690_v39, %v2642_v50  ;;  %v2645_v12 = vadd.f32 %v4572_v29, %v2596_v5  ;;  %v2845_v50 = vpop.f32.mrf.mxu2  ;;  %v254_v29 = vmul.f32 %v4697_v35, %v4268_v27  ;;  %v2798_v46 = vpop.f32.mrf.mxu1 }
 0x264   :  { %v2505_v27 = vadd.f32 %v4630_v17, %v4503_v34 }
 0x265   :  { %v2899_v30 = vadd.f32 %v4718_v61, %v2879_v0  ;;  %v2740_v63 = vadd.f32 %v2739_v48, %v2691_v62  ;;  %v290_v48 = vadd.f32 %v4712_v20, %v252_v6  ;;  %v2749_v62 = vpop.f32.mrf.mxu0  ;;  %v292_v55 = vadd.f32 %v4712_v20, %v254_v29 }
 0x267   :  { %v2915_v24 = vadd.f32 %v2899_v30, %v288_v42  ;;  %v2789_v4 = vadd.f32 %v2788_v43, %v2740_v63 }
 0x269   :  { %v2838_v31 = vadd.f32 %v2837_v36, %v2789_v4  ;;  %v2552_v36 = vadd.f32 %v4578_v53, %v2503_v38  ;;  %v2931_v42 = vmax.f32 %v2915_v24, 0.0 }
 0x26a   :  { %v2693_v39 = vpop.f32.mrf.mxu3 }
 0x26b   :  { %v2880_v41 = vmul.f32 %v4705_v9, %v2838_v31  ;;  %v2694_v33 = vadd.f32 %v2693_v39, %v2645_v12  ;;  %v2601_v59 = vadd.f32 %v4568_v26, %v2552_v36  ;;  %v2554_v31 = vadd.f32 %v4586_v18, %v2505_v27  ;;  %v2801_v38 = vpop.f32.mrf.mxu1 }
 0x26c   :  { %v294_v26 = vadd.f32 %v4712_v20, %v256_v54 }
 0x26d   :  { %v2900_v43 = vadd.f32 %v4718_v61, %v2880_v41  ;;  %v2743_v13 = vadd.f32 %v2742_v49, %v2694_v33  ;;  %v2650_v39 = vadd.f32 %v4588_v15, %v2601_v59  ;;  %v2752_v34 = vpop.f32.mrf.mxu0  ;;  %v2603_v11 = vadd.f32 %v4576_v51, %v2554_v31 }
 0x26e   :  { %v258_v15 = vmul.f32 %v4697_v35, %v4306_v56 }
 0x26f   :  { %v2916_v0 = vadd.f32 %v2900_v43, %v290_v48  ;;  %v2792_v28 = vadd.f32 %v2791_v57, %v2743_v13  ;;  %v2847_v57 = vpop.f32.mrf.mxu2 }
 0x270   :  { %v296_v51 = vadd.f32 %v4712_v20, %v258_v15 }
 0x271   :  { %v2932_v32 = vmax.f32 %v2916_v0, 0.0  ;;  %v2841_v30 = vadd.f32 %v2840_v52, %v2792_v28 }
 0x272   :  { %v2695_v63 = vpop.f32.mrf.mxu3 }
 0x273   :  { %v3802_v5 = vpack.c.bf16 %v2932_v32, %v2931_v42  ;;  %v2881_v49 = vmul.f32 %v4705_v9, %v2841_v30  ;;  %v2696_v4 = vadd.f32 %v2695_v63, %v2647_v16  ;;  %v260_v63 = vmul.f32 %v4697_v35, %v4324_v37 }
 0x275   :  { %3803 = vst [vmem:[%s4897_s7] sm:$0xff] %v3802_v5   ;;  %v2901_v53 = vadd.f32 %v4718_v61, %v2881_v49  ;;  %v2745_v52 = vadd.f32 %v2744_v40, %v2696_v4  ;;  %v2508_v40 = vadd.f32 %v4636_v1, %v4513_v58  ;;  %v2652_v58 = vadd.f32 %v4598_v2, %v2603_v11  ;;  %v2754_v42 = vpop.f32.mrf.mxu0 }
 0x277   :  { %v2917_v24 = vadd.f32 %v2901_v53, %v292_v55  ;;  %v2794_v6 = vadd.f32 %v2793_v8, %v2745_v52  ;;  %v2850_v18 = vpop.f32.mrf.mxu2  ;;  %v2557_v13 = vadd.f32 %v4596_v7, %v2508_v40  ;;  %v4957_v53 = vld [vmem:[#allocation20_spill] sm:$0xff] }
 0x279   :  { %v2843_v12 = vadd.f32 %v2842_v19, %v2794_v6  ;;  %v2933_v60 = vmax.f32 %v2917_v24, 0.0  ;;  %v2606_v2 = vadd.f32 %v4584_v14, %v2557_v13  ;;  %v298_v14 = vadd.f32 %v4712_v20, %v260_v63  ;;  %v4959_v24 = vld [vmem:[#allocation23_spill] sm:$0xff] }
 0x27a   :  { %v2698_v17 = vpop.f32.mrf.mxu3 }
 0x27b   :  { %v2882_v41 = vmul.f32 %v4705_v9, %v2843_v12  ;;  %v2699_v33 = vadd.f32 %v2698_v17, %v2650_v39 }
 0x27d   :  { %v2902_v8 = vadd.f32 %v4718_v61, %v2882_v41  ;;  %v2748_v48 = vadd.f32 %v2747_v22, %v2699_v33  ;;  %v2757_v37 = vpop.f32.mrf.mxu0 }
 0x27f   :  { %v2918_v19 = vadd.f32 %v2902_v8, %v294_v26  ;;  %v2797_v43 = vadd.f32 %v2796_v21, %v2748_v48  ;;  %v2510_v21 = vadd.f32 %v4644_v25, %v4524_v3  ;;  %v2852_v16 = vpop.f32.mrf.mxu2  ;;  %v2655_v3 = vadd.f32 %v4604_v47, %v2606_v2  ;;  %v4962_v8 = vld [vmem:[#allocation40_spill] sm:$0xff]  ;;  %v4967_v2 = vld [vmem:[#allocation15_spill] sm:$0xff] }
 0x281   :  { %v2934_v0 = vmax.f32 %v2918_v19, 0.0  ;;  %v2846_v28 = vadd.f32 %v2845_v50, %v2797_v43  ;;  %v2803_v50 = vpop.f32.mrf.mxu1  ;;  %v2559_v5 = vadd.f32 %v4602_v44, %v2510_v21  ;;  %v4963_v19 = vld [vmem:[#allocation24_spill] sm:$0xff] }
 0x282   :  { %v2700_v1 = vpop.f32.mrf.mxu3 }
 0x283   :  { %v3807_v29 = vpack.c.bf16 %v2934_v0, %v2933_v60  ;;  %v2883_v36 = vmul.f32 %v4705_v9, %v2846_v28  ;;  %v2701_v22 = vadd.f32 %v2700_v1, %v2652_v58  ;;  %v2608_v52 = vadd.f32 %v4957_v53, %v2559_v5  ;;  %v4964_v0 = vld [vmem:[#allocation5_spill] sm:$0xff]  ;;  %v4965_v58 = vld [vmem:[#allocation26_spill] sm:$0xff] }
 0x284   :  { %v264_v28 = vmul.f32 %v4697_v35, %v4964_v0  ;;  %v4979_v0 = vld [vmem:[#allocation17_spill] sm:$0xff] }
 0x285   :  { %3839 = vst [vmem:[%s4897_s7 + $0x8] sm:$0xff] %v3807_v29   ;;  %v2903_v56 = vadd.f32 %v4718_v61, %v2883_v36  ;;  %v2750_v7 = vadd.f32 %v2749_v62, %v2701_v22  ;;  %v2513_v62 = vadd.f32 %v4652_v23, %v4534_v45  ;;  %v4960_v45 = vld [vmem:[#allocation22_spill] sm:$0xff]  ;;  %v2759_v60 = vpop.f32.mrf.mxu0  ;;  %v4966_v36 = vld [vmem:[#allocation25_spill] sm:$0xff] }
 0x286   :  { %v2657_v23 = vadd.f32 %v4960_v45, %v2608_v52  ;;  %v4972_v52 = vld [vmem:[#allocation28_spill] sm:$0xff] }
 0x287   :  { %v2919_v32 = vadd.f32 %v2903_v56, %v296_v51  ;;  %v2799_v30 = vadd.f32 %v2798_v46, %v2750_v7  ;;  %v2562_v6 = vadd.f32 %v4959_v24, %v2513_v62  ;;  %v2855_v17 = vpop.f32.mrf.mxu2  ;;  %v4971_v62 = vld [vmem:[#allocation29_spill] sm:$0xff] }
 0x289   :  { %v2848_v49 = vadd.f32 %v2847_v57, %v2799_v30  ;;  %v4958_v57 = vld [vmem:[#allocation4_spill] sm:$0xff]  ;;  %v2806_v54 = vpop.f32.mrf.mxu1  ;;  %v2935_v31 = vmax.f32 %v2919_v32, 0.0  ;;  %v2611_v43 = vadd.f32 %v4963_v19, %v2562_v6 }
 0x28a   :  { %v2703_v25 = vpop.f32.mrf.mxu3  ;;  %v262_v47 = vmul.f32 %v4697_v35, %v4958_v57 }
 0x28b   :  { %v2884_v4 = vmul.f32 %v4705_v9, %v2848_v49  ;;  %v2704_v55 = vadd.f32 %v2703_v25, %v2655_v3  ;;  %v2660_v22 = vadd.f32 %v4966_v36, %v2611_v43  ;;  %v4969_v49 = vld [vmem:[#allocation27_spill] sm:$0xff] }
 0x28c   :  { %v300_v26 = vadd.f32 %v4712_v20, %v262_v47 }
 0x28d   :  { %v2904_v46 = vadd.f32 %v4718_v61, %v2884_v4  ;;  %v2753_v27 = vadd.f32 %v2752_v34, %v2704_v55  ;;  %v4970_v4 = vld [vmem:[#allocation6_spill] sm:$0xff] }
 0x28e   :  { %v266_v55 = vmul.f32 %v4697_v35, %v4970_v4 }
 0x28f   :  { %v2920_v59 = vadd.f32 %v2904_v46, %v298_v14  ;;  %v2802_v44 = vadd.f32 %v2801_v38, %v2753_v27  ;;  %v4961_v38 = vld [vmem:[#allocation14_spill] sm:$0xff]  ;;  %v2857_v30 = vpop.f32.mrf.mxu2 }
 0x290   :  { %v2515_v48 = vadd.f32 %v4962_v8, %v4961_v38  ;;  %v304_v6 = vadd.f32 %v4712_v20, %v266_v55  ;;  %v4977_v8 = vld [vmem:[#allocation32_spill] sm:$0xff] }
 0x291   :  { %v2936_v12 = vmax.f32 %v2920_v59, 0.0  ;;  %v2851_v39 = vadd.f32 %v2850_v18, %v2802_v44  ;;  %v2808_v51 = vpop.f32.mrf.mxu1  ;;  %v2762_v44 = vpop.f32.mrf.mxu0 }
 0x292   :  { %v2705_v41 = vpop.f32.mrf.mxu3  ;;  %v2564_v1 = vadd.f32 %v4965_v58, %v2515_v48 }
 0x293   :  { %v3812_v33 = vpack.c.bf16 %v2936_v12, %v2935_v31  ;;  %v2885_v34 = vmul.f32 %v4705_v9, %v2851_v39  ;;  %v2706_v40 = vadd.f32 %v2705_v41, %v2657_v23  ;;  %v4974_v12 = vld [vmem:[#allocation46_spill] sm:$0xff] }
 0x294   :  { %v2613_v3 = vadd.f32 %v4969_v49, %v2564_v1 }
 0x295   :  { %3840 = vst [vmem:[%s4897_s7 + $0x10] sm:$0xff] %v3812_v33   ;;  %v2905_v11 = vadd.f32 %v4718_v61, %v2885_v34  ;;  %v2755_v18 = vadd.f32 %v2754_v42, %v2706_v40  ;;  %v4968_v42 = vld [vmem:[#allocation43_spill] sm:$0xff] }
 0x296   :  { %v2518_v32 = vadd.f32 %v4968_v42, %v4967_v2  ;;  %v2662_v59 = vadd.f32 %v4972_v52, %v2613_v3  ;;  %v4982_v2 = vld [vmem:[#allocation8_spill] sm:$0xff]  ;;  %v4984_v3 = vld [vmem:[#allocation34_spill] sm:$0xff] }
 0x297   :  { %v2921_v15 = vadd.f32 %v2905_v11, %v300_v26  ;;  %v2804_v13 = vadd.f32 %v2803_v50, %v2755_v18  ;;  %v302_v50 = vadd.f32 %v4712_v20, %v264_v28  ;;  %v2860_v33 = vpop.f32.mrf.mxu2  ;;  %v4976_v26 = vld [vmem:[#allocation7_spill] sm:$0xff]  ;;  %v4980_v28 = vld [vmem:[#allocation50_spill] sm:$0xff]  ;;  %v270_v42 = vmul.f32 %v4697_v35, %v4982_v2 }
 0x298   :  { %v2567_v14 = vadd.f32 %v4971_v62, %v2518_v32  ;;  %v268_v38 = vmul.f32 %v4697_v35, %v4976_v26  ;;  %v4978_v18 = vld [vmem:[#allocation31_spill] sm:$0xff] }
 0x299   :  { %v2853_v29 = vadd.f32 %v2852_v16, %v2804_v13  ;;  %v2937_v46 = vmax.f32 %v2921_v15, 0.0  ;;  %v2811_v31 = vpop.f32.mrf.mxu1  ;;  %v2764_v58 = vpop.f32.mrf.mxu0  ;;  %v4983_v32 = vld [vmem:[#allocation35_spill] sm:$0xff] }
 0x29a   :  { %v2708_v21 = vpop.f32.mrf.mxu3  ;;  %v306_v1 = vadd.f32 %v4712_v20, %v268_v38  ;;  %v4991_v26 = vld [vmem:[#allocation19_spill] sm:$0xff]  ;;  %v4992_v38 = vld [vmem:[#allocation52_spill] sm:$0xff] }
 0x29b   :  { %v2886_v56 = vmul.f32 %v4705_v9, %v2853_v29  ;;  %v2709_v7 = vadd.f32 %v2708_v21, %v2660_v22  ;;  %v4981_v22 = vld [vmem:[#allocation33_spill] sm:$0xff] }
 0x29d   :  { %v2906_v63 = vadd.f32 %v4718_v61, %v2886_v56  ;;  %v2758_v5 = vadd.f32 %v2757_v37, %v2709_v7 }
 0x29f   :  { %v2922_v25 = vadd.f32 %v2906_v63, %v302_v50  ;;  %v2807_v16 = vadd.f32 %v2806_v54, %v2758_v5  ;;  %v4973_v54 = vld [vmem:[#allocation16_spill] sm:$0xff]  ;;  %v2862_v50 = vpop.f32.mrf.mxu2 }
 0x2a0   :  { %v2520_v39 = vadd.f32 %v4974_v12, %v4973_v54  ;;  %v4989_v12 = vld [vmem:[#allocation38_spill] sm:$0xff] }
 0x2a1   :  { %v2938_v27 = vmax.f32 %v2922_v25, 0.0  ;;  %v2856_v53 = vadd.f32 %v2855_v17, %v2807_v16  ;;  %v4975_v17 = vld [vmem:[#allocation30_spill] sm:$0xff]  ;;  %v2813_v21 = vpop.f32.mrf.mxu1 }
 0x2a2   :  { %v2710_v57 = vpop.f32.mrf.mxu3  ;;  %v2616_v41 = vadd.f32 %v4975_v17, %v2567_v14  ;;  %v2569_v48 = vadd.f32 %v4977_v8, %v2520_v39  ;;  %v308_v14 = vadd.f32 %v4712_v20, %v270_v42  ;;  %v2528_v8 = vadd.f32 %v4992_v38, %v4991_v26  ;;  %v5004_v26 = vld [vmem:[#allocation49_spill] sm:$0xff] }
 0x2a3   :  { %v3817_v47 = vpack.c.bf16 %v2938_v27, %v2937_v46  ;;  %v2887_v24 = vmul.f32 %v4705_v9, %v2856_v53  ;;  %v2711_v37 = vadd.f32 %v2710_v57, %v2662_v59  ;;  %v4985_v46 = vld [vmem:[#allocation18_spill] sm:$0xff]  ;;  %v4986_v27 = vld [vmem:[#allocation51_spill] sm:$0xff] }
 0x2a4   :  { %v2665_v19 = vadd.f32 %v4978_v18, %v2616_v41  ;;  %v2525_v53 = vadd.f32 %v4986_v27, %v4985_v46  ;;  %v5000_v46 = vld [vmem:[#allocation47_spill] sm:$0xff] }
 0x2a5   :  { %3841 = vst [vmem:[%s4897_s7 + $0x18] sm:$0xff] %v3817_v47   ;;  %v2907_v45 = vadd.f32 %v4718_v61, %v2887_v24  ;;  %v2760_v23 = vadd.f32 %v2759_v60, %v2711_v37  ;;  %v2523_v60 = vadd.f32 %v4980_v28, %v4979_v0  ;;  %v2767_v47 = vpop.f32.mrf.mxu0  ;;  %v4994_v0 = vld [vmem:[#allocation10_spill] sm:$0xff] }
 0x2a6   :  { %v2574_v39 = vadd.f32 %v4989_v12, %v2525_v53  ;;  %v274_v28 = vmul.f32 %v4697_v35, %v4994_v0 }
 0x2a7   :  { %v2923_v34 = vadd.f32 %v2907_v45, %v304_v6  ;;  %v2809_v40 = vadd.f32 %v2808_v51, %v2760_v23  ;;  %v2618_v51 = vadd.f32 %v4981_v22, %v2569_v48  ;;  %v4990_v23 = vld [vmem:[#allocation37_spill] sm:$0xff]  ;;  %v2865_v41 = vpop.f32.mrf.mxu2 }
 0x2a9   :  { %v2858_v11 = vadd.f32 %v2857_v30, %v2809_v40  ;;  %v2572_v30 = vadd.f32 %v4983_v32, %v2523_v60  ;;  %v2939_v63 = vmax.f32 %v2923_v34, 0.0  ;;  %v2667_v25 = vadd.f32 %v4984_v3, %v2618_v51  ;;  %v2816_v6 = vpop.f32.mrf.mxu1  ;;  %v4995_v60 = vld [vmem:[#allocation42_spill] sm:$0xff]  ;;  %v4996_v51 = vld [vmem:[#allocation41_spill] sm:$0xff] }
 0x2aa   :  { %v2713_v43 = vpop.f32.mrf.mxu3 }
 0x2ab   :  { %v2888_v15 = vmul.f32 %v4705_v9, %v2858_v11  ;;  %v2714_v13 = vadd.f32 %v2713_v43, %v2665_v19  ;;  %v4993_v19 = vld [vmem:[#allocation39_spill] sm:$0xff] }
 0x2ac   :  { %v2623_v43 = vadd.f32 %v4993_v19, %v2574_v39 }
 0x2ad   :  { %v2908_v29 = vadd.f32 %v4718_v61, %v2888_v15  ;;  %v2763_v36 = vadd.f32 %v2762_v44, %v2714_v13  ;;  %v4987_v44 = vld [vmem:[#allocation36_spill] sm:$0xff] }
 0x2ae   :  { %v2621_v57 = vadd.f32 %v4987_v44, %v2572_v30  ;;  %v312_v30 = vadd.f32 %v4712_v20, %v274_v28 }
 0x2af   :  { %v2924_v56 = vadd.f32 %v2908_v29, %v306_v1  ;;  %v2812_v7 = vadd.f32 %v2811_v31, %v2763_v36  ;;  %v4988_v31 = vld [vmem:[#allocation9_spill] sm:$0xff]  ;;  %v2769_v1 = vpop.f32.mrf.mxu0 }
 0x2b0   :  { %v272_v54 = vmul.f32 %v4697_v35, %v4988_v31  ;;  %v2670_v17 = vadd.f32 %v4990_v23, %v2621_v57 }
 0x2b1   :  { %v2940_v5 = vmax.f32 %v2924_v56, 0.0  ;;  %v2861_v49 = vadd.f32 %v2860_v33, %v2812_v7  ;;  %v2818_v56 = vpop.f32.mrf.mxu1 }
 0x2b2   :  { %v2715_v16 = vpop.f32.mrf.mxu3  ;;  %v310_v48 = vadd.f32 %v4712_v20, %v272_v54  ;;  %v5002_v54 = vld [vmem:[#allocation48_spill] sm:$0xff] }
 0x2b3   :  { %v3822_v4 = vpack.c.bf16 %v2940_v5, %v2939_v63  ;;  %v2889_v55 = vmul.f32 %v4705_v9, %v2861_v49  ;;  %v2716_v62 = vadd.f32 %v2715_v16, %v2667_v25  ;;  %v4997_v63 = vld [vmem:[#allocation21_spill] sm:$0xff]  ;;  %v4998_v25 = vld [vmem:[#allocation44_spill] sm:$0xff] }
 0x2b4   :  { %v2530_v5 = vadd.f32 %v4687_v10, %v4997_v63 }
 0x2b5   :  { %3842 = vst [vmem:[%s4897_s7 + $0x20] sm:$0xff] %v3822_v4   ;;  %v2909_v52 = vadd.f32 %v4718_v61, %v2889_v55  ;;  %v2765_v59 = vadd.f32 %v2764_v58, %v2716_v62  ;;  %v2577_v58 = vadd.f32 %v4995_v60, %v2528_v8  ;;  %v4999_v62 = vld [vmem:[#allocation11_spill] sm:$0xff] }
 0x2b6   :  { %v2579_v27 = vadd.f32 %v5000_v46, %v2530_v5 }
 0x2b7   :  { %v2925_v24 = vadd.f32 %v2909_v52, %v308_v14  ;;  %v2814_v37 = vadd.f32 %v2813_v21, %v2765_v59  ;;  %v2672_v21 = vadd.f32 %v4996_v51, %v2623_v43  ;;  %v2626_v16 = vadd.f32 %v4998_v25, %v2577_v58  ;;  %v5001_v52 = vld [vmem:[#allocation45_spill] sm:$0xff]  ;;  %v2772_v10 = vpop.f32.mrf.mxu0 }
 0x2b8   :  { %v276_v14 = vmul.f32 %v4697_v35, %v4999_v62  ;;  %v2628_v12 = vadd.f32 %v5002_v54, %v2579_v27 }
 0x2b9   :  { %v2863_v45 = vadd.f32 %v2862_v50, %v2814_v37  ;;  %v2941_v29 = vmax.f32 %v2925_v24, 0.0  ;;  %v2867_v50 = vpop.f32.mrf.mxu2  ;;  %v2675_v59 = vadd.f32 %v5001_v52, %v2626_v16  ;;  %v2821_v24 = vpop.f32.mrf.mxu1 }
 0x2ba   :  { %v2718_v33 = vpop.f32.mrf.mxu3  ;;  %v314_v37 = vadd.f32 %v4712_v20, %v276_v14  ;;  %v2677_v38 = vadd.f32 %v5004_v26, %v2628_v12 }
 0x2bb   :  { %v2890_v34 = vmul.f32 %v4705_v9, %v2863_v45  ;;  %v2719_v40 = vadd.f32 %v2718_v33, %v2670_v17  ;;  %v5003_v17 = vld [vmem:[#allocation12_spill] sm:$0xff] }
 0x2bd   :  { %v2910_v11 = vadd.f32 %v4718_v61, %v2890_v34  ;;  %v2768_v18 = vadd.f32 %v2767_v47, %v2719_v40 }
 0x2bf   :  { %v2926_v15 = vadd.f32 %v2910_v11, %v310_v48  ;;  %v2817_v13 = vadd.f32 %v2816_v6, %v2768_v18  ;;  %v2774_v19 = vpop.f32.mrf.mxu0 }
 0x2c1   :  { %v2942_v36 = vmax.f32 %v2926_v15, 0.0  ;;  %v2866_v22 = vadd.f32 %v2865_v41, %v2817_v13  ;;  %v2870_v39 = vpop.f32.mrf.mxu2  ;;  %v278_v41 = vmul.f32 %v4697_v35, %v5003_v17  ;;  %v2823_v0 = vpop.f32.mrf.mxu1 }
 0x2c2   :  { %v2720_v7 = vpop.f32.mrf.mxu3 }
 0x2c3   :  { %v3827_v2 = vpack.c.bf16 %v2942_v36, %v2941_v29  ;;  %v2891_v42 = vmul.f32 %v4705_v9, %v2866_v22  ;;  %v2721_v32 = vadd.f32 %v2720_v7, %v2672_v21  ;;  %v316_v43 = vadd.f32 %v4712_v20, %v278_v41 }
 0x2c5   :  { %3843 = vst [vmem:[%s4897_s7 + $0x28] sm:$0xff] %v3827_v2   ;;  %v2911_v49 = vadd.f32 %v4718_v61, %v2891_v42  ;;  %v2770_v3 = vadd.f32 %v2769_v1, %v2721_v32  ;;  %v5005_v1 = vld [vmem:[#allocation13_spill] sm:$0xff] }
 0x2c6   :  { %v280_v29 = vmul.f32 %v4697_v35, %v5005_v1 }
 0x2c7   :  { %v2927_v4 = vadd.f32 %v2911_v49, %v312_v30  ;;  %v2819_v55 = vadd.f32 %v2818_v56, %v2770_v3 }
 0x2c8   :  { %v318_v51 = vadd.f32 %v4712_v20, %v280_v29 }
 0x2c9   :  { %v2868_v53 = vadd.f32 %v2867_v50, %v2819_v55  ;;  %v2943_v33 = vmax.f32 %v2927_v4, 0.0  ;;  %v2872_v58 = vpop.f32.mrf.mxu2 }
 0x2ca   :  { %v2723_v44 = vpop.f32.mrf.mxu3 }
 0x2cb   :  { %v2892_v57 = vmul.f32 %v4705_v9, %v2868_v53  ;;  %v2724_v47 = vadd.f32 %v2723_v44, %v2675_v59 }
 0x2cd   :  { %v2912_v6 = vadd.f32 %v4718_v61, %v2892_v57  ;;  %v2773_v31 = vadd.f32 %v2772_v10, %v2724_v47 }
 0x2cf   :  { %v2928_v45 = vadd.f32 %v2912_v6, %v314_v37  ;;  %v2822_v23 = vadd.f32 %v2821_v24, %v2773_v31 }
 0x2d1   :  { %v2944_v34 = vmax.f32 %v2928_v45, 0.0  ;;  %v2871_v40 = vadd.f32 %v2870_v39, %v2822_v23 }
 0x2d2   :  { %v2725_v8 = vpop.f32.mrf.mxu3 }
 0x2d3   :  { %v3832_v48 = vpack.c.bf16 %v2944_v34, %v2943_v33  ;;  %v2893_v11 = vmul.f32 %v4705_v9, %v2871_v40  ;;  %v2726_v18 = vadd.f32 %v2725_v8, %v2677_v38 }
 0x2d5   :  { %3844 = vst [vmem:[%s4897_s7 + $0x30] sm:$0xff] %v3832_v48   ;;  %v2913_v15 = vadd.f32 %v4718_v61, %v2893_v11  ;;  %v2775_v13 = vadd.f32 %v2774_v19, %v2726_v18 }
 0x2d7   :  { %v2929_v28 = vadd.f32 %v2913_v15, %v316_v43  ;;  %v2824_v60 = vadd.f32 %v2823_v0, %v2775_v13 }
 0x2d9   :  { %v2873_v36 = vadd.f32 %v2872_v58, %v2824_v60  ;;  %v2945_v7 = vmax.f32 %v2929_v28, 0.0 }
 0x2db   :  { %v2894_v22 = vmul.f32 %v4705_v9, %v2873_v36 }
 0x2dd   :  { %v2914_v21 = vadd.f32 %v4718_v61, %v2894_v22 }
 0x2df   :  { %v2930_v56 = vadd.f32 %v2914_v21, %v318_v51 }
 0x2e1   :  { %v2946_v2 = vmax.f32 %v2930_v56, 0.0 }
 0x2e3   :  { %v3837_v42 = vpack.c.bf16 %v2946_v2, %v2945_v7 }
 0x2e5   :  { %3845 = vst [vmem:[%s4897_s7 + $0x38] sm:$0xff] %v3837_v42  }

</bundles_post_ra>
